<compile_context>
chip_gen: v6e
topology: v6e:2x2x1
jax: 0.10.0
libtpu: 0.0.40
codegen_flags: <defaults>
</compile_context>

<pallas_src>
import functools

import jax
import jax.numpy as jnp
import numpy as np
from jax.experimental import pallas as pl
from jax.experimental.pallas import tpu as pltpu

KSIZE = 4          # Conv1d kernel_size
PAD = 1            # Conv1d padding
C_OUT = 128        # Conv1d out_channels == LayerNorm size
LN_EPS = 1e-5      # torch.nn.LayerNorm default eps


def _reward_kernel(x_ref, wall_ref, bconv_ref, gamma_ref, beta_ref,
                   wlin_ref, blin_ref, out_ref, m_sc, carry_sc, *, chunk):
    """One (b_tile, s_tile) grid step of the fused regressor head.

    x_ref     : [B_t, T, H]        hidden-state tile (native dtype; rows s*T..s*T+T-1)
    wall_ref  : [H, 4*C_OUT]       bf16 concatenated conv taps [W0|W1|W2|W3]
    bconv_ref : [1, C_OUT]         f32 conv bias
    gamma_ref : [1, C_OUT]         f32 LayerNorm weight
    beta_ref  : [1, C_OUT]         f32 LayerNorm bias
    wlin_ref  : [1, C_OUT]         f32 final linear weight row
    blin_ref  : [1, 1]             f32 final linear bias
    out_ref   : [B_t, 1]           f32 output (written on last S tile only)
    m_sc      : [B_t, C_OUT]       f32 running max-pool accumulator (scratch)
    carry_sc  : [3, B_t, C_OUT]    f32 cross-chunk partial conv sums (scratch)
    """
    s = pl.program_id(1)
    ns = pl.num_programs(1)
    Bt, T, H = x_ref.shape
    n_chunks = T // chunk          # static

    @pl.when(s == 0)
    def _():
        m_sc[...] = jnp.full_like(m_sc, -jnp.inf)
        carry_sc[...] = jnp.zeros_like(carry_sc)

    w_all = wall_ref[...]          # [H, 4*C_OUT] bf16, resident across the grid

    # Short static chunk loop (n_chunks <= 4): keeps the f32 tap temporaries
    # at O(B_t * chunk * 512) instead of O(B_t * T * 512).
    for c in range(n_chunks):
        C = chunk
        # Cast to bf16 in-kernel, right before the MXU (no extra HBM pass).
        xf = x_ref[:, c * C:(c + 1) * C, :].astype(jnp.bfloat16)
        xf = xf.reshape(Bt * C, H)
        # y[b, i, k*128:(k+1)*128] = x[base+i] @ W_k, f32 accumulation.
        y = jnp.dot(xf, w_all, preferred_element_type=jnp.float32)
        y = y.reshape(Bt, C, KSIZE * C_OUT)
        y0 = y[:, :, 0 * C_OUT:1 * C_OUT]
        y1 = y[:, :, 1 * C_OUT:2 * C_OUT]
        y2 = y[:, :, 2 * C_OUT:3 * C_OUT]
        y3 = y[:, :, 3 * C_OUT:4 * C_OUT]

        # Interior conv outputs fully contained in this chunk:
        # conv[base+1+j] = y0[j] + y1[j+1] + y2[j+2] + y3[j+3], j in [0, C-4].
        interior = (y0[:, 0:C - 3, :] + y1[:, 1:C - 2, :] +
                    y2[:, 2:C - 1, :] + y3[:, 3:C, :])
        m = jnp.maximum(m_sc[...], jnp.max(interior, axis=1))

        # Complete the 3 conv outputs straddling the previous seam
        # (t = base-2, base-1, base).
        prev0 = carry_sc[0] + y3[:, 0, :]
        prev1 = carry_sc[1] + y2[:, 0, :] + y3[:, 1, :]
        prev2 = carry_sc[2] + y1[:, 0, :] + y2[:, 1, :] + y3[:, 2, :]
        p01 = jnp.maximum(prev0, prev1)
        if c == 0:
            # Global-first chunk: t = -2, -1 do not exist; t = 0 is exact
            # because the carry is zero-initialized (left zero-pad row).
            p01 = jnp.where(s == 0, jnp.full_like(p01, -jnp.inf), p01)
        m = jnp.maximum(m, jnp.maximum(p01, prev2))

        # New carry: partial sums for the 3 outputs straddling the next seam.
        c0 = y0[:, C - 3, :] + y1[:, C - 2, :] + y2[:, C - 1, :]
        c1 = y0[:, C - 2, :] + y1[:, C - 1, :]
        c2 = y0[:, C - 1, :]
        carry_sc[0] = c0
        carry_sc[1] = c1
        carry_sc[2] = c2

        if c == n_chunks - 1:
            # Global-last chunk: c0 is the final conv output t = S-2 (the
            # right zero-pad row contributes 0), already complete -> fold it.
            m = jnp.where(s == ns - 1, jnp.maximum(m, c0), m)
        m_sc[...] = m

    # --- epilogue on the last S tile only ---------------------------------
    @pl.when(s == ns - 1)
    def _():
        pooled = m_sc[...] + bconv_ref[...]          # bias after max (equivalent)
        mean = jnp.mean(pooled, axis=-1, keepdims=True)
        cent = pooled - mean
        var = jnp.mean(cent * cent, axis=-1, keepdims=True)
        normed = cent * jax.lax.rsqrt(var + LN_EPS)
        normed = normed * gamma_ref[...] + beta_ref[...]
        # exact (erf) GELU, matching torch.nn.GELU() default.
        g = 0.5 * normed * (1.0 + jax.lax.erf(normed * (1.0 / np.sqrt(2.0))))
        # Dropout(0.25): identity in eval mode.
        # Linear(128 -> 1) as a lane reduction (avoids an N=1 MXU pass).
        out = jnp.sum(g * wlin_ref[...], axis=-1, keepdims=True) + blin_ref[...]
        out_ref[...] = out.astype(out_ref.dtype)


def prepare_params(params):
    """One-time conversion of torch-layout params to kernel layout (hoisted)."""
    c, h, k = params['conv_w'].shape            # [C_OUT, H, K]
    # W_all[h, k*C_OUT + c] = conv_w[c, h, k]  -> [H, K*C_OUT]
    w_all = jnp.transpose(params['conv_w'], (1, 2, 0)).reshape(h, k * c)
    return {
        'w_all': w_all.astype(jnp.bfloat16),
        'conv_b': params['conv_b'].reshape(1, C_OUT).astype(jnp.float32),
        'ln_w': params['ln_w'].reshape(1, C_OUT).astype(jnp.float32),
        'ln_b': params['ln_b'].reshape(1, C_OUT).astype(jnp.float32),
        'lin_w': params['lin_w'].reshape(1, C_OUT).astype(jnp.float32),
        'lin_b': params['lin_b'].reshape(1, 1).astype(jnp.float32),
    }


def _largest_mult8_divisor(n, cap):
    """Largest multiple-of-8 divisor of n that is <= cap, or None."""
    for cand in range(min(cap, n), 7, -1):
        if cand % 8 == 0 and n % cand == 0:
            return cand
    return None


def _device_caps():
    """(s_tile_target, vmem_cap_bytes) per TPU generation (safe fallback)."""
    try:
        kind = jax.devices()[0].device_kind.lower()
    except Exception:
        kind = ""
    if "v5" in kind or "v6" in kind:
        return 512, 96 << 20      # 128 MiB physical VMEM -> roomy cap
    return 256, 56 << 20          # v7x / unknown: 64 MiB per TC -> conservative


def story_reward_head(hidden_states, prep, *, s_tile=None, b_tile=None, chunk=128):
    """hidden_states: [B, S, H] (frozen BERT output, f32 or bf16). Returns [B] f32."""
    B, S, H = hidden_states.shape
    assert S >= 4, "sequence too short for Conv1d(k=4, pad=1) + max-pool head"

    s_tile_target, vmem_cap = _device_caps()
    if s_tile is None:
        s_tile = s_tile_target
    # Largest multiple-of-8 divisor of S <= target (never full-extent unless forced).
    s_tile = _largest_mult8_divisor(S, min(s_tile, S)) or S
    # In-kernel compute chunk must divide s_tile (and be >= 4).
    chunk = _largest_mult8_divisor(s_tile, min(chunk, s_tile)) or s_tile

    if b_tile is None:
        # Prefer nb >= 2 so the batch axis can shard across the 2 v7x TCs,
        # while keeping the sublane-layout constraint (b_tile % 8 == 0 or == B).
        b_tile = 8 if (B % 8 == 0 and B >= 16) else B
    if B % b_tile != 0 or (b_tile % 8 != 0 and b_tile != B):
        b_tile = B
    nb, ns = B // b_tile, S // s_tile

    w_all = prep['w_all']
    assert w_all.shape == (H, KSIZE * C_OUT)

    # VMEM budget from real tile/temporary sizes (+ headroom), capped per chip.
    itemsize = jnp.dtype(hidden_states.dtype).itemsize
    x_tile_bytes = b_tile * s_tile * H * itemsize            # per buffer
    w_bytes = H * KSIZE * C_OUT * 2                          # bf16 weights
    y_chunk_bytes = b_tile * chunk * KSIZE * C_OUT * 4       # f32 tap tensor / chunk
    n_chunks = s_tile // chunk
    temp_bytes = 4 * y_chunk_bytes * min(n_chunks, 2)        # chunk temps + slack
    scratch_bytes = 4 * b_tile * C_OUT * 4 * 8
    need = 2 * x_tile_bytes + 2 * w_bytes + temp_bytes + scratch_bytes + (4 << 20)
    vmem_limit = int(min(max(need, 16 << 20), vmem_cap))

    cost = pl.CostEstimate(
        flops=2 * B * S * H * KSIZE * C_OUT + 4 * B * C_OUT,
        transcendentals=B * C_OUT,
        bytes_accessed=int(B * S * H * itemsize + w_all.size * 2 + B * 4),
    )

    kernel = functools.partial(_reward_kernel, chunk=chunk)

    out = pl.pallas_call(
        kernel,
        out_shape=jax.ShapeDtypeStruct((B, 1), jnp.float32),
        grid=(nb, ns),
        in_specs=[
            pl.BlockSpec((b_tile, s_tile, H), lambda b, s: (b, s, 0)),
            # weights / params: constant index_map -> resident across the grid
            pl.BlockSpec((H, KSIZE * C_OUT), lambda b, s: (0, 0)),
            pl.BlockSpec((1, C_OUT), lambda b, s: (0, 0)),
            pl.BlockSpec((1, C_OUT), lambda b, s: (0, 0)),
            pl.BlockSpec((1, C_OUT), lambda b, s: (0, 0)),
            pl.BlockSpec((1, C_OUT), lambda b, s: (0, 0)),
            pl.BlockSpec((1, 1), lambda b, s: (0, 0)),
        ],
        out_specs=pl.BlockSpec((b_tile, 1), lambda b, s: (b, 0)),
        scratch_shapes=[
            pltpu.VMEM((b_tile, C_OUT), jnp.float32),       # running max
            pltpu.VMEM((3, b_tile, C_OUT), jnp.float32),    # cross-chunk carry
        ],
        compiler_params=pltpu.CompilerParams(
            dimension_semantics=("parallel", "arbitrary"),
            vmem_limit_bytes=vmem_limit),
        cost_estimate=cost,
    )(hidden_states, w_all, prep['conv_b'], prep['ln_w'], prep['ln_b'],
      prep['lin_w'], prep['lin_b'])
    return out[:, 0]                                 # .squeeze(-1)


def _reference(hidden_states, params):
    """Pure-JAX reference of the regressor head (bf16-quantized conv inputs)."""
    x = hidden_states.astype(jnp.bfloat16).astype(jnp.float32)
    w = params['conv_w'].astype(jnp.bfloat16).astype(jnp.float32)
    xp = jnp.pad(x, ((0, 0), (PAD, PAD), (0, 0)))
    B, S_pad, H = xp.shape
    L_out = S_pad - KSIZE + 1
    wk = jnp.transpose(w, (2, 1, 0))                 # [K, H, C_OUT]
    acc = jnp.zeros((B, L_out, C_OUT), jnp.float32)
    for k in range(KSIZE):
        acc = acc + jnp.einsum('btd,do->bto', xp[:, k:k + L_out, :], wk[k],
                               preferred_element_type=jnp.float32)
    acc = acc + params['conv_b'][None, None, :]
    pooled = jnp.max(acc, axis=1)
    mean = jnp.mean(pooled, axis=-1, keepdims=True)
    var = jnp.mean((pooled - mean) ** 2, axis=-1, keepdims=True)
    normed = (pooled - mean) * jax.lax.rsqrt(var + LN_EPS)
    normed = normed * params['ln_w'] + params['ln_b']
    g = jax.nn.gelu(normed, approximate=False)
    return (g @ params['lin_w'].T + params['lin_b'])[:, 0]


def init_params(key, hidden_size):
    ks = jax.random.split(key, 4)
    return {
        # torch Conv1d weight layout: [out_channels, in_channels, kernel_size]
        'conv_w': 0.05 * jax.random.normal(ks[0], (C_OUT, hidden_size, KSIZE),
                                           jnp.float32),
        'conv_b': 0.01 * jax.random.normal(ks[1], (C_OUT,), jnp.float32),
        'ln_w': jnp.ones((C_OUT,), jnp.float32),
        'ln_b': jnp.zeros((C_OUT,), jnp.float32),
        # torch Linear weight layout: [out_features, in_features]
        'lin_w': 0.05 * jax.random.normal(ks[2], (1, C_OUT), jnp.float32),
        'lin_b': 0.01 * jax.random.normal(ks[3], (1,), jnp.float32),
    }


if __name__ == "__main__":
    key = jax.random.PRNGKey(0)
    k_h, k_p = jax.random.split(key)

    # Small synthetic shapes; S=512 with s_tile=256 / chunk=128 exercises both
    # the in-kernel chunk-seam carry and the grid-tile-seam carry.
    B, S, H = 2, 512, 256
    hidden_states = jax.random.normal(k_h, (B, S, H), jnp.float32)
    params = init_params(k_p, H)
    prep = prepare_params(params)

    fwd = jax.jit(lambda x_, p_: story_reward_head(x_, p_, s_tile=256, chunk=128))
    out = jax.block_until_ready(fwd(hidden_states, prep))

    ref = jax.block_until_ready(_reference(hidden_states, params))
    assert out.shape == (B,)
    np.testing.assert_allclose(np.asarray(out), np.asarray(ref),
                               rtol=2e-2, atol=2e-2)
    print("KERNEL_OK")
</pallas_src>

<mosaic_0001>
module attributes {stable_mosaic.version = 11 : i64} {
  func.func @_reward_kernel(%arg0: i32, %arg1: i32, %arg2: memref<2x256x256xf32, #tpu.memory_space<vmem>>, %arg3: memref<256x512xbf16, #tpu.memory_space<vmem>>, %arg4: memref<1x128xf32, #tpu.memory_space<vmem>>, %arg5: memref<1x128xf32, #tpu.memory_space<vmem>>, %arg6: memref<1x128xf32, #tpu.memory_space<vmem>>, %arg7: memref<1x128xf32, #tpu.memory_space<vmem>>, %arg8: memref<1x1xf32, #tpu.memory_space<vmem>>, %arg9: memref<2x1xf32, #tpu.memory_space<vmem>>, %arg10: memref<2x128xf32, #tpu.memory_space<vmem>>, %arg11: memref<3x2x128xf32, #tpu.memory_space<vmem>>) attributes {dimension_semantics = [#tpu.dimension_semantics<parallel>, #tpu.dimension_semantics<arbitrary>], iteration_bounds = array<i64: 1, 2>, scalar_prefetch = 0 : i64, scratch_operands = 2 : i64, tpu.core_type = #tpu.core_type<tc>, window_params = [{transform_indices = @transform_0, window_bounds = array<i64: 2, 256, 256>}, {pipeline_mode = #tpu.pipeline_mode<synchronous>, transform_indices = @transform_1, window_bounds = array<i64: 256, 512>}, {pipeline_mode = #tpu.pipeline_mode<synchronous>, transform_indices = @transform_2, window_bounds = array<i64: 1, 128>}, {pipeline_mode = #tpu.pipeline_mode<synchronous>, transform_indices = @transform_3, window_bounds = array<i64: 1, 128>}, {pipeline_mode = #tpu.pipeline_mode<synchronous>, transform_indices = @transform_4, window_bounds = array<i64: 1, 128>}, {pipeline_mode = #tpu.pipeline_mode<synchronous>, transform_indices = @transform_5, window_bounds = array<i64: 1, 128>}, {pipeline_mode = #tpu.pipeline_mode<synchronous>, transform_indices = @transform_6, window_bounds = array<i64: 1, 1>}, {transform_indices = @transform_7, window_bounds = array<i64: 2, 1>}]} {
    %c0_i32 = arith.constant 0 : i32
    %0 = arith.cmpi eq, %arg1, %c0_i32 : i32
    %1 = arith.extui %0 : i1 to i32
    %c0_i32_0 = arith.constant 0 : i32
    %2 = arith.cmpi ne, %1, %c0_i32_0 : i32
    scf.if %2 {
      %cst_56 = arith.constant 0xFF800000 : f32
      %155 = vector.broadcast %cst_56 : f32 to vector<2x128xf32>
      %c0_57 = arith.constant 0 : index
      %c0_58 = arith.constant 0 : index
      %156 = vector.load %arg10[%c0_57, %c0_58] : memref<2x128xf32, #tpu.memory_space<vmem>>, vector<2x128xf32>
      tpu.vector_store %arg10[%c0_57, %c0_58], %155 {strides = array<i32>} : memref<2x128xf32, #tpu.memory_space<vmem>>, vector<2x128xf32>,
      %cst_59 = arith.constant 0.000000e+00 : f32
      %157 = vector.broadcast %cst_59 : f32 to vector<3x2x128xf32>
      %c0_60 = arith.constant 0 : index
      %c0_61 = arith.constant 0 : index
      %c0_62 = arith.constant 0 : index
      %158 = vector.load %arg11[%c0_60, %c0_61, %c0_62] : memref<3x2x128xf32, #tpu.memory_space<vmem>>, vector<3x2x128xf32>
      tpu.vector_store %arg11[%c0_60, %c0_61, %c0_62], %157 {strides = array<i32>} : memref<3x2x128xf32, #tpu.memory_space<vmem>>, vector<3x2x128xf32>,
    } else {
    }
    %c0 = arith.constant 0 : index
    %c0_1 = arith.constant 0 : index
    %3 = vector.load %arg3[%c0, %c0_1] : memref<256x512xbf16, #tpu.memory_space<vmem>>, vector<256x512xbf16>
    %c0_2 = arith.constant 0 : index
    %c0_3 = arith.constant 0 : index
    %c0_4 = arith.constant 0 : index
    %4 = vector.load %arg2[%c0_2, %c0_3, %c0_4] : memref<2x256x256xf32, #tpu.memory_space<vmem>>, vector<2x128x256xf32>
    %5 = arith.truncf %4 : vector<2x128x256xf32> to vector<2x128x256xbf16>
    %6 = vector.shape_cast %5 : vector<2x128x256xbf16> to vector<256x256xbf16>
    %cst = arith.constant dense<0.000000e+00> : vector<256x512xf32>
    %7 = tpu.matmul %6, %3, %cst {dimension_numbers = #tpu.dot_dimension_numbers<[1], [0], [0], [1], [0, 0, 1, 1], [], []>} : vector<256x256xbf16>, vector<256x512xbf16>, vector<256x512xf32> -> vector<256x512xf32>
    %8 = vector.shape_cast %7 : vector<256x512xf32> to vector<2x128x512xf32>
    %9 = vector.extract_strided_slice %8 {offsets = [0, 0, 0], sizes = [2, 128, 128], strides = [1, 1, 1]} : vector<2x128x512xf32> to vector<2x128x128xf32>
    %10 = vector.extract_strided_slice %8 {offsets = [0, 0, 128], sizes = [2, 128, 128], strides = [1, 1, 1]} : vector<2x128x512xf32> to vector<2x128x128xf32>
    %11 = vector.extract_strided_slice %8 {offsets = [0, 0, 256], sizes = [2, 128, 128], strides = [1, 1, 1]} : vector<2x128x512xf32> to vector<2x128x128xf32>
    %12 = vector.extract_strided_slice %8 {offsets = [0, 0, 384], sizes = [2, 128, 128], strides = [1, 1, 1]} : vector<2x128x512xf32> to vector<2x128x128xf32>
    %13 = vector.extract_strided_slice %9 {offsets = [0, 0, 0], sizes = [2, 125, 128], strides = [1, 1, 1]} : vector<2x128x128xf32> to vector<2x125x128xf32>
    %14 = vector.extract_strided_slice %10 {offsets = [0, 1, 0], sizes = [2, 125, 128], strides = [1, 1, 1]} : vector<2x128x128xf32> to vector<2x125x128xf32>
    %15 = arith.addf %13, %14 : vector<2x125x128xf32>
    %16 = vector.extract_strided_slice %11 {offsets = [0, 2, 0], sizes = [2, 125, 128], strides = [1, 1, 1]} : vector<2x128x128xf32> to vector<2x125x128xf32>
    %17 = arith.addf %15, %16 : vector<2x125x128xf32>
    %18 = vector.extract_strided_slice %12 {offsets = [0, 3, 0], sizes = [2, 125, 128], strides = [1, 1, 1]} : vector<2x128x128xf32> to vector<2x125x128xf32>
    %19 = arith.addf %17, %18 : vector<2x125x128xf32>
    %c0_5 = arith.constant 0 : index
    %c0_6 = arith.constant 0 : index
    %20 = vector.load %arg10[%c0_5, %c0_6] : memref<2x128xf32, #tpu.memory_space<vmem>>, vector<2x128xf32>
    %cst_7 = arith.constant dense<0xFF800000> : vector<2x128xf32>
    %21 = vector.multi_reduction <maximumf>, %19, %cst_7 [1] : vector<2x125x128xf32> to vector<2x128xf32>
    %22 = arith.maximumf %20, %21 : vector<2x128xf32>
    %c0_8 = arith.constant 0 : index
    %c0_9 = arith.constant 0 : index
    %c0_10 = arith.constant 0 : index
    %23 = vector.load %arg11[%c0_8, %c0_9, %c0_10] : memref<3x2x128xf32, #tpu.memory_space<vmem>>, vector<1x2x128xf32>
    %24 = vector.shape_cast %23 : vector<1x2x128xf32> to vector<2x128xf32>
    %25 = vector.extract_strided_slice %12 {offsets = [0, 0, 0], sizes = [2, 1, 128], strides = [1, 1, 1]} : vector<2x128x128xf32> to vector<2x1x128xf32>
    %26 = vector.shape_cast %25 : vector<2x1x128xf32> to vector<2x128xf32>
    %27 = arith.addf %24, %26 : vector<2x128xf32>
    %c1 = arith.constant 1 : index
    %c0_11 = arith.constant 0 : index
    %c0_12 = arith.constant 0 : index
    %28 = vector.load %arg11[%c1, %c0_11, %c0_12] : memref<3x2x128xf32, #tpu.memory_space<vmem>>, vector<1x2x128xf32>
    %29 = vector.shape_cast %28 : vector<1x2x128xf32> to vector<2x128xf32>
    %30 = vector.extract_strided_slice %11 {offsets = [0, 0, 0], sizes = [2, 1, 128], strides = [1, 1, 1]} : vector<2x128x128xf32> to vector<2x1x128xf32>
    %31 = vector.shape_cast %30 : vector<2x1x128xf32> to vector<2x128xf32>
    %32 = arith.addf %29, %31 : vector<2x128xf32>
    %33 = vector.extract_strided_slice %12 {offsets = [0, 1, 0], sizes = [2, 1, 128], strides = [1, 1, 1]} : vector<2x128x128xf32> to vector<2x1x128xf32>
    %34 = vector.shape_cast %33 : vector<2x1x128xf32> to vector<2x128xf32>
    %35 = arith.addf %32, %34 : vector<2x128xf32>
    %c2 = arith.constant 2 : index
    %c0_13 = arith.constant 0 : index
    %c0_14 = arith.constant 0 : index
    %36 = vector.load %arg11[%c2, %c0_13, %c0_14] : memref<3x2x128xf32, #tpu.memory_space<vmem>>, vector<1x2x128xf32>
    %37 = vector.shape_cast %36 : vector<1x2x128xf32> to vector<2x128xf32>
    %38 = vector.extract_strided_slice %10 {offsets = [0, 0, 0], sizes = [2, 1, 128], strides = [1, 1, 1]} : vector<2x128x128xf32> to vector<2x1x128xf32>
    %39 = vector.shape_cast %38 : vector<2x1x128xf32> to vector<2x128xf32>
    %40 = arith.addf %37, %39 : vector<2x128xf32>
    %41 = vector.extract_strided_slice %11 {offsets = [0, 1, 0], sizes = [2, 1, 128], strides = [1, 1, 1]} : vector<2x128x128xf32> to vector<2x1x128xf32>
    %42 = vector.shape_cast %41 : vector<2x1x128xf32> to vector<2x128xf32>
    %43 = arith.addf %40, %42 : vector<2x128xf32>
    %44 = vector.extract_strided_slice %12 {offsets = [0, 2, 0], sizes = [2, 1, 128], strides = [1, 1, 1]} : vector<2x128x128xf32> to vector<2x1x128xf32>
    %45 = vector.shape_cast %44 : vector<2x1x128xf32> to vector<2x128xf32>
    %46 = arith.addf %43, %45 : vector<2x128xf32>
    %47 = arith.maximumf %27, %35 : vector<2x128xf32>
    %c0_i32_15 = arith.constant 0 : i32
    %48 = arith.cmpi eq, %arg1, %c0_i32_15 : i32
    %cst_16 = arith.constant 0xFF800000 : f32
    %49 = vector.broadcast %cst_16 : f32 to vector<2x128xf32>
    %50 = arith.select %48, %49, %47 : vector<2x128xf32>
    %51 = arith.maximumf %50, %46 : vector<2x128xf32>
    %52 = arith.maximumf %22, %51 : vector<2x128xf32>
    %53 = vector.extract_strided_slice %9 {offsets = [0, 125, 0], sizes = [2, 1, 128], strides = [1, 1, 1]} : vector<2x128x128xf32> to vector<2x1x128xf32>
    %54 = vector.shape_cast %53 : vector<2x1x128xf32> to vector<2x128xf32>
    %55 = vector.extract_strided_slice %10 {offsets = [0, 126, 0], sizes = [2, 1, 128], strides = [1, 1, 1]} : vector<2x128x128xf32> to vector<2x1x128xf32>
    %56 = vector.shape_cast %55 : vector<2x1x128xf32> to vector<2x128xf32>
    %57 = arith.addf %54, %56 : vector<2x128xf32>
    %58 = vector.extract_strided_slice %11 {offsets = [0, 127, 0], sizes = [2, 1, 128], strides = [1, 1, 1]} : vector<2x128x128xf32> to vector<2x1x128xf32>
    %59 = vector.shape_cast %58 : vector<2x1x128xf32> to vector<2x128xf32>
    %60 = arith.addf %57, %59 : vector<2x128xf32>
    %61 = vector.extract_strided_slice %9 {offsets = [0, 126, 0], sizes = [2, 1, 128], strides = [1, 1, 1]} : vector<2x128x128xf32> to vector<2x1x128xf32>
    %62 = vector.shape_cast %61 : vector<2x1x128xf32> to vector<2x128xf32>
    %63 = vector.extract_strided_slice %10 {offsets = [0, 127, 0], sizes = [2, 1, 128], strides = [1, 1, 1]} : vector<2x128x128xf32> to vector<2x1x128xf32>
    %64 = vector.shape_cast %63 : vector<2x1x128xf32> to vector<2x128xf32>
    %65 = arith.addf %62, %64 : vector<2x128xf32>
    %66 = vector.extract_strided_slice %9 {offsets = [0, 127, 0], sizes = [2, 1, 128], strides = [1, 1, 1]} : vector<2x128x128xf32> to vector<2x1x128xf32>
    %67 = vector.shape_cast %66 : vector<2x1x128xf32> to vector<2x128xf32>
    %c0_17 = arith.constant 0 : index
    %c0_18 = arith.constant 0 : index
    %c0_19 = arith.constant 0 : index
    %68 = vector.load %arg11[%c0_17, %c0_18, %c0_19] : memref<3x2x128xf32, #tpu.memory_space<vmem>>, vector<1x2x128xf32>
    %69 = vector.shape_cast %68 : vector<1x2x128xf32> to vector<2x128xf32>
    %70 = vector.shape_cast %60 : vector<2x128xf32> to vector<1x2x128xf32>
    tpu.vector_store %arg11[%c0_17, %c0_18, %c0_19], %70 {strides = array<i32>} : memref<3x2x128xf32, #tpu.memory_space<vmem>>, vector<1x2x128xf32>,
    %c1_20 = arith.constant 1 : index
    %c0_21 = arith.constant 0 : index
    %c0_22 = arith.constant 0 : index
    %71 = vector.load %arg11[%c1_20, %c0_21, %c0_22] : memref<3x2x128xf32, #tpu.memory_space<vmem>>, vector<1x2x128xf32>
    %72 = vector.shape_cast %71 : vector<1x2x128xf32> to vector<2x128xf32>
    %73 = vector.shape_cast %65 : vector<2x128xf32> to vector<1x2x128xf32>
    tpu.vector_store %arg11[%c1_20, %c0_21, %c0_22], %73 {strides = array<i32>} : memref<3x2x128xf32, #tpu.memory_space<vmem>>, vector<1x2x128xf32>,
    %c2_23 = arith.constant 2 : index
    %c0_24 = arith.constant 0 : index
    %c0_25 = arith.constant 0 : index
    %74 = vector.load %arg11[%c2_23, %c0_24, %c0_25] : memref<3x2x128xf32, #tpu.memory_space<vmem>>, vector<1x2x128xf32>
    %75 = vector.shape_cast %74 : vector<1x2x128xf32> to vector<2x128xf32>
    %76 = vector.shape_cast %67 : vector<2x128xf32> to vector<1x2x128xf32>
    tpu.vector_store %arg11[%c2_23, %c0_24, %c0_25], %76 {strides = array<i32>} : memref<3x2x128xf32, #tpu.memory_space<vmem>>, vector<1x2x128xf32>,
    %c0_26 = arith.constant 0 : index
    %c0_27 = arith.constant 0 : index
    %77 = vector.load %arg10[%c0_26, %c0_27] : memref<2x128xf32, #tpu.memory_space<vmem>>, vector<2x128xf32>
    tpu.vector_store %arg10[%c0_26, %c0_27], %52 {strides = array<i32>} : memref<2x128xf32, #tpu.memory_space<vmem>>, vector<2x128xf32>,
    %c0_28 = arith.constant 0 : index
    %c128 = arith.constant 128 : index
    %c0_29 = arith.constant 0 : index
    %78 = vector.load %arg2[%c0_28, %c128, %c0_29] : memref<2x256x256xf32, #tpu.memory_space<vmem>>, vector<2x128x256xf32>
    %79 = arith.truncf %78 : vector<2x128x256xf32> to vector<2x128x256xbf16>
    %80 = vector.shape_cast %79 : vector<2x128x256xbf16> to vector<256x256xbf16>
    %cst_30 = arith.constant dense<0.000000e+00> : vector<256x512xf32>
    %81 = tpu.matmul %80, %3, %cst_30 {dimension_numbers = #tpu.dot_dimension_numbers<[1], [0], [0], [1], [0, 0, 1, 1], [], []>} : vector<256x256xbf16>, vector<256x512xbf16>, vector<256x512xf32> -> vector<256x512xf32>
    %82 = vector.shape_cast %81 : vector<256x512xf32> to vector<2x128x512xf32>
    %83 = vector.extract_strided_slice %82 {offsets = [0, 0, 0], sizes = [2, 128, 128], strides = [1, 1, 1]} : vector<2x128x512xf32> to vector<2x128x128xf32>
    %84 = vector.extract_strided_slice %82 {offsets = [0, 0, 128], sizes = [2, 128, 128], strides = [1, 1, 1]} : vector<2x128x512xf32> to vector<2x128x128xf32>
    %85 = vector.extract_strided_slice %82 {offsets = [0, 0, 256], sizes = [2, 128, 128], strides = [1, 1, 1]} : vector<2x128x512xf32> to vector<2x128x128xf32>
    %86 = vector.extract_strided_slice %82 {offsets = [0, 0, 384], sizes = [2, 128, 128], strides = [1, 1, 1]} : vector<2x128x512xf32> to vector<2x128x128xf32>
    %87 = vector.extract_strided_slice %83 {offsets = [0, 0, 0], sizes = [2, 125, 128], strides = [1, 1, 1]} : vector<2x128x128xf32> to vector<2x125x128xf32>
    %88 = vector.extract_strided_slice %84 {offsets = [0, 1, 0], sizes = [2, 125, 128], strides = [1, 1, 1]} : vector<2x128x128xf32> to vector<2x125x128xf32>
    %89 = arith.addf %87, %88 : vector<2x125x128xf32>
    %90 = vector.extract_strided_slice %85 {offsets = [0, 2, 0], sizes = [2, 125, 128], strides = [1, 1, 1]} : vector<2x128x128xf32> to vector<2x125x128xf32>
    %91 = arith.addf %89, %90 : vector<2x125x128xf32>
    %92 = vector.extract_strided_slice %86 {offsets = [0, 3, 0], sizes = [2, 125, 128], strides = [1, 1, 1]} : vector<2x128x128xf32> to vector<2x125x128xf32>
    %93 = arith.addf %91, %92 : vector<2x125x128xf32>
    %c0_31 = arith.constant 0 : index
    %c0_32 = arith.constant 0 : index
    %94 = vector.load %arg10[%c0_31, %c0_32] : memref<2x128xf32, #tpu.memory_space<vmem>>, vector<2x128xf32>
    %cst_33 = arith.constant dense<0xFF800000> : vector<2x128xf32>
    %95 = vector.multi_reduction <maximumf>, %93, %cst_33 [1] : vector<2x125x128xf32> to vector<2x128xf32>
    %96 = arith.maximumf %94, %95 : vector<2x128xf32>
    %c0_34 = arith.constant 0 : index
    %c0_35 = arith.constant 0 : index
    %c0_36 = arith.constant 0 : index
    %97 = vector.load %arg11[%c0_34, %c0_35, %c0_36] : memref<3x2x128xf32, #tpu.memory_space<vmem>>, vector<1x2x128xf32>
    %98 = vector.shape_cast %97 : vector<1x2x128xf32> to vector<2x128xf32>
    %99 = vector.extract_strided_slice %86 {offsets = [0, 0, 0], sizes = [2, 1, 128], strides = [1, 1, 1]} : vector<2x128x128xf32> to vector<2x1x128xf32>
    %100 = vector.shape_cast %99 : vector<2x1x128xf32> to vector<2x128xf32>
    %101 = arith.addf %98, %100 : vector<2x128xf32>
    %c1_37 = arith.constant 1 : index
    %c0_38 = arith.constant 0 : index
    %c0_39 = arith.constant 0 : index
    %102 = vector.load %arg11[%c1_37, %c0_38, %c0_39] : memref<3x2x128xf32, #tpu.memory_space<vmem>>, vector<1x2x128xf32>
    %103 = vector.shape_cast %102 : vector<1x2x128xf32> to vector<2x128xf32>
    %104 = vector.extract_strided_slice %85 {offsets = [0, 0, 0], sizes = [2, 1, 128], strides = [1, 1, 1]} : vector<2x128x128xf32> to vector<2x1x128xf32>
    %105 = vector.shape_cast %104 : vector<2x1x128xf32> to vector<2x128xf32>
    %106 = arith.addf %103, %105 : vector<2x128xf32>
    %107 = vector.extract_strided_slice %86 {offsets = [0, 1, 0], sizes = [2, 1, 128], strides = [1, 1, 1]} : vector<2x128x128xf32> to vector<2x1x128xf32>
    %108 = vector.shape_cast %107 : vector<2x1x128xf32> to vector<2x128xf32>
    %109 = arith.addf %106, %108 : vector<2x128xf32>
    %c2_40 = arith.constant 2 : index
    %c0_41 = arith.constant 0 : index
    %c0_42 = arith.constant 0 : index
    %110 = vector.load %arg11[%c2_40, %c0_41, %c0_42] : memref<3x2x128xf32, #tpu.memory_space<vmem>>, vector<1x2x128xf32>
    %111 = vector.shape_cast %110 : vector<1x2x128xf32> to vector<2x128xf32>
    %112 = vector.extract_strided_slice %84 {offsets = [0, 0, 0], sizes = [2, 1, 128], strides = [1, 1, 1]} : vector<2x128x128xf32> to vector<2x1x128xf32>
    %113 = vector.shape_cast %112 : vector<2x1x128xf32> to vector<2x128xf32>
    %114 = arith.addf %111, %113 : vector<2x128xf32>
    %115 = vector.extract_strided_slice %85 {offsets = [0, 1, 0], sizes = [2, 1, 128], strides = [1, 1, 1]} : vector<2x128x128xf32> to vector<2x1x128xf32>
    %116 = vector.shape_cast %115 : vector<2x1x128xf32> to vector<2x128xf32>
    %117 = arith.addf %114, %116 : vector<2x128xf32>
    %118 = vector.extract_strided_slice %86 {offsets = [0, 2, 0], sizes = [2, 1, 128], strides = [1, 1, 1]} : vector<2x128x128xf32> to vector<2x1x128xf32>
    %119 = vector.shape_cast %118 : vector<2x1x128xf32> to vector<2x128xf32>
    %120 = arith.addf %117, %119 : vector<2x128xf32>
    %121 = arith.maximumf %101, %109 : vector<2x128xf32>
    %122 = arith.maximumf %121, %120 : vector<2x128xf32>
    %123 = arith.maximumf %96, %122 : vector<2x128xf32>
    %124 = vector.extract_strided_slice %83 {offsets = [0, 125, 0], sizes = [2, 1, 128], strides = [1, 1, 1]} : vector<2x128x128xf32> to vector<2x1x128xf32>
    %125 = vector.shape_cast %124 : vector<2x1x128xf32> to vector<2x128xf32>
    %126 = vector.extract_strided_slice %84 {offsets = [0, 126, 0], sizes = [2, 1, 128], strides = [1, 1, 1]} : vector<2x128x128xf32> to vector<2x1x128xf32>
    %127 = vector.shape_cast %126 : vector<2x1x128xf32> to vector<2x128xf32>
    %128 = arith.addf %125, %127 : vector<2x128xf32>
    %129 = vector.extract_strided_slice %85 {offsets = [0, 127, 0], sizes = [2, 1, 128], strides = [1, 1, 1]} : vector<2x128x128xf32> to vector<2x1x128xf32>
    %130 = vector.shape_cast %129 : vector<2x1x128xf32> to vector<2x128xf32>
    %131 = arith.addf %128, %130 : vector<2x128xf32>
    %132 = vector.extract_strided_slice %83 {offsets = [0, 126, 0], sizes = [2, 1, 128], strides = [1, 1, 1]} : vector<2x128x128xf32> to vector<2x1x128xf32>
    %133 = vector.shape_cast %132 : vector<2x1x128xf32> to vector<2x128xf32>
    %134 = vector.extract_strided_slice %84 {offsets = [0, 127, 0], sizes = [2, 1, 128], strides = [1, 1, 1]} : vector<2x128x128xf32> to vector<2x1x128xf32>
    %135 = vector.shape_cast %134 : vector<2x1x128xf32> to vector<2x128xf32>
    %136 = arith.addf %133, %135 : vector<2x128xf32>
    %137 = vector.extract_strided_slice %83 {offsets = [0, 127, 0], sizes = [2, 1, 128], strides = [1, 1, 1]} : vector<2x128x128xf32> to vector<2x1x128xf32>
    %138 = vector.shape_cast %137 : vector<2x1x128xf32> to vector<2x128xf32>
    %c0_43 = arith.constant 0 : index
    %c0_44 = arith.constant 0 : index
    %c0_45 = arith.constant 0 : index
    %139 = vector.load %arg11[%c0_43, %c0_44, %c0_45] : memref<3x2x128xf32, #tpu.memory_space<vmem>>, vector<1x2x128xf32>
    %140 = vector.shape_cast %139 : vector<1x2x128xf32> to vector<2x128xf32>
    %141 = vector.shape_cast %131 : vector<2x128xf32> to vector<1x2x128xf32>
    tpu.vector_store %arg11[%c0_43, %c0_44, %c0_45], %141 {strides = array<i32>} : memref<3x2x128xf32, #tpu.memory_space<vmem>>, vector<1x2x128xf32>,
    %c1_46 = arith.constant 1 : index
    %c0_47 = arith.constant 0 : index
    %c0_48 = arith.constant 0 : index
    %142 = vector.load %arg11[%c1_46, %c0_47, %c0_48] : memref<3x2x128xf32, #tpu.memory_space<vmem>>, vector<1x2x128xf32>
    %143 = vector.shape_cast %142 : vector<1x2x128xf32> to vector<2x128xf32>
    %144 = vector.shape_cast %136 : vector<2x128xf32> to vector<1x2x128xf32>
    tpu.vector_store %arg11[%c1_46, %c0_47, %c0_48], %144 {strides = array<i32>} : memref<3x2x128xf32, #tpu.memory_space<vmem>>, vector<1x2x128xf32>,
    %c2_49 = arith.constant 2 : index
    %c0_50 = arith.constant 0 : index
    %c0_51 = arith.constant 0 : index
    %145 = vector.load %arg11[%c2_49, %c0_50, %c0_51] : memref<3x2x128xf32, #tpu.memory_space<vmem>>, vector<1x2x128xf32>
    %146 = vector.shape_cast %145 : vector<1x2x128xf32> to vector<2x128xf32>
    %147 = vector.shape_cast %138 : vector<2x128xf32> to vector<1x2x128xf32>
    tpu.vector_store %arg11[%c2_49, %c0_50, %c0_51], %147 {strides = array<i32>} : memref<3x2x128xf32, #tpu.memory_space<vmem>>, vector<1x2x128xf32>,
    %c1_i32 = arith.constant 1 : i32
    %148 = arith.cmpi eq, %arg1, %c1_i32 : i32
    %149 = arith.maximumf %123, %131 : vector<2x128xf32>
    %150 = arith.select %148, %149, %123 : vector<2x128xf32>
    %c0_52 = arith.constant 0 : index
    %c0_53 = arith.constant 0 : index
    %151 = vector.load %arg10[%c0_52, %c0_53] : memref<2x128xf32, #tpu.memory_space<vmem>>, vector<2x128xf32>
    tpu.vector_store %arg10[%c0_52, %c0_53], %150 {strides = array<i32>} : memref<2x128xf32, #tpu.memory_space<vmem>>, vector<2x128xf32>,
    %c1_i32_54 = arith.constant 1 : i32
    %152 = arith.cmpi eq, %arg1, %c1_i32_54 : i32
    %153 = arith.extui %152 : i1 to i32
    %c0_i32_55 = arith.constant 0 : i32
    %154 = arith.cmpi ne, %153, %c0_i32_55 : i32
    scf.if %154 {
      %c0_56 = arith.constant 0 : index
      %c0_57 = arith.constant 0 : index
      %155 = vector.load %arg10[%c0_56, %c0_57] : memref<2x128xf32, #tpu.memory_space<vmem>>, vector<2x128xf32>
      %c0_58 = arith.constant 0 : index
      %c0_59 = arith.constant 0 : index
      %156 = vector.load %arg4[%c0_58, %c0_59] : memref<1x128xf32, #tpu.memory_space<vmem>>, vector<1x128xf32>
      %157 = vector.broadcast %156 : vector<1x128xf32> to vector<2x128xf32>
      %158 = arith.addf %155, %157 : vector<2x128xf32>
      %cst_60 = arith.constant dense<0.000000e+00> : vector<2xf32>
      %159 = vector.multi_reduction <add>, %158, %cst_60 [1] : vector<2x128xf32> to vector<2xf32>
      %160 = vector.shape_cast %159 : vector<2xf32> to vector<2x1xf32>
      %cst_61 = arith.constant 1.280000e+02 : f32
      %161 = vector.broadcast %cst_61 : f32 to vector<2x1xf32>
      %162 = arith.divf %160, %161 : vector<2x1xf32>
      %163 = vector.broadcast %162 : vector<2x1xf32> to vector<2x128xf32>
      %164 = arith.subf %158, %163 : vector<2x128xf32>
      %165 = arith.mulf %164, %164 : vector<2x128xf32>
      %cst_62 = arith.constant dense<0.000000e+00> : vector<2xf32>
      %166 = vector.multi_reduction <add>, %165, %cst_62 [1] : vector<2x128xf32> to vector<2xf32>
      %167 = vector.shape_cast %166 : vector<2xf32> to vector<2x1xf32>
      %cst_63 = arith.constant 1.280000e+02 : f32
      %168 = vector.broadcast %cst_63 : f32 to vector<2x1xf32>
      %169 = arith.divf %167, %168 : vector<2x1xf32>
      %cst_64 = arith.constant 9.99999974E-6 : f32
      %170 = vector.broadcast %cst_64 : f32 to vector<2x1xf32>
      %171 = arith.addf %169, %170 : vector<2x1xf32>
      %172 = math.rsqrt %171 : vector<2x1xf32>
      %173 = vector.broadcast %172 : vector<2x1xf32> to vector<2x128xf32>
      %174 = arith.mulf %164, %173 : vector<2x128xf32>
      %c0_65 = arith.constant 0 : index
      %c0_66 = arith.constant 0 : index
      %175 = vector.load %arg5[%c0_65, %c0_66] : memref<1x128xf32, #tpu.memory_space<vmem>>, vector<1x128xf32>
      %176 = vector.broadcast %175 : vector<1x128xf32> to vector<2x128xf32>
      %177 = arith.mulf %174, %176 : vector<2x128xf32>
      %c0_67 = arith.constant 0 : index
      %c0_68 = arith.constant 0 : index
      %178 = vector.load %arg6[%c0_67, %c0_68] : memref<1x128xf32, #tpu.memory_space<vmem>>, vector<1x128xf32>
      %179 = vector.broadcast %178 : vector<1x128xf32> to vector<2x128xf32>
      %180 = arith.addf %177, %179 : vector<2x128xf32>
      %cst_69 = arith.constant 5.000000e-01 : f32
      %181 = vector.broadcast %cst_69 : f32 to vector<2x128xf32>
      %182 = arith.mulf %181, %180 : vector<2x128xf32>
      %cst_70 = arith.constant 0.707106769 : f32
      %183 = vector.broadcast %cst_70 : f32 to vector<2x128xf32>
      %184 = arith.mulf %180, %183 : vector<2x128xf32>
      %185 = math.erf %184 : vector<2x128xf32>
      %cst_71 = arith.constant 1.000000e+00 : f32
      %186 = vector.broadcast %cst_71 : f32 to vector<2x128xf32>
      %187 = arith.addf %186, %185 : vector<2x128xf32>
      %188 = arith.mulf %182, %187 : vector<2x128xf32>
      %c0_72 = arith.constant 0 : index
      %c0_73 = arith.constant 0 : index
      %189 = vector.load %arg7[%c0_72, %c0_73] : memref<1x128xf32, #tpu.memory_space<vmem>>, vector<1x128xf32>
      %190 = vector.broadcast %189 : vector<1x128xf32> to vector<2x128xf32>
      %191 = arith.mulf %188, %190 : vector<2x128xf32>
      %cst_74 = arith.constant dense<0.000000e+00> : vector<2xf32>
      %192 = vector.multi_reduction <add>, %191, %cst_74 [1] : vector<2x128xf32> to vector<2xf32>
      %193 = vector.shape_cast %192 : vector<2xf32> to vector<2x1xf32>
      %c0_75 = arith.constant 0 : index
      %c0_76 = arith.constant 0 : index
      %194 = vector.load %arg8[%c0_75, %c0_76] : memref<1x1xf32, #tpu.memory_space<vmem>>, vector<1x1xf32>
      %195 = vector.broadcast %194 : vector<1x1xf32> to vector<2x1xf32>
      %196 = arith.addf %193, %195 : vector<2x1xf32>
      %c0_77 = arith.constant 0 : index
      %c0_78 = arith.constant 0 : index
      %197 = vector.load %arg9[%c0_77, %c0_78] : memref<2x1xf32, #tpu.memory_space<vmem>>, vector<2x1xf32>
      tpu.vector_store %arg9[%c0_77, %c0_78], %196 {strides = array<i32>} : memref<2x1xf32, #tpu.memory_space<vmem>>, vector<2x1xf32>,
    } else {
    }
    return
  }
  func.func @transform_0(%arg0: i32, %arg1: i32) -> (i32, i32, i32) {
    %c0_i32 = arith.constant 0 : i32
    %c0_i32_0 = arith.constant 0 : i32
    return %arg0, %arg1, %c0_i32 : i32, i32, i32
  }
  func.func @transform_1(%arg0: i32, %arg1: i32) -> (i32, i32) {
    %c0_i32 = arith.constant 0 : i32
    %c0_i32_0 = arith.constant 0 : i32
    %c0_i32_1 = arith.constant 0 : i32
    return %c0_i32, %c0_i32_0 : i32, i32
  }
  func.func @transform_2(%arg0: i32, %arg1: i32) -> (i32, i32) {
    %c0_i32 = arith.constant 0 : i32
    %c0_i32_0 = arith.constant 0 : i32
    %c0_i32_1 = arith.constant 0 : i32
    return %c0_i32, %c0_i32_0 : i32, i32
  }
  func.func @transform_3(%arg0: i32, %arg1: i32) -> (i32, i32) {
    %c0_i32 = arith.constant 0 : i32
    %c0_i32_0 = arith.constant 0 : i32
    %c0_i32_1 = arith.constant 0 : i32
    return %c0_i32, %c0_i32_0 : i32, i32
  }
  func.func @transform_4(%arg0: i32, %arg1: i32) -> (i32, i32) {
    %c0_i32 = arith.constant 0 : i32
    %c0_i32_0 = arith.constant 0 : i32
    %c0_i32_1 = arith.constant 0 : i32
    return %c0_i32, %c0_i32_0 : i32, i32
  }
  func.func @transform_5(%arg0: i32, %arg1: i32) -> (i32, i32) {
    %c0_i32 = arith.constant 0 : i32
    %c0_i32_0 = arith.constant 0 : i32
    %c0_i32_1 = arith.constant 0 : i32
    return %c0_i32, %c0_i32_0 : i32, i32
  }
  func.func @transform_6(%arg0: i32, %arg1: i32) -> (i32, i32) {
    %c0_i32 = arith.constant 0 : i32
    %c0_i32_0 = arith.constant 0 : i32
    %c0_i32_1 = arith.constant 0 : i32
    return %c0_i32, %c0_i32_0 : i32, i32
  }
  func.func @transform_7(%arg0: i32, %arg1: i32) -> (i32, i32) {
    %c0_i32 = arith.constant 0 : i32
    %c0_i32_0 = arith.constant 0 : i32
    return %arg0, %c0_i32 : i32, i32
  }
}

</mosaic_0001>

<bundles_post_ra>
// kernel: _lambda_.1
= control target key start
LH: loop header
LB: loop body
LE: loop exit
PB: predicated region body
PF: predicated region fallthrough
CT: control target
= control target key end

     0   :  { %s4512_s0 = inlined_call_operand.hbm [shape: f32[2,512,256], index: 0, kind: input, shape index: {}]   ;;  %s4513_s1 = inlined_call_operand.hbm [shape: bf16[256,512], index: 1, kind: input, shape index: {}]   ;;  %s4514_s2 = inlined_call_operand.vmem [shape: f32[1,128], index: 2, kind: input, shape index: {}]   ;;  %s4515_s3 = inlined_call_operand.vmem [shape: f32[1,128], index: 3, kind: input, shape index: {}]   ;;  %s4516_s4 = inlined_call_operand.vmem [shape: f32[1,128], index: 4, kind: input, shape index: {}]   ;;  %s4517_s5 = inlined_call_operand.vmem [shape: f32[1,128], index: 5, kind: input, shape index: {}]   ;;  %s4518_s6 = inlined_call_operand.<no memory space> [shape: f32[1,1], index: 6, kind: input, shape index: {}]   ;;  %s4519_s7 = inlined_call_operand.vmem [shape: f32[2,1], index: 7, kind: output, shape index: {}]  }
   0x1   :  { %4529 = sst [smem:[#allocation22_spill]] %s4513_s1  ;;  %v12_v0 = vstv %s4518_s6 }
   0x2   :  { %13 = vst [vmem:[#allocation4] sm:$0x1] %v12_v0 }
   0x3   :  { %14 = vsyncpa [#allocation6], 0 }
   0x4   :  { %16 = vsyncpa [#allocation6 + $0x1], 0 }
   0x5   :  { %17 = vsyncpa [#allocation8], 0  ;;  %s3442_s26 = smov 0   ;;  %s3444_s27 = smov 0  }
   0x6   :  { %s3446_s28 = smov 0   ;;  %s3448_s29 = smov 0  }
   0x7   :  { %s3450_s30 = smov 0   ;;  %s3452_s8 = smov 0  }
   0x8 LB: > { %s3039_s6 = sadd.s32 4294967295, %s3386_s8   ;;  %s32_s9 = sadd.s32 1, %s3382_s30  ;;  %s3386_s8 = sphi %s3452_s8, %s23_s8   ;;  %s3382_s30 = sphi %s3450_s30, %s4556_s30   ;;  %s3378_s29 = sphi %s3448_s29, %s4555_s29   ;;  %s3374_s28 = sphi %s3446_s28, %s4554_s28   ;;  %s3370_s27 = sphi %s3444_s27, %s4553_s27   ;;  %s3366_s26 = sphi %s3442_s26, %s4552_s26  }
   0x9   : > { %p33_p0 = scmp.ge.s32.totalorder %s32_s9, 2  ;;  %s44_s10 = sadd.s32 1, %s3374_s28 }
   0xa   : > { %p51_p1 = scmp.ne.s32.totalorder %s3374_s28, %s3370_s27  ;;  %p52_p2 = scmp.eq.s32.totalorder %s3386_s8, 0 }
   0xb   : > { %s4558_s9 = smov (%p33_p0, %s32_s9), 0  ;;  %p57_p4 = scmp.ne.s32.totalorder %s3370_s27, %s3366_s26 }
   0xc   : > { %p3478_p3 = por %p52_p2, %p51_p1  ;;  %s40_s12 = ssub.s32 %s3382_s30, %s4558_s9 }
   0xd   : > { %p3485_p5 = scmp.eq.s32.totalorder %s3039_s6, 0  ;;  %p42_p6 = scmp.eq.s32.totalorder %s40_s12, 0 }
   0xe   : > { %p3040_p7 = scmp.ge.s32.totalorder %s3386_s8, 1  ;;  %p220_p9 = scmp.lt.s32.totalorder %s3386_s8, 3 }
   0xf   : > { %p3492_p8 = por %p3485_p5, %p57_p4  ;;  %s3388_s17 = smov [#allocation7]  }
  0x10   : > { %s3498_s15 = scalar_select %p42_p6, %s3374_s28, %s44_s10  }
  0x11   : > { %s4532_s14 = scalar_select %p3492_p8, 1, 0 }
  0x12   : > { %p3500_p10 = pnand %p3040_p7, %p220_p9  ;;  %s232_s18 = sshll.u32 %s3388_s17, 4  ;;  %s233_s18 = int_to_ptr.vmem [resolvable:$true] %s232_s18 }
  0x13   : > { %s3317_s19 = scalar_lea.vmem %s233_s18, 8192  ;;  %p3325_p4 = scmp.lt.s32.totalorder %s233_s18, %s233_s18 }
  0x14   : > { %p3141_p11 = pneg %p3500_p10  ;;  %p3318_p0 = scmp.ne.s32.totalorder %s233_s18, %s3317_s19 }
  0x15   : > { %p3326_p6 = scmp.lt.s32.totalorder %s3317_s19, %s3317_s19 }
  0x16   : > { %p3142_p12 = pnand %p3141_p11, %p3485_p5 }
  0x17   : > { %p3327_p8 = por %p3326_p6, %p3325_p4 }
  0x18   : > { %p3308_p13 = pneg %p3142_p12 }
  0x1a   : > { %p3320_p1 = pnand %p3318_p0, %p3308_p13 }
  0x1c   : > { %p3321_p2 = pneg %p3320_p1 }
  0x1e   : > { %p3328_p7 = pnand %p3327_p8, %p3321_p2 }
  0x20   : > { %3331 = shalt.err (!%p3328_p7)
}
  0x21   : > { %s3389_s20 = smov 256   ;;  %s3390_s21 = smov 16  }
  0x22   : > { %s4534_s1 = sld [smem:[#allocation22_spill]]  ;;  %p3042_p9 = scmp.ge.s32.totalorder %s3386_s8, 2 }
  0x24   : > { %257 = sbr.rel (%p3042_p9) target bundleno = 54 (0x36), region = 40 }
  0x28   : > { %3144 = dma.hbm_to_vmem [thread:$0]  (!%p3142_p12), %s4534_s1, 8192, %s233_s18, [#allocation8], %s3389_s20, %s3389_s20, %s3390_s21  }
  0x29   : > { %s261_s24 = sand.u32 1, %s3374_s28   ;;  %s3127_s25 = sshll.u32 %s3382_s30, 13 }
  0x2a   : > { %s3043_s26 = sshll.u32 %s261_s24, 10  ;;  %s275_s12 = scalar_lea.hbm %s4512_s0, %s3127_s25 }
  0x2b   : > { %s3130_s17 = scalar_select %p3478_p3, [#allocation0], [#allocation11] }
  0x2c   : > { %s265_s18 = scalar_lea.vmem [#allocation5], %s3043_s26  ;;  %s3391_s21 = smov 16384  }
  0x2d   : > { %s288_s19 = sshll.u32 %s265_s18, 4  ;;  %s280_s20 = sld [smem:[%s3130_s17]]   ;;  %s289_s19 = int_to_ptr.vmem [resolvable:$true] %s288_s19 }
  0x2e   : > { %3131 = sst [smem:[#allocation10]] (%p3478_p3), %s3391_s21  ;;  %s3392_s22 = smov 8192  }
  0x2f   : > { %3132 = sst [smem:[#allocation10 + $0x1]] (%p3478_p3), %s3392_s22  ;;  %s3393_s23 = smov 32  }
  0x30   : > { %3133 = sst [smem:[#allocation10 + $0x2]] (%p3478_p3), %s3393_s23  ;;  %s3394_s1 = smov 256  }
  0x31   : > { %3134 = sst [smem:[#allocation10 + $0x3]] (%p3478_p3), %s3394_s1  ;;  %s3395_s26 = smov 16  }
  0x32   : > { %3135 = sst [smem:[#allocation10 + $0x4]] (%p3478_p3), %s3394_s1  ;;  %s262_s10 = scalar_lea.sflag [#allocation6], %s261_s24 }
  0x33   : > { %s3047_s25 = sshll.u32 %s280_s20, 26  ;;  %3136 = sst [smem:[#allocation10 + $0x5]] (%p3478_p3), %s3395_s26 }
  0x34   : > { %s3048_s6 = sadd.s32 134217728, %s3047_s25  ;;  %s3396_s17 = smov 131072  }
  0x35   : > { %3137 = dma.general (%p3478_p3), %s275_s12, 16384, %s289_s19, %s262_s10, %s3396_s17, [#allocation10], %s3048_s6, 0  }
  0x36 PF: > { %313 = sbr.rel (%p3500_p10) target bundleno = 1102 (0x44e), region = 48 }
  0x3b   : > { %s315_s18 = sand.u32 1, %s3370_s27   ;;  %p4535_p8 = scmp.ne.s32.totalorder %s4532_s14, 0 }
  0x3c   : > { %s3050_s21 = sshll.u32 %s315_s18, 10  ;;  %s316_s22 = scalar_lea.sflag [#allocation6], %s315_s18 }
  0x3d   : > { %s3536_s23 = scalar_lea.vmem [#allocation5], %s3050_s21 }
  0x3e   : > { %3357 = dma.done.wait (%p4535_p8), %s316_s22, 16384  }
  0x3f   : > { %3359 = vsyncadd (%p4535_p8), %s316_s22, 4294950912 }
  0x40   : > { %3361 = dma.done.wait (%p3485_p5), [#allocation8], 8192  }
  0x41   : > { %3363 = vsyncadd (%p3485_p5), [#allocation8], 4294959104  ;;  %p359_p3 = scmp.eq.s32.totalorder %s3378_s29, 0  ;;  %p3052_p10 = scmp.ne.s32.totalorder %s3378_s29, 0 }
  0x43   : > { %362 = sbr.rel (%p3052_p10) target bundleno = 75 (0x4b), region = 60 }
  0x48   : > { %v3397_v1 = vmov -inf   ;;  %v3398_v2 = vmov 0.0  }
  0x49   : > { %363 = vst [vmem:[#allocation2] sm:$0x3] %v3397_v1  ;;  %364 = vst [vmem:[#allocation3] sm:$0x3] %v3398_v2 }
  0x4a   : > { %365 = vst [vmem:[#allocation3 + $0x2] sm:$0x3] %v3398_v2  ;;  %366 = vst [vmem:[#allocation3 + $0x4] sm:$0x3] %v3398_v2 }
  0x4b PF: > { %v3548_v3 = vld [vmem:[#allocation7 + $0xe4] ss:$16 sps:$4 sm:$0xff]   ;;  %v3550_v4 = vld [vmem:[#allocation7 + $0xec] ss:$16 sps:$4 sm:$0xff]   ;;  %v3553_v5 = vld [vmem:[#allocation7 + $0xe0] ss:$16 sps:$4 sm:$0xff]  }
  0x4c   : > { %847 = vmatprep.subr.bf16.mxu0 %v3548_v3  ;;  %v3555_v6 = vld [vmem:[#allocation7 + $0xe8] ss:$16 sps:$4 sm:$0xff]   ;;  %1040 = vmatprep.subr.bf16.mxu1 %v3550_v4  ;;  %v3558_v7 = vld [vmem:[#allocation7 + $0xc4] ss:$16 sps:$4 sm:$0xff]   ;;  %v3562_v8 = vld [vmem:[#allocation7 + $0xcc] ss:$16 sps:$4 sm:$0xff]  }
  0x4d   : > { %848 = vmatpush1.bf16.msra.mxu0 %v3553_v5  ;;  %1041 = vmatpush1.bf16.msra.mxu1 %v3555_v6  ;;  %v3564_v9 = vld [vmem:[#allocation7 + $0xc0] ss:$16 sps:$4 sm:$0xff]   ;;  %v3567_v10 = vld [vmem:[#allocation7 + $0xc8] ss:$16 sps:$4 sm:$0xff]   ;;  %v3570_v11 = vld [vmem:[#allocation7 + $0xa4] ss:$16 sps:$4 sm:$0xff]  }
  0x4e   : > { %849 = vmatprep.subr.bf16.mxu0 %v3558_v7  ;;  %1042 = vmatprep.subr.bf16.mxu1 %v3562_v8  ;;  %v3572_v12 = vld [vmem:[#allocation7 + $0xac] ss:$16 sps:$4 sm:$0xff]   ;;  %v3574_v13 = vld [vmem:[#allocation7 + $0xa0] ss:$16 sps:$4 sm:$0xff]   ;;  %v3576_v14 = vld [vmem:[#allocation7 + $0xa8] ss:$16 sps:$4 sm:$0xff]  }
  0x4f   : > { %v3580_v15 = vld [vmem:[#allocation7 + $0x84] ss:$16 sps:$4 sm:$0xff]   ;;  %v3584_v16 = vld [vmem:[#allocation7 + $0x8c] ss:$16 sps:$4 sm:$0xff]   ;;  %v3586_v17 = vld [vmem:[#allocation7 + $0x80] ss:$16 sps:$4 sm:$0xff]  }
  0x50   : > { %v3590_v18 = vld [vmem:[#allocation7 + $0x88] ss:$16 sps:$4 sm:$0xff]   ;;  %v3592_v19 = vld [vmem:[#allocation7 + $0x64] ss:$16 sps:$4 sm:$0xff]   ;;  %v3596_v20 = vld [vmem:[#allocation7 + $0x6c] ss:$16 sps:$4 sm:$0xff]  }
  0x51   : > { %850 = vmatpush1.bf16.msra.mxu0 %v3564_v9  ;;  %1043 = vmatpush1.bf16.msra.mxu1 %v3567_v10  ;;  %v3598_v21 = vld [vmem:[#allocation7 + $0x60] ss:$16 sps:$4 sm:$0xff]   ;;  %v3600_v22 = vld [vmem:[#allocation7 + $0x68] ss:$16 sps:$4 sm:$0xff]   ;;  %v3604_v23 = vld [vmem:[#allocation7 + $0x44] ss:$16 sps:$4 sm:$0xff]  }
  0x52   : > { %851 = vmatprep.subr.bf16.mxu0 %v3570_v11  ;;  %1044 = vmatprep.subr.bf16.mxu1 %v3572_v12  ;;  %v3608_v24 = vld [vmem:[#allocation7 + $0x4c] ss:$16 sps:$4 sm:$0xff]   ;;  %v3610_v25 = vld [vmem:[#allocation7 + $0x40] ss:$16 sps:$4 sm:$0xff]   ;;  %v3614_v26 = vld [vmem:[#allocation7 + $0x48] ss:$16 sps:$4 sm:$0xff]  }
  0x53   : > { %v3616_v27 = vld [vmem:[#allocation7 + $0x24] ss:$16 sps:$4 sm:$0xff]   ;;  %v3620_v28 = vld [vmem:[#allocation7 + $0x2c] ss:$16 sps:$4 sm:$0xff]   ;;  %v3622_v29 = vld [vmem:[#allocation7 + $0x20] ss:$16 sps:$4 sm:$0xff]  }
  0x54   : > { %v3624_v30 = vld [vmem:[#allocation7 + $0x28] ss:$16 sps:$4 sm:$0xff]   ;;  %v3628_v31 = vld [vmem:[#allocation7 + $0x4] ss:$16 sps:$4 sm:$0xff]   ;;  %v3632_v32 = vld [vmem:[#allocation7 + $0xc] ss:$16 sps:$4 sm:$0xff]  }
  0x55   : > { %852 = vmatpush1.bf16.msra.mxu0 %v3574_v13  ;;  %1045 = vmatpush1.bf16.msra.mxu1 %v3576_v14  ;;  %v3634_v33 = vld [vmem:[#allocation7] ss:$16 sps:$4 sm:$0xff]   ;;  %v3638_v34 = vld [vmem:[#allocation7 + $0x8] ss:$16 sps:$4 sm:$0xff]   ;;  %v3640_v35 = vld [vmem:[#allocation7 + $0x1e4] ss:$16 sps:$4 sm:$0xff]  }
  0x56   : > { %853 = vmatprep.subr.bf16.mxu0 %v3580_v15  ;;  %1046 = vmatprep.subr.bf16.mxu1 %v3584_v16  ;;  %v3644_v36 = vld [vmem:[#allocation7 + $0x1ec] ss:$16 sps:$4 sm:$0xff]   ;;  %v3646_v37 = vld [vmem:[#allocation7 + $0x1e0] ss:$16 sps:$4 sm:$0xff]   ;;  %v3648_v38 = vld [vmem:[#allocation7 + $0x1e8] ss:$16 sps:$4 sm:$0xff]  }
  0x57   : > { %v3652_v39 = vld [vmem:[#allocation7 + $0x1c4] ss:$16 sps:$4 sm:$0xff]   ;;  %v3656_v40 = vld [vmem:[#allocation7 + $0x1cc] ss:$16 sps:$4 sm:$0xff]   ;;  %v3658_v41 = vld [vmem:[#allocation7 + $0x1c0] ss:$16 sps:$4 sm:$0xff]  }
  0x58   : > { %v3662_v42 = vld [vmem:[#allocation7 + $0x1c8] ss:$16 sps:$4 sm:$0xff]   ;;  %v3664_v43 = vld [vmem:[#allocation7 + $0x1a4] ss:$16 sps:$4 sm:$0xff]   ;;  %v3668_v44 = vld [vmem:[#allocation7 + $0x1ac] ss:$16 sps:$4 sm:$0xff]  }
  0x59   : > { %854 = vmatpush1.bf16.msra.mxu0 %v3586_v17  ;;  %1047 = vmatpush1.bf16.msra.mxu1 %v3590_v18  ;;  %v3670_v45 = vld [vmem:[#allocation7 + $0x1a0] ss:$16 sps:$4 sm:$0xff]   ;;  %v3672_v46 = vld [vmem:[#allocation7 + $0x1a8] ss:$16 sps:$4 sm:$0xff]   ;;  %v3676_v47 = vld [vmem:[#allocation7 + $0x184] ss:$16 sps:$4 sm:$0xff]  }
  0x5a   : > { %855 = vmatprep.subr.bf16.mxu0 %v3592_v19  ;;  %1048 = vmatprep.subr.bf16.mxu1 %v3596_v20  ;;  %v3680_v48 = vld [vmem:[#allocation7 + $0x18c] ss:$16 sps:$4 sm:$0xff]   ;;  %v3686_v51 = vld [vmem:[#allocation7 + $0x180] ss:$16 sps:$4 sm:$0xff]   ;;  %v3688_v52 = vld [vmem:[#allocation7 + $0x188] ss:$16 sps:$4 sm:$0xff]  }
  0x5b   : > { %v432_v49 = vld [vmem:[%s3536_s23 + $0x8] sm:$0xff]  ;;  %v434_v50 = vld [vmem:[%s3536_s23 + $0x18] sm:$0xff]  ;;  %v3692_v54 = vld [vmem:[#allocation7 + $0x164] ss:$16 sps:$4 sm:$0xff]   ;;  %vm1265_vm0 = vcmask 1046528   ;;  %vm1424_vm1 = vcmask 1045504  }
  0x5c   : > { %v496_v53 = vpack.c.bf16 %v434_v50, %v432_v49  ;;  %v3694_v55 = vld [vmem:[#allocation7 + $0x16c] ss:$16 sps:$4 sm:$0xff]   ;;  %v3698_v56 = vld [vmem:[#allocation7 + $0x160] ss:$16 sps:$4 sm:$0xff]   ;;  %v3700_v57 = vld [vmem:[#allocation7 + $0x168] ss:$16 sps:$4 sm:$0xff]  }
  0x5d   : > { %856 = vmatpush1.bf16.msra.mxu0 %v3598_v21  ;;  %1049 = vmatpush1.bf16.msra.mxu1 %v3600_v22  ;;  %v3704_v58 = vld [vmem:[#allocation7 + $0x144] ss:$16 sps:$4 sm:$0xff]   ;;  %v3706_v59 = vld [vmem:[#allocation7 + $0x14c] ss:$16 sps:$4 sm:$0xff]   ;;  %v3710_v60 = vld [vmem:[#allocation7 + $0x140] ss:$16 sps:$4 sm:$0xff]  }
  0x5e   : > { %857 = vmatprep.subr.bf16.mxu0 %v3604_v23  ;;  %1050 = vmatprep.subr.bf16.mxu1 %v3608_v24  ;;  %4536 = vst [vmem:[#allocation14_spill] sm:$0xff] %v3706_v59  ;;  %4537 = vst [vmem:[#allocation15_spill] sm:$0xff] %v3710_v60  ;;  %v3712_v61 = vld [vmem:[#allocation7 + $0x148] ss:$16 sps:$4 sm:$0xff]   ;;  %v3716_v62 = vld [vmem:[#allocation7 + $0x124] ss:$16 sps:$4 sm:$0xff]  }
  0x5f   : > { %879 = vmatprep.mubr.bf16.mxu0 %v496_v53  ;;  %1072 = vmatprep.mubr.bf16.mxu1 %v496_v53  ;;  %4538 = vst [vmem:[#allocation16_spill] sm:$0xff] %v3712_v61  ;;  %4539 = vst [vmem:[#allocation17_spill] sm:$0xff] %v3716_v62  ;;  %v3718_v63 = vld [vmem:[#allocation7 + $0x12c] ss:$16 sps:$4 sm:$0xff]   ;;  %v3722_v0 = vld [vmem:[#allocation7 + $0x120] ss:$16 sps:$4 sm:$0xff]  }
  0x60   : > { %4540 = vst [vmem:[#allocation18_spill] sm:$0xff] %v3718_v63  ;;  %v3724_v1 = vld [vmem:[#allocation7 + $0x128] ss:$16 sps:$4 sm:$0xff]   ;;  %v3728_v2 = vld [vmem:[#allocation7 + $0x104] ss:$16 sps:$4 sm:$0xff]   ;;  %vm1583_vm2 = vcmask 1044480  }
  0x61   : > { %858 = vmatpush1.bf16.msra.mxu0 %v3610_v25  ;;  %1051 = vmatpush1.bf16.msra.mxu1 %v3614_v26  ;;  %4541 = vst [vmem:[#allocation19_spill] sm:$0xff] %v3724_v1  ;;  %4542 = vst [vmem:[#allocation20_spill] sm:$0xff] %v3728_v2  ;;  %v3730_v49 = vld [vmem:[#allocation7 + $0x10c] ss:$16 sps:$4 sm:$0xff]   ;;  %v3732_v50 = vld [vmem:[#allocation7 + $0x100] ss:$16 sps:$4 sm:$0xff]  }
  0x62   : > { %859 = vmatprep.subr.bf16.mxu0 %v3616_v27  ;;  %1052 = vmatprep.subr.bf16.mxu1 %v3620_v28  ;;  %4543 = vst [vmem:[#allocation21_spill] sm:$0xff] %v3730_v49  ;;  %v3736_v53 = vld [vmem:[#allocation7 + $0x108] ss:$16 sps:$4 sm:$0xff]   ;;  %s4003_s1 = scalar_select %p359_p3, 1, 0  ;;  %vm1757_vm3 = vcmask 1041409  }
  0x63   : > { %vm1808_vm5 = vcmask 1047559   ;;  %vm1801_vm6 = vcmask 1046534   ;;  %p2876_p5 = scmp.eq.s32.totalorder %s3378_s29, 1  ;;  %p3117_p11 = scmp.ne.s32.totalorder %s3378_s29, 1 }
  0x65   : > { %860 = vmatpush1.bf16.msra.mxu0 %v3622_v29  ;;  %1053 = vmatpush1.bf16.msra.mxu1 %v3624_v30  ;;  %s2882_s11 = scalar_select %p2876_p5, 1, 0 }
  0x66   : > { %861 = vmatprep.subr.bf16.mxu0 %v3628_v31  ;;  %1054 = vmatprep.subr.bf16.mxu1 %v3632_v32 }
  0x69   : > { %862 = vmatpush1.bf16.msra.mxu0 %v3634_v33  ;;  %1055 = vmatpush1.bf16.msra.mxu1 %v3638_v34 }
  0x6a   : > { %863 = vmatprep.subr.bf16.mxu0 %v3640_v35  ;;  %1056 = vmatprep.subr.bf16.mxu1 %v3644_v36 }
  0x6d   : > { %864 = vmatpush2.bf16.msra.mxu0 %v3646_v37  ;;  %1057 = vmatpush2.bf16.msra.mxu1 %v3648_v38 }
  0x6e   : > { %865 = vmatprep.subr.bf16.mxu0 %v3652_v39  ;;  %1058 = vmatprep.subr.bf16.mxu1 %v3656_v40 }
  0x71   : > { %866 = vmatpush2.bf16.msra.mxu0 %v3658_v41  ;;  %1059 = vmatpush2.bf16.msra.mxu1 %v3662_v42 }
  0x72   : > { %867 = vmatprep.subr.bf16.mxu0 %v3664_v43  ;;  %1060 = vmatprep.subr.bf16.mxu1 %v3668_v44 }
  0x75   : > { %868 = vmatpush2.bf16.msra.mxu0 %v3670_v45  ;;  %1061 = vmatpush2.bf16.msra.mxu1 %v3672_v46 }
  0x76   : > { %869 = vmatprep.subr.bf16.mxu0 %v3676_v47  ;;  %1062 = vmatprep.subr.bf16.mxu1 %v3680_v48 }
  0x79   : > { %870 = vmatpush2.bf16.msra.mxu0 %v3686_v51  ;;  %1063 = vmatpush2.bf16.msra.mxu1 %v3688_v52 }
  0x7a   : > { %871 = vmatprep.subr.bf16.mxu0 %v3692_v54  ;;  %1064 = vmatprep.subr.bf16.mxu1 %v3694_v55 }
  0x7d   : > { %872 = vmatpush2.bf16.msra.mxu0 %v3698_v56  ;;  %1065 = vmatpush2.bf16.msra.mxu1 %v3700_v57 }
  0x7e   : > { %873 = vmatprep.subr.bf16.mxu0 %v3704_v58  ;;  %1066 = vmatprep.subr.bf16.mxu1 %v3706_v59 }
  0x81   : > { %874 = vmatpush2.bf16.msra.mxu0 %v3710_v60  ;;  %1067 = vmatpush2.bf16.msra.mxu1 %v3712_v61  ;;  %v431_v61 = vld [vmem:[%s3536_s23] sm:$0xff]  ;;  %v433_v60 = vld [vmem:[%s3536_s23 + $0x10] sm:$0xff] }
  0x82   : > { %875 = vmatprep.subr.bf16.mxu0 %v3716_v62  ;;  %1068 = vmatprep.subr.bf16.mxu1 %v3718_v63  ;;  %v436_v63 = vld [vmem:[%s3536_s23 + $0x28] sm:$0xff]  ;;  %v438_v62 = vld [vmem:[%s3536_s23 + $0x38] sm:$0xff]  ;;  %v495_v59 = vpack.c.bf16 %v433_v60, %v431_v61 }
  0x83   : > { %v440_v60 = vld [vmem:[%s3536_s23 + $0x48] sm:$0xff]  ;;  %v442_v61 = vld [vmem:[%s3536_s23 + $0x58] sm:$0xff] }
  0x85   : > { %876 = vmatpush2.bf16.msra.mxu0 %v3722_v0  ;;  %1069 = vmatpush2.bf16.msra.mxu1 %v3724_v1  ;;  %v498_v1 = vpack.c.bf16 %v438_v62, %v436_v63  ;;  %v472_v62 = vld [vmem:[%s3536_s23 + $0x248] sm:$0xff]  ;;  %v474_v63 = vld [vmem:[%s3536_s23 + $0x258] sm:$0xff] }
  0x86   : > { %877 = vmatprep.subr.bf16.mxu0 %v3728_v2  ;;  %1070 = vmatprep.subr.bf16.mxu1 %v3730_v49  ;;  %v435_v49 = vld [vmem:[%s3536_s23 + $0x20] sm:$0xff]  ;;  %v437_v2 = vld [vmem:[%s3536_s23 + $0x30] sm:$0xff] }
  0x89   : > { %878 = vmatpush2.bf16.msra.mxu0 %v3732_v50  ;;  %1071 = vmatpush2.bf16.msra.mxu1 %v3736_v53 }
  0x8a   : > { %1916 = vmatprep.subr.bf16.mxu0 %v3548_v3  ;;  %2109 = vmatprep.subr.bf16.mxu1 %v3550_v4  ;;  %v497_v3 = vpack.c.bf16 %v437_v2, %v435_v49  ;;  %v500_v4 = vpack.c.bf16 %v442_v61, %v440_v60  ;;  %v471_v2 = vld [vmem:[%s3536_s23 + $0x240] sm:$0xff]  ;;  %v473_v49 = vld [vmem:[%s3536_s23 + $0x250] sm:$0xff] }
  0x8b   : > { %v515_v60 = vpack.c.bf16 %v473_v49, %v471_v2 }
  0x8c   : > { %880 = vmatmul.mubr.bf16.vlgmr.msra.gmra.mxu0 %v495_v59  ;;  %1073 = vmatmul.mubr.bf16.vlgmr.msra.gmra.mxu1 %v495_v59  ;;  %v469_v59 = vld [vmem:[%s3536_s23 + $0x230] sm:$0xff] }
  0x8d   : > { %1917 = vmatpush1.bf16.msra.mxu0 %v3553_v5  ;;  %2110 = vmatpush1.bf16.msra.mxu1 %v3555_v6  ;;  %v439_v5 = vld [vmem:[%s3536_s23 + $0x40] sm:$0xff]  ;;  %v441_v6 = vld [vmem:[%s3536_s23 + $0x50] sm:$0xff] }
  0x8e   : > { %889 = vmatprep.mubr.bf16.mxu0 %v498_v1  ;;  %1082 = vmatprep.mubr.bf16.mxu1 %v498_v1  ;;  %v516_v1 = vpack.c.bf16 %v474_v63, %v472_v62  ;;  %v1836_v62 = vld [vmem:[%s3536_s23 + $0x180] sm:$0xff]  ;;  %v1838_v63 = vld [vmem:[%s3536_s23 + $0x190] sm:$0xff] }
  0x8f   : > { %1918 = vmatprep.subr.bf16.mxu0 %v3558_v7  ;;  %2111 = vmatprep.subr.bf16.mxu1 %v3562_v8  ;;  %v444_v7 = vld [vmem:[%s3536_s23 + $0x68] sm:$0xff]  ;;  %v446_v8 = vld [vmem:[%s3536_s23 + $0x78] sm:$0xff]  ;;  %v1892_v2 = vpack.c.bf16 %v1838_v63, %v1836_v62 }
  0x91   : > { %1919 = vmatpush1.bf16.msra.mxu0 %v3564_v9  ;;  %2112 = vmatpush1.bf16.msra.mxu1 %v3567_v10  ;;  %v499_v9 = vpack.c.bf16 %v441_v6, %v439_v5  ;;  %v502_v10 = vpack.c.bf16 %v446_v8, %v444_v7  ;;  %v480_v5 = vld [vmem:[%s3536_s23 + $0x288] sm:$0xff]  ;;  %v482_v6 = vld [vmem:[%s3536_s23 + $0x298] sm:$0xff] }
  0x92   : > { %1920 = vmatprep.subr.bf16.mxu0 %v3570_v11  ;;  %2113 = vmatprep.subr.bf16.mxu1 %v3572_v12  ;;  %v443_v11 = vld [vmem:[%s3536_s23 + $0x60] sm:$0xff]  ;;  %v445_v12 = vld [vmem:[%s3536_s23 + $0x70] sm:$0xff]  ;;  %v520_v8 = vpack.c.bf16 %v482_v6, %v480_v5 }
  0x93   : > { %v1844_v5 = vld [vmem:[%s3536_s23 + $0x1c0] sm:$0xff]  ;;  %v1846_v6 = vld [vmem:[%s3536_s23 + $0x1d0] sm:$0xff] }
  0x94   : > { %890 = vmatmul.mubr.bf16.gmra.mxu0 %v497_v3  ;;  %1083 = vmatmul.mubr.bf16.gmra.mxu1 %v497_v3  ;;  %v475_v3 = vld [vmem:[%s3536_s23 + $0x260] sm:$0xff] }
  0x95   : > { %899 = vmatprep.mubr.bf16.mxu0 %v500_v4  ;;  %1092 = vmatprep.mubr.bf16.mxu1 %v500_v4  ;;  %v477_v4 = vld [vmem:[%s3536_s23 + $0x270] sm:$0xff] }
  0x96   : > { %1921 = vmatpush1.bf16.msra.mxu0 %v3574_v13  ;;  %2114 = vmatpush1.bf16.msra.mxu1 %v3576_v14  ;;  %v448_v13 = vld [vmem:[%s3536_s23 + $0x88] sm:$0xff]  ;;  %v450_v14 = vld [vmem:[%s3536_s23 + $0x98] sm:$0xff]  ;;  %v517_v7 = vpack.c.bf16 %v477_v4, %v475_v3 }
  0x97   : > { %1922 = vmatprep.subr.bf16.mxu0 %v3580_v15  ;;  %2115 = vmatprep.subr.bf16.mxu1 %v3584_v16  ;;  %v501_v15 = vpack.c.bf16 %v445_v12, %v443_v11  ;;  %v504_v16 = vpack.c.bf16 %v450_v14, %v448_v13  ;;  %v484_v11 = vld [vmem:[%s3536_s23 + $0x2a8] sm:$0xff]  ;;  %v486_v12 = vld [vmem:[%s3536_s23 + $0x2b8] sm:$0xff] }
  0x98   : > { %v522_v14 = vpack.c.bf16 %v486_v12, %v484_v11  ;;  %v1848_v11 = vld [vmem:[%s3536_s23 + $0x1e0] sm:$0xff]  ;;  %v1850_v12 = vld [vmem:[%s3536_s23 + $0x1f0] sm:$0xff] }
  0x9a   : > { %1923 = vmatpush1.bf16.msra.mxu0 %v3586_v17  ;;  %2116 = vmatpush1.bf16.msra.mxu1 %v3590_v18  ;;  %v447_v17 = vld [vmem:[%s3536_s23 + $0x80] sm:$0xff]  ;;  %v449_v18 = vld [vmem:[%s3536_s23 + $0x90] sm:$0xff] }
  0x9b   : > { %1924 = vmatprep.subr.bf16.mxu0 %v3592_v19  ;;  %2117 = vmatprep.subr.bf16.mxu1 %v3596_v20  ;;  %v452_v19 = vld [vmem:[%s3536_s23 + $0xa8] sm:$0xff]  ;;  %v454_v20 = vld [vmem:[%s3536_s23 + $0xb8] sm:$0xff] }
  0x9c   : > { %900 = vmatmul.mubr.bf16.gmra.mxu0 %v499_v9  ;;  %1093 = vmatmul.mubr.bf16.gmra.mxu1 %v499_v9  ;;  %v479_v9 = vld [vmem:[%s3536_s23 + $0x280] sm:$0xff] }
  0x9d   : > { %909 = vmatprep.mubr.bf16.mxu0 %v502_v10  ;;  %1102 = vmatprep.mubr.bf16.mxu1 %v502_v10  ;;  %v481_v10 = vld [vmem:[%s3536_s23 + $0x290] sm:$0xff] }
  0x9e   : > { %1925 = vmatpush1.bf16.msra.mxu0 %v3598_v21  ;;  %2118 = vmatpush1.bf16.msra.mxu1 %v3600_v22  ;;  %v503_v21 = vpack.c.bf16 %v449_v18, %v447_v17  ;;  %v506_v22 = vpack.c.bf16 %v454_v20, %v452_v19  ;;  %v519_v13 = vpack.c.bf16 %v481_v10, %v479_v9  ;;  %v488_v17 = vld [vmem:[%s3536_s23 + $0x2c8] sm:$0xff]  ;;  %v490_v18 = vld [vmem:[%s3536_s23 + $0x2d8] sm:$0xff] }
  0x9f   : > { %1926 = vmatprep.subr.bf16.mxu0 %v3604_v23  ;;  %2119 = vmatprep.subr.bf16.mxu1 %v3608_v24  ;;  %v451_v23 = vld [vmem:[%s3536_s23 + $0xa0] sm:$0xff]  ;;  %v453_v24 = vld [vmem:[%s3536_s23 + $0xb0] sm:$0xff]  ;;  %v524_v20 = vpack.c.bf16 %v490_v18, %v488_v17  ;;  %v1896_v9 = vpack.c.bf16 %v1846_v6, %v1844_v5 }
  0xa0   : > { %v1852_v17 = vld [vmem:[%s3536_s23 + $0x300] sm:$0xff]  ;;  %v1854_v18 = vld [vmem:[%s3536_s23 + $0x310] sm:$0xff] }
  0xa2   : > { %1927 = vmatpush1.bf16.msra.mxu0 %v3610_v25  ;;  %2120 = vmatpush1.bf16.msra.mxu1 %v3614_v26  ;;  %v456_v25 = vld [vmem:[%s3536_s23 + $0xc8] sm:$0xff]  ;;  %v458_v26 = vld [vmem:[%s3536_s23 + $0xd8] sm:$0xff] }
  0xa3   : > { %1928 = vmatprep.subr.bf16.mxu0 %v3616_v27  ;;  %2121 = vmatprep.subr.bf16.mxu1 %v3620_v28  ;;  %v505_v27 = vpack.c.bf16 %v453_v24, %v451_v23  ;;  %v508_v28 = vpack.c.bf16 %v458_v26, %v456_v25  ;;  %v492_v23 = vld [vmem:[%s3536_s23 + $0x2e8] sm:$0xff]  ;;  %v494_v24 = vld [vmem:[%s3536_s23 + $0x2f8] sm:$0xff] }
  0xa4   : > { %910 = vmatmul.mubr.bf16.gmra.mxu0 %v501_v15  ;;  %1103 = vmatmul.mubr.bf16.gmra.mxu1 %v501_v15  ;;  %v483_v15 = vld [vmem:[%s3536_s23 + $0x2a0] sm:$0xff]  ;;  %v526_v26 = vpack.c.bf16 %v494_v24, %v492_v23 }
  0xa5   : > { %919 = vmatprep.mubr.bf16.mxu0 %v504_v16  ;;  %1112 = vmatprep.mubr.bf16.mxu1 %v504_v16  ;;  %v485_v16 = vld [vmem:[%s3536_s23 + $0x2b0] sm:$0xff] }
  0xa6   : > { %1929 = vmatpush1.bf16.msra.mxu0 %v3622_v29  ;;  %2122 = vmatpush1.bf16.msra.mxu1 %v3624_v30  ;;  %v455_v29 = vld [vmem:[%s3536_s23 + $0xc0] sm:$0xff]  ;;  %v457_v30 = vld [vmem:[%s3536_s23 + $0xd0] sm:$0xff]  ;;  %v521_v19 = vpack.c.bf16 %v485_v16, %v483_v15  ;;  %v1898_v15 = vpack.c.bf16 %v1850_v12, %v1848_v11 }
  0xa7   : > { %1930 = vmatprep.subr.bf16.mxu0 %v3628_v31  ;;  %2123 = vmatprep.subr.bf16.mxu1 %v3632_v32  ;;  %v460_v31 = vld [vmem:[%s3536_s23 + $0xe8] sm:$0xff]  ;;  %v462_v32 = vld [vmem:[%s3536_s23 + $0xf8] sm:$0xff] }
  0xaa   : > { %1931 = vmatpush1.bf16.msra.mxu0 %v3634_v33  ;;  %2124 = vmatpush1.bf16.msra.mxu1 %v3638_v34  ;;  %v507_v33 = vpack.c.bf16 %v457_v30, %v455_v29  ;;  %v510_v34 = vpack.c.bf16 %v462_v32, %v460_v31  ;;  %v1821_v29 = vld [vmem:[%s3536_s23 + $0x108] sm:$0xff]  ;;  %v1823_v30 = vld [vmem:[%s3536_s23 + $0x118] sm:$0xff] }
  0xab   : > { %1932 = vmatprep.subr.bf16.mxu0 %v3640_v35  ;;  %2125 = vmatprep.subr.bf16.mxu1 %v3644_v36  ;;  %v459_v35 = vld [vmem:[%s3536_s23 + $0xe0] sm:$0xff]  ;;  %v461_v36 = vld [vmem:[%s3536_s23 + $0xf0] sm:$0xff]  ;;  %v1885_v32 = vpack.c.bf16 %v1823_v30, %v1821_v29  ;;  %v1861_v29 = vld [vmem:[%s3536_s23 + $0x348] sm:$0xff] }
  0xac   : > { %920 = vmatmul.mubr.bf16.gmra.mxu0 %v503_v21  ;;  %1113 = vmatmul.mubr.bf16.gmra.mxu1 %v503_v21  ;;  %v487_v21 = vld [vmem:[%s3536_s23 + $0x2c0] sm:$0xff]  ;;  %v1863_v30 = vld [vmem:[%s3536_s23 + $0x358] sm:$0xff] }
  0xad   : > { %929 = vmatprep.mubr.bf16.mxu0 %v506_v22  ;;  %1122 = vmatprep.mubr.bf16.mxu1 %v506_v22  ;;  %v489_v22 = vld [vmem:[%s3536_s23 + $0x2d0] sm:$0xff] }
  0xae   : > { %1933 = vmatpush2.bf16.msra.mxu0 %v3646_v37  ;;  %2126 = vmatpush2.bf16.msra.mxu1 %v3648_v38  ;;  %v464_v37 = vld [vmem:[%s3536_s23 + $0x208] sm:$0xff]  ;;  %v466_v38 = vld [vmem:[%s3536_s23 + $0x218] sm:$0xff]  ;;  %v523_v25 = vpack.c.bf16 %v489_v22, %v487_v21  ;;  %v1900_v21 = vpack.c.bf16 %v1854_v18, %v1852_v17  ;;  %v1866_v17 = vld [vmem:[%s3536_s23 + $0x370] sm:$0xff] }
  0xaf   : > { %1934 = vmatprep.subr.bf16.mxu0 %v3652_v39  ;;  %2127 = vmatprep.subr.bf16.mxu1 %v3656_v40  ;;  %v4544_v39 = vld [vmem:[#allocation14_spill] sm:$0xff]  ;;  %v509_v40 = vpack.c.bf16 %v461_v36, %v459_v35  ;;  %v1825_v35 = vld [vmem:[%s3536_s23 + $0x128] sm:$0xff]  ;;  %v1827_v36 = vld [vmem:[%s3536_s23 + $0x138] sm:$0xff] }
  0xb2   : > { %1935 = vmatpush2.bf16.msra.mxu0 %v3658_v41  ;;  %2128 = vmatpush2.bf16.msra.mxu1 %v3662_v42  ;;  %v512_v41 = vpack.c.bf16 %v466_v38, %v464_v37  ;;  %v4545_v42 = vld [vmem:[#allocation15_spill] sm:$0xff]  ;;  %v1887_v38 = vpack.c.bf16 %v1827_v36, %v1825_v35 }
  0xb3   : > { %1936 = vmatprep.subr.bf16.mxu0 %v3664_v43  ;;  %2129 = vmatprep.subr.bf16.mxu1 %v3668_v44  ;;  %v4546_v43 = vld [vmem:[#allocation16_spill] sm:$0xff]  ;;  %v4547_v44 = vld [vmem:[#allocation17_spill] sm:$0xff] }
  0xb4   : > { %930 = vmatmul.mubr.bf16.gmra.mxu0 %v505_v27  ;;  %1123 = vmatmul.mubr.bf16.gmra.mxu1 %v505_v27  ;;  %v491_v27 = vld [vmem:[%s3536_s23 + $0x2e0] sm:$0xff] }
  0xb5   : > { %939 = vmatprep.mubr.bf16.mxu0 %v508_v28  ;;  %1132 = vmatprep.mubr.bf16.mxu1 %v508_v28  ;;  %v493_v28 = vld [vmem:[%s3536_s23 + $0x2f0] sm:$0xff] }
  0xb6   : > { %1937 = vmatpush2.bf16.msra.mxu0 %v3670_v45  ;;  %2130 = vmatpush2.bf16.msra.mxu1 %v3672_v46  ;;  %v4548_v45 = vld [vmem:[#allocation18_spill] sm:$0xff]  ;;  %v525_v31 = vpack.c.bf16 %v493_v28, %v491_v27 }
  0xb7   : > { %1938 = vmatprep.subr.bf16.mxu0 %v3676_v47  ;;  %2131 = vmatprep.subr.bf16.mxu1 %v3680_v48  ;;  %v463_v46 = vld [vmem:[%s3536_s23 + $0x200] sm:$0xff]  ;;  %v465_v47 = vld [vmem:[%s3536_s23 + $0x210] sm:$0xff]  ;;  %v468_v48 = vld [vmem:[%s3536_s23 + $0x228] sm:$0xff] }
  0xba   : > { %1939 = vmatpush2.bf16.msra.mxu0 %v3686_v51  ;;  %2132 = vmatpush2.bf16.msra.mxu1 %v3688_v52  ;;  %v470_v51 = vld [vmem:[%s3536_s23 + $0x238] sm:$0xff]  ;;  %v4549_v52 = vld [vmem:[#allocation19_spill] sm:$0xff] }
  0xbb   : > { %1940 = vmatprep.subr.bf16.mxu0 %v3692_v54  ;;  %2133 = vmatprep.subr.bf16.mxu1 %v3694_v55  ;;  %v4550_v54 = vld [vmem:[#allocation20_spill] sm:$0xff]  ;;  %v4551_v55 = vld [vmem:[#allocation21_spill] sm:$0xff] }
  0xbc   : > { %940 = vmatmul.mubr.bf16.gmra.mxu0 %v507_v33  ;;  %1133 = vmatmul.mubr.bf16.gmra.mxu1 %v507_v33  ;;  %v1820_v33 = vld [vmem:[%s3536_s23 + $0x100] sm:$0xff] }
  0xbd   : > { %949 = vmatprep.mubr.bf16.mxu0 %v510_v34  ;;  %1142 = vmatprep.mubr.bf16.mxu1 %v510_v34  ;;  %v1822_v34 = vld [vmem:[%s3536_s23 + $0x110] sm:$0xff] }
  0xbe   : > { %1941 = vmatpush2.bf16.msra.mxu0 %v3698_v56  ;;  %2134 = vmatpush2.bf16.msra.mxu1 %v3700_v57  ;;  %v511_v56 = vpack.c.bf16 %v465_v47, %v463_v46  ;;  %v514_v57 = vpack.c.bf16 %v470_v51, %v468_v48  ;;  %v1884_v37 = vpack.c.bf16 %v1822_v34, %v1820_v33  ;;  %v1830_v46 = vld [vmem:[%s3536_s23 + $0x150] sm:$0xff]  ;;  %v1833_v47 = vld [vmem:[%s3536_s23 + $0x168] sm:$0xff]  ;;  %v1835_v48 = vld [vmem:[%s3536_s23 + $0x178] sm:$0xff] }
  0xbf   : > { %1942 = vmatprep.subr.bf16.mxu0 %v3704_v58  ;;  %2135 = vmatprep.subr.bf16.mxu1 %v4544_v39  ;;  %v467_v58 = vld [vmem:[%s3536_s23 + $0x220] sm:$0xff]  ;;  %v1905_v34 = vpack.c.bf16 %v1863_v30, %v1861_v29 }
  0xc0   : > { %v1824_v39 = vld [vmem:[%s3536_s23 + $0x120] sm:$0xff] }
  0xc2   : > { %1943 = vmatpush2.bf16.msra.mxu0 %v4545_v42  ;;  %2136 = vmatpush2.bf16.msra.mxu1 %v4546_v43  ;;  %v1831_v42 = vld [vmem:[%s3536_s23 + $0x158] sm:$0xff] }
  0xc3   : > { %1944 = vmatprep.subr.bf16.mxu0 %v4547_v44  ;;  %2137 = vmatprep.subr.bf16.mxu1 %v4548_v45  ;;  %v1828_v45 = vld [vmem:[%s3536_s23 + $0x140] sm:$0xff] }
  0xc4   : > { %950 = vmatmul.mubr.bf16.gmra.mxu0 %v509_v40  ;;  %1143 = vmatmul.mubr.bf16.gmra.mxu1 %v509_v40  ;;  %v1826_v40 = vld [vmem:[%s3536_s23 + $0x130] sm:$0xff]  ;;  %v1888_v51 = vpack.c.bf16 %v1830_v46, %v1828_v45 }
  0xc5   : > { %959 = vmatprep.mubr.bf16.mxu0 %v512_v41  ;;  %1152 = vmatprep.mubr.bf16.mxu1 %v512_v41  ;;  %v1829_v41 = vld [vmem:[%s3536_s23 + $0x148] sm:$0xff]  ;;  %v1886_v43 = vpack.c.bf16 %v1826_v40, %v1824_v39 }
  0xc6   : > { %1945 = vmatpush2.bf16.msra.mxu0 %v3722_v0  ;;  %2138 = vmatpush2.bf16.msra.mxu1 %v4549_v52  ;;  %v513_v0 = vpack.c.bf16 %v469_v59, %v467_v58  ;;  %v1889_v44 = vpack.c.bf16 %v1831_v42, %v1829_v41  ;;  %v1891_v52 = vpack.c.bf16 %v1835_v48, %v1833_v47  ;;  %v1862_v47 = vld [vmem:[%s3536_s23 + $0x350] sm:$0xff]  ;;  %v1865_v48 = vld [vmem:[%s3536_s23 + $0x368] sm:$0xff] }
  0xc7   : > { %1946 = vmatprep.subr.bf16.mxu0 %v4550_v54  ;;  %2139 = vmatprep.subr.bf16.mxu1 %v4551_v55  ;;  %v1832_v54 = vld [vmem:[%s3536_s23 + $0x160] sm:$0xff]  ;;  %v1834_v55 = vld [vmem:[%s3536_s23 + $0x170] sm:$0xff] }
  0xc8   : > { %v1890_v58 = vpack.c.bf16 %v1834_v55, %v1832_v54 }
  0xca   : > { %1947 = vmatpush2.bf16.msra.mxu0 %v3732_v50  ;;  %2140 = vmatpush2.bf16.msra.mxu1 %v3736_v53  ;;  %v476_v50 = vld [vmem:[%s3536_s23 + $0x268] sm:$0xff]  ;;  %v478_v53 = vld [vmem:[%s3536_s23 + $0x278] sm:$0xff] }
  0xcb   : > { %v518_v61 = vpack.c.bf16 %v478_v53, %v476_v50  ;;  %v1840_v50 = vld [vmem:[%s3536_s23 + $0x1a0] sm:$0xff]  ;;  %v1842_v53 = vld [vmem:[%s3536_s23 + $0x1b0] sm:$0xff] }
  0xcc   : > { %960 = vmatmul.mubr.bf16.gmra.mxu0 %v511_v56  ;;  %1153 = vmatmul.mubr.bf16.gmra.mxu1 %v511_v56  ;;  %v1837_v56 = vld [vmem:[%s3536_s23 + $0x188] sm:$0xff]  ;;  %v1894_v3 = vpack.c.bf16 %v1842_v53, %v1840_v50 }
  0xcd   : > { %969 = vmatprep.mubr.bf16.mxu0 %v514_v57  ;;  %1162 = vmatprep.mubr.bf16.mxu1 %v514_v57  ;;  %v1839_v57 = vld [vmem:[%s3536_s23 + $0x198] sm:$0xff] }
  0xce   : > { %v1893_v59 = vpack.c.bf16 %v1839_v57, %v1837_v56 }
  0xd4   : > { %970 = vmatmul.mubr.bf16.gmra.mxu0 %v513_v0  ;;  %1163 = vmatmul.mubr.bf16.gmra.mxu1 %v513_v0  ;;  %v1841_v0 = vld [vmem:[%s3536_s23 + $0x1a8] sm:$0xff] }
  0xd5   : > { %979 = vmatprep.mubr.bf16.mxu0 %v516_v1  ;;  %1172 = vmatprep.mubr.bf16.mxu1 %v516_v1  ;;  %v1843_v1 = vld [vmem:[%s3536_s23 + $0x1b8] sm:$0xff] }
  0xd6   : > { %v1895_v49 = vpack.c.bf16 %v1843_v1, %v1841_v0 }
  0xdc   : > { %980 = vmatmul.mubr.bf16.gmra.mxu0 %v515_v60  ;;  %1173 = vmatmul.mubr.bf16.gmra.mxu1 %v515_v60  ;;  %v1845_v60 = vld [vmem:[%s3536_s23 + $0x1c8] sm:$0xff] }
  0xdd   : > { %989 = vmatprep.mubr.bf16.mxu0 %v518_v61  ;;  %1182 = vmatprep.mubr.bf16.mxu1 %v518_v61  ;;  %v1847_v61 = vld [vmem:[%s3536_s23 + $0x1d8] sm:$0xff] }
  0xde   : > { %v1897_v4 = vpack.c.bf16 %v1847_v61, %v1845_v60 }
  0xe4   : > { %990 = vmatmul.mubr.bf16.gmra.mxu0 %v517_v7  ;;  %1183 = vmatmul.mubr.bf16.gmra.mxu1 %v517_v7  ;;  %v1849_v7 = vld [vmem:[%s3536_s23 + $0x1e8] sm:$0xff] }
  0xe5   : > { %999 = vmatprep.mubr.bf16.mxu0 %v520_v8  ;;  %1192 = vmatprep.mubr.bf16.mxu1 %v520_v8  ;;  %v1851_v8 = vld [vmem:[%s3536_s23 + $0x1f8] sm:$0xff] }
  0xe6   : > { %v1899_v10 = vpack.c.bf16 %v1851_v8, %v1849_v7 }
  0xec   : > { %1000 = vmatmul.mubr.bf16.gmra.mxu0 %v519_v13  ;;  %1193 = vmatmul.mubr.bf16.gmra.mxu1 %v519_v13  ;;  %v1853_v13 = vld [vmem:[%s3536_s23 + $0x308] sm:$0xff] }
  0xed   : > { %1009 = vmatprep.mubr.bf16.mxu0 %v522_v14  ;;  %1202 = vmatprep.mubr.bf16.mxu1 %v522_v14  ;;  %v1855_v14 = vld [vmem:[%s3536_s23 + $0x318] sm:$0xff] }
  0xee   : > { %v1901_v16 = vpack.c.bf16 %v1855_v14, %v1853_v13 }
  0xf4   : > { %1010 = vmatmul.mubr.bf16.gmra.mxu0 %v521_v19  ;;  %1203 = vmatmul.mubr.bf16.gmra.mxu1 %v521_v19  ;;  %v1857_v19 = vld [vmem:[%s3536_s23 + $0x328] sm:$0xff] }
  0xf5   : > { %1019 = vmatprep.mubr.bf16.mxu0 %v524_v20  ;;  %1212 = vmatprep.mubr.bf16.mxu1 %v524_v20  ;;  %v1859_v20 = vld [vmem:[%s3536_s23 + $0x338] sm:$0xff] }
  0xf6   : > { %v1903_v22 = vpack.c.bf16 %v1859_v20, %v1857_v19 }
  0xfc   : > { %1020 = vmatmul.mubr.bf16.gmra.mxu0 %v523_v25  ;;  %1213 = vmatmul.mubr.bf16.gmra.mxu1 %v523_v25  ;;  %v1856_v25 = vld [vmem:[%s3536_s23 + $0x320] sm:$0xff] }
  0xfd   : > { %1029 = vmatprep.mubr.bf16.mxu0 %v526_v26  ;;  %1222 = vmatprep.mubr.bf16.mxu1 %v526_v26  ;;  %v1858_v26 = vld [vmem:[%s3536_s23 + $0x330] sm:$0xff] }
  0xfe   : > { %v1902_v33 = vpack.c.bf16 %v1858_v26, %v1856_v25 }
 0x104   : > { %1030 = vmatmul.mubr.bf16.gmra.mxu0 %v525_v31  ;;  %1223 = vmatmul.mubr.bf16.gmra.mxu1 %v525_v31 }
 0x105   : > { %1948 = vmatprep.mubr.bf16.mxu0 %v1885_v32  ;;  %2141 = vmatprep.mubr.bf16.mxu1 %v1885_v32 }
 0x10c   : > { %1949 = vmatmul.mubr.bf16.vlgmr.msra.gmra.mxu0 %v1884_v37  ;;  %2142 = vmatmul.mubr.bf16.vlgmr.msra.gmra.mxu1 %v1884_v37 }
 0x10d   : > { %1958 = vmatprep.mubr.bf16.mxu0 %v1887_v38  ;;  %2151 = vmatprep.mubr.bf16.mxu1 %v1887_v38 }
 0x114   : > { %1959 = vmatmul.mubr.bf16.gmra.mxu0 %v1886_v43  ;;  %2152 = vmatmul.mubr.bf16.gmra.mxu1 %v1886_v43  ;;  %v1860_v43 = vld [vmem:[%s3536_s23 + $0x340] sm:$0xff] }
 0x115   : > { %1968 = vmatprep.mubr.bf16.mxu0 %v1889_v44  ;;  %2161 = vmatprep.mubr.bf16.mxu1 %v1889_v44 }
 0x11c   : > { %1969 = vmatmul.mubr.bf16.gmra.mxu0 %v1888_v51  ;;  %2162 = vmatmul.mubr.bf16.gmra.mxu1 %v1888_v51  ;;  %v1867_v51 = vld [vmem:[%s3536_s23 + $0x378] sm:$0xff] }
 0x11d   : > { %1978 = vmatprep.mubr.bf16.mxu0 %v1891_v52  ;;  %2171 = vmatprep.mubr.bf16.mxu1 %v1891_v52 }
 0x124   : > { %1979 = vmatmul.mubr.bf16.gmra.mxu0 %v1890_v58  ;;  %2172 = vmatmul.mubr.bf16.gmra.mxu1 %v1890_v58 }
 0x125   : > { %1988 = vmatprep.mubr.bf16.mxu0 %v1893_v59  ;;  %2181 = vmatprep.mubr.bf16.mxu1 %v1893_v59 }
 0x12c   : > { %1989 = vmatmul.mubr.bf16.gmra.mxu0 %v1892_v2  ;;  %2182 = vmatmul.mubr.bf16.gmra.mxu1 %v1892_v2  ;;  %v1904_v2 = vpack.c.bf16 %v1862_v47, %v1860_v43 }
 0x12d   : > { %1998 = vmatprep.mubr.bf16.mxu0 %v1895_v49  ;;  %2191 = vmatprep.mubr.bf16.mxu1 %v1895_v49  ;;  %v1907_v49 = vpack.c.bf16 %v1867_v51, %v1865_v48 }
 0x134   : > { %1999 = vmatmul.mubr.bf16.gmra.mxu0 %v1894_v3  ;;  %2192 = vmatmul.mubr.bf16.gmra.mxu1 %v1894_v3 }
 0x135   : > { %2008 = vmatprep.mubr.bf16.mxu0 %v1897_v4  ;;  %2201 = vmatprep.mubr.bf16.mxu1 %v1897_v4 }
 0x13c   : > { %2009 = vmatmul.mubr.bf16.gmra.mxu0 %v1896_v9  ;;  %2202 = vmatmul.mubr.bf16.gmra.mxu1 %v1896_v9 }
 0x13d   : > { %2018 = vmatprep.mubr.bf16.mxu0 %v1899_v10  ;;  %2211 = vmatprep.mubr.bf16.mxu1 %v1899_v10 }
 0x144   : > { %2019 = vmatmul.mubr.bf16.gmra.mxu0 %v1898_v15  ;;  %2212 = vmatmul.mubr.bf16.gmra.mxu1 %v1898_v15 }
 0x145   : > { %2028 = vmatprep.mubr.bf16.mxu0 %v1901_v16  ;;  %2221 = vmatprep.mubr.bf16.mxu1 %v1901_v16  ;;  %v1864_v16 = vld [vmem:[%s3536_s23 + $0x360] sm:$0xff] }
 0x14c   : > { %v881_v23 = vpop.f32.mrf.mxu0  ;;  %v3906_v24 = vpop.f32.mrf.mxu1  ;;  %2029 = vmatmul.mubr.bf16.gmra.mxu0 %v1900_v21  ;;  %2222 = vmatmul.mubr.bf16.gmra.mxu1 %v1900_v21 }
 0x14d   : > { %2038 = vmatprep.mubr.bf16.mxu0 %v1903_v22  ;;  %2231 = vmatprep.mubr.bf16.mxu1 %v1903_v22  ;;  %v1425_v37 = vrot.slane %v3906_v24, 2  ;;  %v1869_v22 = vld [vmem:[%s3536_s23 + $0x388] sm:$0xff] }
 0x14e   : > { %v3910_v27 = vpop.f32.mrf.mxu0  ;;  %v3912_v28 = vpop.f32.mrf.mxu1 }
 0x14f   : > { %v1266_v38 = vrot.slane %v3910_v27, 1  ;;  %v1584_v52 = vrot.slane %v3912_v28, 3 }
 0x150   : > { %v885_v31 = vpop.f32.mrf.mxu0  ;;  %v1078_v32 = vpop.f32.mrf.mxu1 }
 0x151   : > { %v1426_v39 = vrot.slane %v1078_v32, 2 }
 0x152   : > { %v887_v35 = vpop.f32.mrf.mxu0  ;;  %v1080_v36 = vpop.f32.mrf.mxu1 }
 0x153   : > { %v1267_v40 = vrot.slane %v887_v35, 1  ;;  %v1585_v45 = vrot.slane %v1080_v36, 3  ;;  %v1427_v57 = vsel %vm1424_vm1, %v1425_v37, %v1426_v39 }
 0x154   : > { %v891_v41 = vpop.f32.mrf.mxu0  ;;  %v1084_v42 = vpop.f32.mrf.mxu1  ;;  %2039 = vmatmul.mubr.bf16.gmra.mxu0 %v1902_v33  ;;  %2232 = vmatmul.mubr.bf16.gmra.mxu1 %v1902_v33  ;;  %v1906_v33 = vpack.c.bf16 %v1866_v17, %v1864_v16 }
 0x155   : > { %v1268_v44 = vsel %vm1265_vm0, %v1266_v38, %v1267_v40  ;;  %v1428_v46 = vrot.slane %v1084_v42, 2  ;;  %2048 = vmatprep.mubr.bf16.mxu0 %v1905_v34  ;;  %2241 = vmatprep.mubr.bf16.mxu1 %v1905_v34  ;;  %v1586_v50 = vsel %vm1583_vm2, %v1584_v52, %v1585_v45 }
 0x156   : > { %v1360_v54 = vadd.f32 %v1268_v44, %v881_v23  ;;  %v893_v55 = vpop.f32.mrf.mxu0  ;;  %v1086_v56 = vpop.f32.mrf.mxu1  ;;  %v1871_v23 = vld [vmem:[%s3536_s23 + $0x398] sm:$0xff] }
 0x157   : > { %v1429_v58 = vsel %vm1424_vm1, %v1426_v39, %v1428_v46  ;;  %v1269_v59 = vrot.slane %v893_v55, 1  ;;  %v1587_v62 = vrot.slane %v1086_v56, 3  ;;  %v1909_v37 = vpack.c.bf16 %v1871_v23, %v1869_v22  ;;  %v1868_v55 = vld [vmem:[%s3536_s23 + $0x380] sm:$0xff]  ;;  %v1870_v56 = vld [vmem:[%s3536_s23 + $0x390] sm:$0xff] }
 0x158   : > { %v1519_v63 = vadd.f32 %v1427_v57, %v1360_v54  ;;  %v895_v0 = vpop.f32.mrf.mxu0  ;;  %v1088_v1 = vpop.f32.mrf.mxu1  ;;  %v1872_v22 = vld [vmem:[%s3536_s23 + $0x3a0] sm:$0xff]  ;;  %v1874_v23 = vld [vmem:[%s3536_s23 + $0x3b0] sm:$0xff] }
 0x159   : > { %v1270_v53 = vsel %vm1265_vm0, %v1267_v40, %v1269_v59  ;;  %v1588_v60 = vsel %vm1583_vm2, %v1585_v45, %v1587_v62  ;;  %v1430_v61 = vrot.slane %v1088_v1, 2 }
 0x15a   : > { %v3929_v3 = vadd.f32 %v1586_v50, %v1519_v63  ;;  %v1361_v4 = vadd.f32 %v1270_v53, %v885_v31  ;;  %v897_v5 = vpop.f32.mrf.mxu0  ;;  %v1090_v6 = vpop.f32.mrf.mxu1  ;;  %v1873_v63 = vld [vmem:[%s3536_s23 + $0x3a8] sm:$0xff] }
 0x15b   : > { %v1431_v7 = vsel %vm1424_vm1, %v1428_v46, %v1430_v61  ;;  %v1271_v8 = vrot.slane %v897_v5, 1  ;;  %v1589_v9 = vrot.slane %v1090_v6, 3 }
 0x15c   : > { %v1520_v10 = vadd.f32 %v1429_v58, %v1361_v4  ;;  %v901_v11 = vpop.f32.mrf.mxu0  ;;  %v1094_v12 = vpop.f32.mrf.mxu1  ;;  %2049 = vmatmul.mubr.bf16.gmra.mxu0 %v1904_v2  ;;  %2242 = vmatmul.mubr.bf16.gmra.mxu1 %v1904_v2 }
 0x15d   : > { %v1272_v13 = vsel %vm1265_vm0, %v1269_v59, %v1271_v8  ;;  %v1590_v14 = vsel %vm1583_vm2, %v1587_v62, %v1589_v9  ;;  %v1432_v15 = vrot.slane %v1094_v12, 2  ;;  %2058 = vmatprep.mubr.bf16.mxu0 %v1907_v49  ;;  %2251 = vmatprep.mubr.bf16.mxu1 %v1907_v49 }
 0x15e   : > { %v3936_v18 = vadd.f32 %v1588_v60, %v1520_v10  ;;  %v1362_v19 = vadd.f32 %v1272_v13, %v891_v41  ;;  %v903_v20 = vpop.f32.mrf.mxu0  ;;  %v1096_v21 = vpop.f32.mrf.mxu1 }
 0x15f   : > { %v1433_v25 = vsel %vm1424_vm1, %v1430_v61, %v1432_v15  ;;  %v1273_v26 = vrot.slane %v903_v20, 1  ;;  %v1591_v29 = vrot.slane %v1096_v21, 3 }
 0x160   : > { %v1521_v30 = vadd.f32 %v1431_v7, %v1362_v19  ;;  %v905_v31 = vpop.f32.mrf.mxu0  ;;  %v1098_v32 = vpop.f32.mrf.mxu1 }
 0x161   : > { %v1274_v34 = vsel %vm1265_vm0, %v1271_v8, %v1273_v26  ;;  %v1592_v35 = vsel %vm1583_vm2, %v1589_v9, %v1591_v29  ;;  %v1434_v36 = vrot.slane %v1098_v32, 2  ;;  %v1879_v32 = vld [vmem:[%s3536_s23 + $0x3d8] sm:$0xff] }
 0x162   : > { %v1680_v38 = vadd.f32 %v1590_v14, %v1521_v30  ;;  %v1363_v39 = vadd.f32 %v1274_v34, %v895_v0  ;;  %v907_v40 = vpop.f32.mrf.mxu0  ;;  %v1100_v41 = vpop.f32.mrf.mxu1  ;;  %v1875_v0 = vld [vmem:[%s3536_s23 + $0x3b8] sm:$0xff] }
 0x163   : > { %v1435_v42 = vsel %vm1424_vm1, %v1432_v15, %v1434_v36  ;;  %v1275_v43 = vrot.slane %v907_v40, 1  ;;  %v1593_v44 = vrot.slane %v1100_v41, 3  ;;  %v1911_v7 = vpack.c.bf16 %v1875_v0, %v1873_v63  ;;  %v1876_v0 = vld [vmem:[%s3536_s23 + $0x3c0] sm:$0xff] }
 0x164   : > { %v1711_v45 = vmax.f32 %v3929_v3, %v1680_v38  ;;  %v1522_v46 = vadd.f32 %v1433_v25, %v1363_v39  ;;  %v911_v47 = vpop.f32.mrf.mxu0  ;;  %v1104_v48 = vpop.f32.mrf.mxu1  ;;  %2059 = vmatmul.mubr.bf16.gmra.mxu0 %v1906_v33  ;;  %2252 = vmatmul.mubr.bf16.gmra.mxu1 %v1906_v33  ;;  %v1908_v3 = vpack.c.bf16 %v1870_v56, %v1868_v55 }
 0x165   : > { %v1276_v51 = vsel %vm1265_vm0, %v1273_v26, %v1275_v43  ;;  %v1594_v52 = vsel %vm1583_vm2, %v1591_v29, %v1593_v44  ;;  %v1436_v54 = vrot.slane %v1104_v48, 2  ;;  %2068 = vmatprep.mubr.bf16.mxu0 %v1909_v37  ;;  %2261 = vmatprep.mubr.bf16.mxu1 %v1909_v37  ;;  %v1910_v40 = vpack.c.bf16 %v1874_v23, %v1872_v22 }
 0x166   : > { %v1681_v57 = vadd.f32 %v1592_v35, %v1522_v46  ;;  %v1364_v58 = vadd.f32 %v1276_v51, %v901_v11  ;;  %v913_v59 = vpop.f32.mrf.mxu0  ;;  %v1106_v62 = vpop.f32.mrf.mxu1 }
 0x167   : > { %v1437_v1 = vsel %vm1424_vm1, %v1434_v36, %v1436_v54  ;;  %v1277_v2 = vrot.slane %v913_v59, 1  ;;  %v1595_v49 = vrot.slane %v1106_v62, 3 }
 0x168   : > { %v1712_v50 = vmax.f32 %v3936_v18, %v1681_v57  ;;  %v1523_v53 = vadd.f32 %v1435_v42, %v1364_v58  ;;  %v915_v60 = vpop.f32.mrf.mxu0  ;;  %v1108_v61 = vpop.f32.mrf.mxu1 }
 0x169   : > { %v1278_v4 = vsel %vm1265_vm0, %v1275_v43, %v1277_v2  ;;  %v1596_v5 = vsel %vm1583_vm2, %v1593_v44, %v1595_v49  ;;  %v1438_v6 = vrot.slane %v1108_v61, 2  ;;  %v1883_v61 = vld [vmem:[%s3536_s23 + $0x3f8] sm:$0xff] }
 0x16a   : > { %v1682_v8 = vadd.f32 %v1594_v52, %v1523_v53  ;;  %v1365_v9 = vadd.f32 %v1278_v4, %v905_v31  ;;  %v917_v10 = vpop.f32.mrf.mxu0  ;;  %v1110_v11 = vpop.f32.mrf.mxu1  ;;  %v1877_v31 = vld [vmem:[%s3536_s23 + $0x3c8] sm:$0xff] }
 0x16b   : > { %v1439_v12 = vsel %vm1424_vm1, %v1436_v54, %v1438_v6  ;;  %v1279_v13 = vrot.slane %v917_v10, 1  ;;  %v1597_v14 = vrot.slane %v1110_v11, 3  ;;  %v1913_v44 = vpack.c.bf16 %v1879_v32, %v1877_v31  ;;  %v1880_v32 = vld [vmem:[%s3536_s23 + $0x3e0] sm:$0xff] }
 0x16c   : > { %v3956_v15 = vmax.f32 %v1711_v45, %v1682_v8  ;;  %v1524_v16 = vadd.f32 %v1437_v1, %v1365_v9  ;;  %v921_v17 = vpop.f32.mrf.mxu0  ;;  %v1114_v18 = vpop.f32.mrf.mxu1  ;;  %2069 = vmatmul.mubr.bf16.gmra.mxu0 %v1908_v3  ;;  %2262 = vmatmul.mubr.bf16.gmra.mxu1 %v1908_v3  ;;  %v1878_v1 = vld [vmem:[%s3536_s23 + $0x3d0] sm:$0xff] }
 0x16d   : > { %v1280_v19 = vsel %vm1265_vm0, %v1277_v2, %v1279_v13  ;;  %v1598_v20 = vsel %vm1583_vm2, %v1595_v49, %v1597_v14  ;;  %v1440_v21 = vrot.slane %v1114_v18, 2  ;;  %2078 = vmatprep.mubr.bf16.mxu0 %v1911_v7  ;;  %2271 = vmatprep.mubr.bf16.mxu1 %v1911_v7  ;;  %v1912_v10 = vpack.c.bf16 %v1878_v1, %v1876_v0 }
 0x16e   : > { %v1683_v25 = vadd.f32 %v1596_v5, %v1524_v16  ;;  %v1366_v26 = vadd.f32 %v1280_v19, %v911_v47  ;;  %v923_v29 = vpop.f32.mrf.mxu0  ;;  %v1116_v30 = vpop.f32.mrf.mxu1 }
 0x16f   : > { %v1441_v33 = vsel %vm1424_vm1, %v1438_v6, %v1440_v21  ;;  %v1281_v34 = vrot.slane %v923_v29, 1  ;;  %v1599_v35 = vrot.slane %v1116_v30, 3 }
 0x170   : > { %v3965_v36 = vmax.f32 %v1712_v50, %v1683_v25  ;;  %v1525_v37 = vadd.f32 %v1439_v12, %v1366_v26  ;;  %v925_v38 = vpop.f32.mrf.mxu0  ;;  %v1118_v39 = vpop.f32.mrf.mxu1 }
 0x171   : > { %v1282_v41 = vsel %vm1265_vm0, %v1279_v13, %v1281_v34  ;;  %v1600_v42 = vsel %vm1583_vm2, %v1597_v14, %v1599_v35  ;;  %v1442_v43 = vrot.slane %v1118_v39, 2 }
 0x172   : > { %v1684_v45 = vadd.f32 %v1598_v20, %v1525_v37  ;;  %v1367_v46 = vadd.f32 %v1282_v41, %v915_v60  ;;  %v927_v47 = vpop.f32.mrf.mxu0  ;;  %v1120_v48 = vpop.f32.mrf.mxu1  ;;  %v1881_v60 = vld [vmem:[%s3536_s23 + $0x3e8] sm:$0xff] }
 0x173   : > { %v1443_v51 = vsel %vm1424_vm1, %v1440_v21, %v1442_v43  ;;  %v1283_v52 = vrot.slane %v927_v47, 1  ;;  %v1601_v54 = vrot.slane %v1120_v48, 3  ;;  %v1915_v14 = vpack.c.bf16 %v1883_v61, %v1881_v60 }
 0x174   : > { %v1715_v55 = vmax.f32 %v3956_v15, %v1684_v45  ;;  %v1526_v56 = vadd.f32 %v1441_v33, %v1367_v46  ;;  %v931_v57 = vpop.f32.mrf.mxu0  ;;  %v1124_v58 = vpop.f32.mrf.mxu1  ;;  %2079 = vmatmul.mubr.bf16.gmra.mxu0 %v1910_v40  ;;  %2272 = vmatmul.mubr.bf16.gmra.mxu1 %v1910_v40  ;;  %v1882_v33 = vld [vmem:[%s3536_s23 + $0x3f0] sm:$0xff] }
 0x175   : > { %v1284_v59 = vsel %vm1265_vm0, %v1281_v34, %v1283_v52  ;;  %v1602_v62 = vsel %vm1583_vm2, %v1599_v35, %v1601_v54  ;;  %v1444_v63 = vrot.slane %v1124_v58, 2  ;;  %2088 = vmatprep.mubr.bf16.mxu0 %v1913_v44  ;;  %2281 = vmatprep.mubr.bf16.mxu1 %v1913_v44  ;;  %v1914_v45 = vpack.c.bf16 %v1882_v33, %v1880_v32 }
 0x176   : > { %v1685_v2 = vadd.f32 %v1600_v42, %v1526_v56  ;;  %v1368_v49 = vadd.f32 %v1284_v59, %v921_v17  ;;  %v933_v50 = vpop.f32.mrf.mxu0  ;;  %v1126_v53 = vpop.f32.mrf.mxu1  ;;  %v1782_v32 = vrot.slane %v3906_v24, 1 }
 0x177   : > { %v1445_v3 = vsel %vm1424_vm1, %v1442_v43, %v1444_v63  ;;  %v1285_v4 = vrot.slane %v933_v50, 1  ;;  %v1603_v5 = vrot.slane %v1126_v53, 3 }
 0x178   : > { %v1716_v6 = vmax.f32 %v3965_v36, %v1685_v2  ;;  %v1527_v7 = vadd.f32 %v1443_v51, %v1368_v49  ;;  %v935_v8 = vpop.f32.mrf.mxu0  ;;  %v1128_v9 = vpop.f32.mrf.mxu1 }
 0x179   : > { %v1286_v11 = vsel %vm1265_vm0, %v1283_v52, %v1285_v4  ;;  %v1604_v12 = vsel %vm1583_vm2, %v1601_v54, %v1603_v5  ;;  %v1446_v13 = vrot.slane %v1128_v9, 2 }
 0x17a   : > { %v1686_v15 = vadd.f32 %v1602_v62, %v1527_v7  ;;  %v1369_v16 = vadd.f32 %v1286_v11, %v925_v38  ;;  %v937_v17 = vpop.f32.mrf.mxu0  ;;  %v1130_v18 = vpop.f32.mrf.mxu1 }
 0x17b   : > { %v1447_v19 = vsel %vm1424_vm1, %v1444_v63, %v1446_v13  ;;  %v1287_v20 = vrot.slane %v937_v17, 1  ;;  %v1605_v21 = vrot.slane %v1130_v18, 3 }
 0x17c   : > { %v3982_v22 = vmax.f32 %v1715_v55, %v1686_v15  ;;  %v1528_v23 = vadd.f32 %v1445_v3, %v1369_v16  ;;  %v941_v25 = vpop.f32.mrf.mxu0  ;;  %v1134_v26 = vpop.f32.mrf.mxu1  ;;  %2089 = vmatmul.mubr.bf16.gmra.mxu0 %v1912_v10  ;;  %2282 = vmatmul.mubr.bf16.gmra.mxu1 %v1912_v10  ;;  %v1777_v3 = vld [vmem:[#allocation3 + $0x4] sm:$0x3] }
 0x17d   : > { %v1288_v29 = vsel %vm1265_vm0, %v1285_v4, %v1287_v20  ;;  %v1606_v30 = vsel %vm1583_vm2, %v1603_v5, %v1605_v21  ;;  %v1448_v31 = vrot.slane %v1134_v26, 2  ;;  %2098 = vmatprep.mubr.bf16.mxu0 %v1915_v14  ;;  %2291 = vmatprep.mubr.bf16.mxu1 %v1915_v14 }
 0x17e   : > { %v1687_v34 = vadd.f32 %v1604_v12, %v1528_v23  ;;  %v1370_v35 = vadd.f32 %v1288_v29, %v931_v57  ;;  %v943_v36 = vpop.f32.mrf.mxu0  ;;  %v1136_v37 = vpop.f32.mrf.mxu1 }
 0x17f   : > { %v1449_v38 = vsel %vm1424_vm1, %v1446_v13, %v1448_v31  ;;  %v1289_v39 = vrot.slane %v943_v36, 1  ;;  %v1607_v40 = vrot.slane %v1136_v37, 3 }
 0x180   : > { %v3989_v41 = vmax.f32 %v1716_v6, %v1687_v34  ;;  %v1529_v42 = vadd.f32 %v1447_v19, %v1370_v35  ;;  %v945_v43 = vpop.f32.mrf.mxu0  ;;  %v1138_v44 = vpop.f32.mrf.mxu1 }
 0x181   : > { %v1290_v46 = vsel %vm1265_vm0, %v1287_v20, %v1289_v39  ;;  %v1608_v47 = vsel %vm1583_vm2, %v1605_v21, %v1607_v40  ;;  %v1450_v48 = vrot.slane %v1138_v44, 2 }
 0x182   : > { %v1688_v51 = vadd.f32 %v1606_v30, %v1529_v42  ;;  %v1371_v52 = vadd.f32 %v1290_v46, %v935_v8  ;;  %v947_v54 = vpop.f32.mrf.mxu0  ;;  %v1140_v55 = vpop.f32.mrf.mxu1  ;;  %v1761_v46 = vld [vmem:[#allocation3] sm:$0x3] }
 0x183   : > { %v1451_v56 = vsel %vm1424_vm1, %v1448_v31, %v1450_v48  ;;  %v1291_v57 = vrot.slane %v947_v54, 1  ;;  %v1609_v58 = vrot.slane %v1140_v55, 3  ;;  %v1793_v31 = vstv %s4003_s1 }
 0x184   : > { %v1719_v59 = vmax.f32 %v3982_v22, %v1688_v51  ;;  %v1530_v62 = vadd.f32 %v1449_v38, %v1371_v52  ;;  %v951_v63 = vpop.f32.mrf.mxu0  ;;  %v1144_v0 = vpop.f32.mrf.mxu1  ;;  %2099 = vmatmul.mubr.bf16.gmra.mxu0 %v1914_v45  ;;  %2292 = vmatmul.mubr.bf16.gmra.mxu1 %v1914_v45  ;;  %v1767_v38 = vld [vmem:[#allocation3 + $0x2] sm:$0x3]  ;;  %vm1794_vm4 = vcmp.eq.s32.totalorder %v1793_v31, 1 }
 0x185   : > { %v1292_v1 = vsel %vm1265_vm0, %v1289_v39, %v1291_v57  ;;  %v1610_v2 = vsel %vm1583_vm2, %v1607_v40, %v1609_v58  ;;  %v1452_v49 = vrot.slane %v1144_v0, 2  ;;  %v1772_v39 = vrot.slane %v3912_v28, 1 }
 0x186   : > { %v1689_v50 = vadd.f32 %v1608_v47, %v1530_v62  ;;  %v1372_v53 = vadd.f32 %v1292_v1, %v941_v25  ;;  %v953_v60 = vpop.f32.mrf.mxu0  ;;  %v1146_v61 = vpop.f32.mrf.mxu1  ;;  %v1786_v40 = vrot.slane %v3912_v28, 2 }
 0x187   : > { %v1453_v4 = vsel %vm1424_vm1, %v1450_v48, %v1452_v49  ;;  %v1293_v5 = vrot.slane %v953_v60, 1  ;;  %v1611_v6 = vrot.slane %v1146_v61, 3 }
 0x188   : > { %v1720_v7 = vmax.f32 %v3989_v41, %v1689_v50  ;;  %v1531_v8 = vadd.f32 %v1451_v56, %v1372_v53  ;;  %v955_v9 = vpop.f32.mrf.mxu0  ;;  %v1148_v10 = vpop.f32.mrf.mxu1 }
 0x189   : > { %v1294_v11 = vsel %vm1265_vm0, %v1291_v57, %v1293_v5  ;;  %v1612_v12 = vsel %vm1583_vm2, %v1609_v58, %v1611_v6  ;;  %1817 = vst [vmem:[#allocation3 - $0x3] sm:$0x80] %v955_v9  ;;  %v1454_v13 = vrot.slane %v1148_v10, 2 }
 0x18a   : > { %v1690_v14 = vadd.f32 %v1610_v2, %v1531_v8  ;;  %v1373_v15 = vadd.f32 %v1294_v11, %v945_v43  ;;  %v957_v16 = vpop.f32.mrf.mxu0  ;;  %v1150_v17 = vpop.f32.mrf.mxu1 }
 0x18b   : > { %v1455_v18 = vsel %vm1424_vm1, %v1452_v49, %v1454_v13  ;;  %v1295_v19 = vrot.slane %v957_v16, 1  ;;  %v1613_v20 = vrot.slane %v1150_v17, 3 }
 0x18c   : > { %v1721_v21 = vmax.f32 %v1719_v59, %v1690_v14  ;;  %v1532_v22 = vadd.f32 %v1453_v4, %v1373_v15  ;;  %v4006_v23 = vpop.f32.mrf.mxu0  ;;  %v4008_v25 = vpop.f32.mrf.mxu1 }
 0x18d   : > { %v1296_v26 = vsel %vm1265_vm0, %v1293_v5, %v1295_v19  ;;  %v4011_v29 = vadd.f32 %v1295_v19, %v955_v9  ;;  %v1614_v30 = vsel %vm1583_vm2, %v1611_v6, %v1613_v20  ;;  %v1768_v35 = vrot.slane %v4008_v25, 7 }
 0x18e   : > { %v1691_v33 = vadd.f32 %v1612_v12, %v1532_v22  ;;  %v1374_v34 = vadd.f32 %v1296_v26, %v951_v63  ;;  %v4017_v36 = vpop.f32.mrf.mxu0  ;;  %v4019_v37 = vpop.f32.mrf.mxu1  ;;  %v1783_v1 = vsel %vm1757_vm3, %v4008_v25, %v1782_v32 }
 0x18f   : > { %v4024_v41 = vadd.f32 %v1454_v13, %v4011_v29  ;;  %v1778_v42 = vrot.slane %v4017_v36, 7  ;;  %v1769_v45 = vsel %vm1757_vm3, %v1768_v35, %v3906_v24  ;;  %v1762_v47 = vrot.slane %v4019_v37, 7 }
 0x190   : > { %v1533_v43 = vadd.f32 %v1455_v18, %v1374_v34  ;;  %v1722_v44 = vmax.f32 %v1720_v7, %v1691_v33  ;;  %v4030_v48 = vpop.f32.mrf.mxu0  ;;  %v4032_v51 = vpop.f32.mrf.mxu1  ;;  %v1771_v55 = vadd.f32 %v1769_v45, %v1767_v38  ;;  %v1773_v56 = vsel %vm1757_vm3, %v4019_v37, %v1772_v39 }
 0x191   : > { %v1693_v52 = vadd.f32 %v1613_v20, %v4024_v41  ;;  %v1779_v54 = vsel %vm1757_vm3, %v1778_v42, %v3910_v27  ;;  %v1763_v24 = vsel %vm1757_vm3, %v1762_v47, %v3912_v28  ;;  %v1787_v59 = vrot.slane %v4019_v37, 1 }
 0x192   : > { %v1692_v57 = vadd.f32 %v1614_v30, %v1533_v43  ;;  %v1781_v58 = vadd.f32 %v1779_v54, %v1777_v3  ;;  %v967_v62 = vpop.f32.mrf.mxu0  ;;  %v4042_v63 = vpop.f32.mrf.mxu1  ;;  %v1765_v27 = vadd.f32 %v1763_v24, %v1761_v46  ;;  %v1775_v2 = vadd.f32 %v1773_v56, %v1771_v55 }
 0x193   : > { %v1724_v0 = vsel %vm1583_vm2, %v1693_v52, -inf  ;;  %v1788_v28 = vsel %vm1757_vm3, %v1787_v59, %v1786_v40  ;;  %v1298_v38 = vrot.slane %v967_v62, 1  ;;  %v1456_v43 = vrot.slane %v4008_v25, 2 }
 0x194   : > { %v1723_v49 = vmax.f32 %v1721_v21, %v1692_v57  ;;  %v1725_v50 = vmax.f32 %v1722_v44, %v1724_v0  ;;  %v1785_v53 = vadd.f32 %v1783_v1, %v1781_v58  ;;  %v971_v60 = vpop.f32.mrf.mxu0  ;;  %v4047_v61 = vpop.f32.mrf.mxu1  ;;  %v1791_v3 = vmax.f32 %v1765_v27, %v1775_v2 }
 0x195   : > { %v1297_v44 = vrot.slane %v4017_v36, 1  ;;  %v1457_v45 = vrot.slane %v4032_v51, 2  ;;  %v1616_v47 = vrot.slane %v4042_v63, 3  ;;  %v1615_v36 = vrot.slane %v4019_v37, 3 }
 0x196   : > { %v4050_v4 = vmax.f32 %v1723_v49, %v1725_v50  ;;  %v4052_v5 = vadd.f32 %v1788_v28, %v1785_v53  ;;  %v973_v6 = vpop.f32.mrf.mxu0  ;;  %v4054_v7 = vpop.f32.mrf.mxu1  ;;  %v4056_v8 = vsel %vm1794_vm4, -inf, %v1791_v3  ;;  %v1459_v1 = vrot.slane %v4047_v61, 2 }
 0x197   : > { %v1300_v39 = vrot.slane %v973_v6, 1  ;;  %v1299_v56 = vsel %vm1265_vm0, %v1297_v44, %v1298_v38  ;;  %v1458_v0 = vsel %vm1424_vm1, %v1456_v43, %v1457_v45  ;;  %v1617_v50 = vsel %vm1583_vm2, %v1615_v36, %v1616_v47 }
 0x198   : > { %v1796_v9 = vmax.f32 %v4056_v8, %v4052_v5  ;;  %v975_v10 = vpop.f32.mrf.mxu0  ;;  %v1168_v11 = vpop.f32.mrf.mxu1  ;;  %v1376_v49 = vadd.f32 %v1299_v56, %v4006_v23  ;;  %v1618_v53 = vrot.slane %v4054_v7, 3 }
 0x199   : > { %v1301_v57 = vsel %vm1265_vm0, %v1298_v38, %v1300_v39  ;;  %v1461_v58 = vrot.slane %v1168_v11, 2 }
 0x19a   : > { %v977_v12 = vpop.f32.mrf.mxu0  ;;  %v4060_v13 = vpop.f32.mrf.mxu1  ;;  %v1377_v37 = vadd.f32 %v1301_v57, %v4030_v48 }
 0x19b   : > { %v1302_v32 = vrot.slane %v977_v12, 1  ;;  %v1462_v3 = vsel %vm1424_vm1, %v1459_v1, %v1461_v58  ;;  %v1620_v6 = vrot.slane %v4060_v13, 3 }
 0x19c   : > { %v4062_v14 = vpop.f32.mrf.mxu0  ;;  %v4064_v15 = vpop.f32.mrf.mxu1 }
 0x19d   : > { %v1303_v46 = vsel %vm1265_vm0, %v1300_v39, %v1302_v32  ;;  %v1463_v51 = vrot.slane %v4064_v15, 2  ;;  %v1621_v43 = vsel %vm1583_vm2, %v1618_v53, %v1620_v6 }
 0x19e   : > { %v983_v16 = vpop.f32.mrf.mxu0  ;;  %v4066_v17 = vpop.f32.mrf.mxu1  ;;  %v1378_v24 = vadd.f32 %v1303_v46, %v971_v60 }
 0x19f   : > { %v1304_v33 = vrot.slane %v983_v16, 1  ;;  %v1464_v23 = vsel %vm1424_vm1, %v1461_v58, %v1463_v51  ;;  %v1622_v12 = vrot.slane %v4066_v17, 3  ;;  %v1460_v16 = vsel %vm1424_vm1, %v1457_v45, %v1459_v1 }
 0x1a0   : > { %v4068_v18 = vpop.f32.mrf.mxu0  ;;  %v4070_v19 = vpop.f32.mrf.mxu1  ;;  %v1537_v11 = vadd.f32 %v1462_v3, %v1378_v24  ;;  %v1536_v46 = vadd.f32 %v1460_v16, %v1377_v37 }
 0x1a1   : > { %v1305_v52 = vsel %vm1265_vm0, %v1302_v32, %v1304_v33  ;;  %v1535_v32 = vadd.f32 %v1458_v0, %v1376_v49 }
 0x1a2   : > { %v987_v20 = vpop.f32.mrf.mxu0  ;;  %v4072_v21 = vpop.f32.mrf.mxu1  ;;  %v1379_v27 = vadd.f32 %v1305_v52, %v975_v10  ;;  %v1696_v52 = vadd.f32 %v1621_v43, %v1537_v11 }
 0x1a3   : > { %v1306_v25 = vrot.slane %v987_v20, 1 }
 0x1a4   : > { %v4074_v22 = vpop.f32.mrf.mxu0  ;;  %v4076_v26 = vpop.f32.mrf.mxu1  ;;  %v1538_v20 = vadd.f32 %v1464_v23, %v1379_v27 }
 0x1a5   : > { %v1307_v61 = vsel %vm1265_vm0, %v1304_v33, %v1306_v25  ;;  %v1619_v33 = vsel %vm1583_vm2, %v1616_v47, %v1618_v53  ;;  %v1467_v39 = vrot.slane %v4076_v26, 2  ;;  %v1623_v47 = vsel %vm1583_vm2, %v1620_v6, %v1622_v12 }
 0x1a6   : > { %v993_v30 = vpop.f32.mrf.mxu0  ;;  %v4078_v31 = vpop.f32.mrf.mxu1  ;;  %v1380_v38 = vadd.f32 %v1307_v61, %v4062_v14  ;;  %v1697_v57 = vadd.f32 %v1623_v47, %v1538_v20 }
 0x1a7   : > { %v1308_v59 = vrot.slane %v993_v30, 1  ;;  %v1465_v30 = vrot.slane %v4070_v19, 2  ;;  %v1626_v24 = vrot.slane %v4078_v31, 3  ;;  %v1695_v31 = vadd.f32 %v1619_v33, %v1536_v46 }
 0x1a8   : > { %v4080_v34 = vpop.f32.mrf.mxu0  ;;  %v4082_v35 = vpop.f32.mrf.mxu1 }
 0x1a9   : > { %v1309_v48 = vsel %vm1265_vm0, %v1306_v25, %v1308_v59  ;;  %v1469_v45 = vrot.slane %v4082_v35, 2  ;;  %v1466_v58 = vsel %vm1424_vm1, %v1463_v51, %v1465_v30  ;;  %v1624_v25 = vrot.slane %v4072_v21, 3 }
 0x1aa   : > { %v997_v40 = vpop.f32.mrf.mxu0  ;;  %v4084_v42 = vpop.f32.mrf.mxu1  ;;  %v1381_v44 = vadd.f32 %v1309_v48, %v4068_v18  ;;  %v1539_v36 = vadd.f32 %v1466_v58, %v1380_v38  ;;  %v1468_v35 = vsel %vm1424_vm1, %v1465_v30, %v1467_v39 }
 0x1ab   : > { %v1310_v2 = vrot.slane %v997_v40, 1  ;;  %v1470_v1 = vsel %vm1424_vm1, %v1467_v39, %v1469_v45  ;;  %v1628_v27 = vrot.slane %v4084_v42, 3  ;;  %v1627_v23 = vsel %vm1583_vm2, %v1624_v25, %v1626_v24 }
 0x1ac   : > { %v4092_v54 = vpop.f32.mrf.mxu0  ;;  %v4094_v55 = vpop.f32.mrf.mxu1 }
 0x1ad   : > { %v1311_v13 = vsel %vm1265_vm0, %v1308_v59, %v1310_v2  ;;  %v1471_v18 = vrot.slane %v4094_v55, 2 }
 0x1ae   : > { %v4100_v62 = vpop.f32.mrf.mxu0  ;;  %v4102_v63 = vpop.f32.mrf.mxu1  ;;  %v1382_v14 = vadd.f32 %v1311_v13, %v4074_v22  ;;  %v1540_v22 = vadd.f32 %v1468_v35, %v1381_v44 }
 0x1af   : > { %v1312_v10 = vrot.slane %v4100_v62, 1  ;;  %v1630_v55 = vrot.slane %v4102_v63, 3  ;;  %v1472_v3 = vsel %vm1424_vm1, %v1469_v45, %v1471_v18  ;;  %v1629_v63 = vsel %vm1583_vm2, %v1626_v24, %v1628_v27 }
 0x1b0   : > { %v4110_v60 = vpop.f32.mrf.mxu0  ;;  %v4112_v28 = vpop.f32.mrf.mxu1  ;;  %v1541_v21 = vadd.f32 %v1470_v1, %v1382_v14  ;;  %v1699_v16 = vadd.f32 %v1627_v23, %v1540_v22 }
 0x1b1   : > { %v1313_v19 = vsel %vm1265_vm0, %v1310_v2, %v1312_v10  ;;  %v1694_v2 = vadd.f32 %v1617_v50, %v1535_v32  ;;  %v1473_v13 = vrot.slane %v4112_v28, 2 }
 0x1b2   : > { %v1007_v7 = vpop.f32.mrf.mxu0  ;;  %v4121_v15 = vpop.f32.mrf.mxu1  ;;  %v1383_v59 = vadd.f32 %v1313_v19, %v4080_v34  ;;  %v1625_v34 = vsel %vm1583_vm2, %v1622_v12, %v1624_v25  ;;  %v4159_v30 = vadd.f32 %v1629_v63, %v1541_v21  ;;  %v1631_v12 = vsel %vm1583_vm2, %v1628_v27, %v1630_v55 }
 0x1b3   : > { %v1314_v51 = vrot.slane %v1007_v7, 1  ;;  %v1733_v61 = vmax.f32 %v1694_v2, %v1696_v52  ;;  %v1698_v11 = vadd.f32 %v1625_v34, %v1539_v36  ;;  %v1734_v7 = vmax.f32 %v1695_v31, %v1697_v57 }
 0x1b4   : > { %v4129_v17 = vpop.f32.mrf.mxu0  ;;  %v4131_v40 = vpop.f32.mrf.mxu1  ;;  %v1542_v42 = vadd.f32 %v1472_v3, %v1383_v59  ;;  %v1632_v39 = vrot.slane %v4121_v15, 3  ;;  %v1474_v58 = vsel %vm1424_vm1, %v1471_v18, %v1473_v13 }
 0x1b5   : > { %v1315_v20 = vsel %vm1265_vm0, %v1312_v10, %v1314_v51  ;;  %v1475_v43 = vrot.slane %v4131_v40, 2  ;;  %v1727_v10 = vrot.slane %v4050_v4, 4  ;;  %v1735_v19 = vmax.f32 %v1733_v61, %v1698_v11 }
 0x1b6   : > { %v1013_v56 = vpop.f32.mrf.mxu0  ;;  %v4139_v26 = vpop.f32.mrf.mxu1  ;;  %v4170_v46 = vadd.f32 %v1631_v12, %v1542_v42  ;;  %v1384_v52 = vadd.f32 %v1315_v20, %v4092_v54  ;;  %v4173_v14 = vmax.f32 %v1734_v7, %v1699_v16  ;;  %v1633_v54 = vsel %vm1583_vm2, %v1630_v55, %v1632_v39 }
 0x1b7   : > { %v1316_v49 = vrot.slane %v1013_v56, 1  ;;  %v1737_v57 = vmax.f32 %v1735_v19, %v4159_v30  ;;  %v1476_v59 = vsel %vm1424_vm1, %v1473_v13, %v1475_v43  ;;  %v1634_v27 = vrot.slane %v4139_v26, 3 }
 0x1b8   : > { %v1015_v62 = vpop.f32.mrf.mxu0  ;;  %v4147_v0 = vpop.f32.mrf.mxu1 }
 0x1b9   : > { %v1317_v32 = vsel %vm1265_vm0, %v1314_v51, %v1316_v49  ;;  %v1477_v15 = vrot.slane %v4147_v0, 2  ;;  %v1543_v0 = vadd.f32 %v1474_v58, %v1384_v52 }
 0x1ba   : > { %v1017_v37 = vpop.f32.mrf.mxu0  ;;  %v4152_v53 = vpop.f32.mrf.mxu1  ;;  %v1385_v56 = vadd.f32 %v1317_v32, %v4110_v60  ;;  %v1738_v60 = vmax.f32 %v4173_v14, %v4170_v46 }
 0x1bb   : > { %v1318_v6 = vrot.slane %v1017_v37, 1  ;;  %v1702_v42 = vadd.f32 %v1633_v54, %v1543_v0 }
 0x1bc   : > { %v1021_v48 = vpop.f32.mrf.mxu0  ;;  %v1214_v50 = vpop.f32.mrf.mxu1  ;;  %v1544_v21 = vadd.f32 %v1476_v59, %v1385_v56 }
 0x1bd   : > { %v1319_v44 = vsel %vm1265_vm0, %v1316_v49, %v1318_v6  ;;  %v1479_v36 = vrot.slane %v1214_v50, 2  ;;  %v1636_v49 = vrot.slane %v4152_v53, 3  ;;  %v1635_v50 = vsel %vm1583_vm2, %v1632_v39, %v1634_v27 }
 0x1be   : > { %v1023_v33 = vpop.f32.mrf.mxu0  ;;  %v4164_v38 = vpop.f32.mrf.mxu1  ;;  %v1386_v25 = vadd.f32 %v1319_v44, %v4129_v17  ;;  %v1478_v17 = vsel %vm1424_vm1, %v1475_v43, %v1477_v15  ;;  %v1703_v13 = vadd.f32 %v1635_v50, %v1544_v21  ;;  %v1739_v52 = vmax.f32 %v1737_v57, %v1702_v42 }
 0x1bf   : > { %v1320_v45 = vrot.slane %v1023_v33, 1  ;;  %v1480_v31 = vsel %vm1424_vm1, %v1477_v15, %v1479_v36  ;;  %v1638_v34 = vrot.slane %v4164_v38, 3  ;;  %v1637_v20 = vsel %vm1583_vm2, %v1634_v27, %v1636_v49 }
 0x1c0   : > { %v1025_v28 = vpop.f32.mrf.mxu0  ;;  %v1218_v47 = vpop.f32.mrf.mxu1  ;;  %v1545_v37 = vadd.f32 %v1478_v17, %v1386_v25 }
 0x1c1   : > { %v1321_v40 = vsel %vm1265_vm0, %v1318_v6, %v1320_v45  ;;  %v1481_v22 = vrot.slane %v1218_v47, 2  ;;  %v1639_v33 = vsel %vm1583_vm2, %v1636_v49, %v1638_v34 }
 0x1c2   : > { %v1027_v35 = vpop.f32.mrf.mxu0  ;;  %v1220_v24 = vpop.f32.mrf.mxu1  ;;  %v1387_v51 = vadd.f32 %v1321_v40, %v1015_v62  ;;  %v1704_v32 = vadd.f32 %v1637_v20, %v1545_v37 }
 0x1c3   : > { %v1322_v1 = vrot.slane %v1027_v35, 1  ;;  %v1482_v26 = vsel %vm1424_vm1, %v1479_v36, %v1481_v22  ;;  %v1640_v62 = vrot.slane %v1220_v24, 3  ;;  %v1740_v35 = vmax.f32 %v1738_v60, %v1703_v13 }
 0x1c4   : > { %v1031_v2 = vpop.f32.mrf.mxu0  ;;  %v1224_v18 = vpop.f32.mrf.mxu1  ;;  %v1546_v53 = vadd.f32 %v1480_v31, %v1387_v51  ;;  %v1741_v24 = vmax.f32 %v1739_v52, %v1704_v32  ;;  %v1728_v51 = vmax.f32 %v4050_v4, %v1727_v10 }
 0x1c5   : > { %v1323_v55 = vsel %vm1265_vm0, %v1320_v45, %v1322_v1  ;;  %v1483_v11 = vrot.slane %v1224_v18, 2  ;;  %v1641_v45 = vsel %vm1583_vm2, %v1638_v34, %v1640_v62 }
 0x1c6   : > { %v1388_v3 = vadd.f32 %v1323_v55, %v1021_v48  ;;  %v1033_v6 = vpop.f32.mrf.mxu0  ;;  %v1226_v61 = vpop.f32.mrf.mxu1  ;;  %v1705_v47 = vadd.f32 %v1639_v33, %v1546_v53  ;;  %v1729_v20 = vrot.slane %v1728_v51, 2 }
 0x1c7   : > { %v1324_v23 = vrot.slane %v1033_v6, 1  ;;  %v1642_v48 = vrot.slane %v1226_v61, 3  ;;  %v1484_v39 = vsel %vm1424_vm1, %v1481_v22, %v1483_v11 }
 0x1c8   : > { %v1547_v7 = vadd.f32 %v1482_v26, %v1388_v3  ;;  %v1035_v16 = vpop.f32.mrf.mxu0  ;;  %v1228_v63 = vpop.f32.mrf.mxu1  ;;  %v1742_v18 = vmax.f32 %v1740_v35, %v1705_v47 }
 0x1c9   : > { %v1325_v30 = vsel %vm1265_vm0, %v1322_v1, %v1324_v23  ;;  %v1814_v12 = vrot.slane %v1035_v16, 7  ;;  %v1485_v19 = vrot.slane %v1228_v63, 2  ;;  %v1643_v58 = vsel %vm1583_vm2, %v1640_v62, %v1642_v48 }
 0x1ca   : > { %v1389_v38 = vadd.f32 %v1325_v30, %v1025_v28  ;;  %v1037_v43 = vpop.f32.mrf.mxu0  ;;  %v1230_v44 = vpop.f32.mrf.mxu1  ;;  %v1706_v14 = vadd.f32 %v1641_v45, %v1547_v7 }
 0x1cb   : > { %1818 = vst [vmem:[#allocation3 + $0x5] sm:$0x1] %v1814_v12  ;;  %v1326_v46 = vrot.slane %v1037_v43, 1  ;;  %v1644_v36 = vrot.slane %v1230_v44, 3  ;;  %v1486_v57 = vsel %vm1424_vm1, %v1483_v11, %v1485_v19 }
 0x1cc   : > { %v1548_v56 = vadd.f32 %v1484_v39, %v1389_v38  ;;  %v1950_v15 = vpop.f32.mrf.mxu0  ;;  %v4198_v40 = vpop.f32.mrf.mxu1  ;;  %v1743_v21 = vmax.f32 %v1741_v24, %v1706_v14 }
 0x1cd   : > { %v1327_v28 = vsel %vm1265_vm0, %v1324_v23, %v1326_v46  ;;  %v1391_v25 = vadd.f32 %v1326_v46, %v1035_v16  ;;  %v1645_v55 = vsel %vm1583_vm2, %v1642_v48, %v1644_v36  ;;  %v2492_v6 = vrot.slane %v4198_v40, 2 }
 0x1ce   : > { %v1707_v54 = vadd.f32 %v1643_v58, %v1548_v56  ;;  %v1390_v59 = vadd.f32 %v1327_v28, %v1031_v2  ;;  %v4202_v22 = vpop.f32.mrf.mxu0  ;;  %v4204_v1 = vpop.f32.mrf.mxu1  ;;  %v1730_v56 = vmax.f32 %v1728_v51, %v1729_v20 }
 0x1cf   : > { %v1807_v0 = vrot.slane %v1391_v25, 7  ;;  %v1550_v27 = vadd.f32 %v1485_v19, %v1391_v25  ;;  %v2334_v61 = vrot.slane %v4202_v22, 1  ;;  %v2650_v48 = vrot.slane %v4204_v1, 3 }
 0x1d0   : > { %v1549_v17 = vadd.f32 %v1486_v57, %v1390_v59  ;;  %v1954_v60 = vpop.f32.mrf.mxu0  ;;  %v2147_v49 = vpop.f32.mrf.mxu1  ;;  %v1744_v3 = vmax.f32 %v1742_v18, %v1707_v54  ;;  %v1731_v51 = vrot.slane %v1730_v56, 1 }
 0x1d1   : > { %v1809_v2 = vsel %vm1808_vm5, %v1807_v0, %v4011_v29  ;;  %v1709_v37 = vadd.f32 %v1644_v36, %v1550_v27  ;;  %v1800_v31 = vrot.slane %v1550_v27, 7  ;;  %v2493_v11 = vrot.slane %v2147_v49, 2 }
 0x1d2   : > { %1811 = vst [vmem:[#allocation3 - $0x4] sm:$0xc0] %v1809_v2  ;;  %v1708_v34 = vadd.f32 %v1645_v55, %v1549_v17  ;;  %v1956_v4 = vpop.f32.mrf.mxu0  ;;  %v2149_v10 = vpop.f32.mrf.mxu1 }
 0x1d3   : > { %v1746_v26 = vsel %vm1583_vm2, %v1709_v37, -inf  ;;  %v1802_v62 = vsel %vm1801_vm6, %v1800_v31, %v4024_v41  ;;  %v2335_v29 = vrot.slane %v1956_v4, 1  ;;  %v2651_v16 = vrot.slane %v2149_v10, 3 }
 0x1d4   : > { %v1745_v23 = vmax.f32 %v1743_v21, %v1708_v34  ;;  %v1747_v42 = vmax.f32 %v1744_v3, %v1746_v26  ;;  %1804 = vst [vmem:[#allocation3 - $0x5] sm:$0x60] %v1802_v62  ;;  %v1960_v50 = vpop.f32.mrf.mxu0  ;;  %v2153_v53 = vpop.f32.mrf.mxu1  ;;  %v2494_v41 = vsel %vm1424_vm1, %v2492_v6, %v2493_v11 }
 0x1d5   : > { %v2336_v7 = vsel %vm1265_vm0, %v2334_v61, %v2335_v29  ;;  %v2495_v63 = vrot.slane %v2153_v53, 2  ;;  %v2652_v46 = vsel %vm1583_vm2, %v2650_v48, %v2651_v16 }
 0x1d6   : > { %v1748_v30 = vmax.f32 %v1745_v23, %v1747_v42  ;;  %v2428_v12 = vadd.f32 %v2336_v7, %v1950_v15  ;;  %v1962_v13 = vpop.f32.mrf.mxu0  ;;  %v2155_v32 = vpop.f32.mrf.mxu1  ;;  %v1710_v23 = vld [vmem:[#allocation2] sm:$0x3] }
 0x1d7   : > { %v2496_v33 = vsel %vm1424_vm1, %v2493_v11, %v2495_v63  ;;  %v2337_v38 = vrot.slane %v1962_v13, 1  ;;  %v2653_v43 = vrot.slane %v2155_v32, 3 }
 0x1d8   : > { %v1749_v44 = vrot.slane %v1748_v30, 4  ;;  %v2586_v45 = vadd.f32 %v2494_v41, %v2428_v12  ;;  %v1964_v39 = vpop.f32.mrf.mxu0  ;;  %v2157_v19 = vpop.f32.mrf.mxu1 }
 0x1d9   : > { %v2338_v52 = vsel %vm1265_vm0, %v2335_v29, %v2337_v38  ;;  %v2654_v47 = vsel %vm1583_vm2, %v2651_v16, %v2653_v43  ;;  %v2497_v14 = vrot.slane %v2157_v19, 2  ;;  %v1732_v29 = vmax.f32 %v1730_v56, %v1731_v51 }
 0x1da   : > { %v1750_v15 = vmax.f32 %v1748_v30, %v1749_v44  ;;  %v4225_v58 = vadd.f32 %v2652_v46, %v2586_v45  ;;  %v2429_v28 = vadd.f32 %v2338_v52, %v1954_v60  ;;  %v1966_v25 = vpop.f32.mrf.mxu0  ;;  %v2159_v36 = vpop.f32.mrf.mxu1 }
 0x1db   : > { %v2498_v35 = vsel %vm1424_vm1, %v2495_v63, %v2497_v14  ;;  %v2339_v24 = vrot.slane %v1966_v25, 1  ;;  %v2655_v54 = vrot.slane %v2159_v36, 3 }
 0x1dc   : > { %v1751_v59 = vrot.slane %v1750_v15, 2  ;;  %v2587_v57 = vadd.f32 %v2496_v33, %v2429_v28  ;;  %v1970_v0 = vpop.f32.mrf.mxu0  ;;  %v2163_v27 = vpop.f32.mrf.mxu1 }
 0x1dd   : > { %v2340_v18 = vsel %vm1265_vm0, %v2337_v38, %v2339_v24  ;;  %v2656_v21 = vsel %vm1583_vm2, %v2653_v43, %v2655_v54  ;;  %v2499_v17 = vrot.slane %v2163_v27, 2 }
 0x1de   : > { %v1752_v49 = vmax.f32 %v1750_v15, %v1751_v59  ;;  %v4230_v2 = vadd.f32 %v2654_v47, %v2587_v57  ;;  %v2430_v60 = vadd.f32 %v2340_v18, %v1960_v50  ;;  %v1972_v55 = vpop.f32.mrf.mxu0  ;;  %v2165_v37 = vpop.f32.mrf.mxu1 }
 0x1df   : > { %v2500_v31 = vsel %vm1424_vm1, %v2497_v14, %v2499_v17  ;;  %v2341_v34 = vrot.slane %v1972_v55, 1  ;;  %v2657_v3 = vrot.slane %v2165_v37, 3 }
 0x1e0   : > { %v1753_v6 = vrot.slane %v1752_v49, 1  ;;  %v2588_v61 = vadd.f32 %v2498_v35, %v2430_v60  ;;  %v1974_v4 = vpop.f32.mrf.mxu0  ;;  %v2167_v10 = vpop.f32.mrf.mxu1 }
 0x1e1   : > { %v2342_v26 = vsel %vm1265_vm0, %v2339_v24, %v2341_v34  ;;  %v2658_v62 = vsel %vm1583_vm2, %v2655_v54, %v2657_v3  ;;  %v2501_v11 = vrot.slane %v2167_v10, 2 }
 0x1e2   : > { %v1754_v42 = vmax.f32 %v1752_v49, %v1753_v6  ;;  %v2746_v53 = vadd.f32 %v2656_v21, %v2588_v61  ;;  %v2431_v50 = vadd.f32 %v2342_v26, %v1964_v39  ;;  %v1976_v7 = vpop.f32.mrf.mxu0  ;;  %v2169_v16 = vpop.f32.mrf.mxu1 }
 0x1e3   : > { %v2502_v63 = vsel %vm1424_vm1, %v2499_v17, %v2501_v11  ;;  %v2343_v20 = vrot.slane %v1976_v7, 1  ;;  %v2659_v30 = vrot.slane %v2169_v16, 3 }
 0x1e4   : > { %v1758_v48 = vsel %vm1757_vm3, %v1754_v42, %v1732_v29  ;;  %v2777_v12 = vmax.f32 %v4225_v58, %v2746_v53  ;;  %v2589_v13 = vadd.f32 %v2500_v31, %v2431_v50  ;;  %v1980_v32 = vpop.f32.mrf.mxu0  ;;  %v2173_v41 = vpop.f32.mrf.mxu1 }
 0x1e5   : > { %v1760_v33 = vmax.f32 %v1710_v23, %v1758_v48  ;;  %v2344_v38 = vsel %vm1265_vm0, %v2341_v34, %v2343_v20  ;;  %v2660_v43 = vsel %vm1583_vm2, %v2657_v3, %v2659_v30  ;;  %v2503_v44 = vrot.slane %v2173_v41, 2 }
 0x1e6   : > { %v2747_v45 = vadd.f32 %v2658_v62, %v2589_v13  ;;  %v2432_v39 = vadd.f32 %v2344_v38, %v1970_v0  ;;  %v1982_v19 = vpop.f32.mrf.mxu0  ;;  %v2175_v46 = vpop.f32.mrf.mxu1 }
 0x1e7   : > { %v1797_v52 = vmax.f32 %v1760_v33, %v1796_v9  ;;  %v2504_v47 = vsel %vm1424_vm1, %v2501_v11, %v2503_v44  ;;  %v2345_v14 = vrot.slane %v1982_v19, 1  ;;  %v2661_v56 = vrot.slane %v2175_v46, 3 }
 0x1e8   : > { %v2778_v15 = vmax.f32 %v4230_v2, %v2747_v45  ;;  %v2590_v58 = vadd.f32 %v2502_v63, %v2432_v39  ;;  %v1984_v28 = vpop.f32.mrf.mxu0  ;;  %v2177_v25 = vpop.f32.mrf.mxu1 }
 0x1e9   : > { %1819 = vst [vmem:[#allocation2] sm:$0x3] %v1797_v52  ;;  %v2346_v36 = vsel %vm1265_vm0, %v2343_v20, %v2345_v14  ;;  %v2662_v35 = vsel %vm1583_vm2, %v2659_v30, %v2661_v56  ;;  %v2505_v24 = vrot.slane %v2177_v25, 2 }
 0x1ea   : > { %v2748_v54 = vadd.f32 %v2660_v43, %v2590_v58  ;;  %v2433_v59 = vadd.f32 %v2346_v36, %v1974_v4  ;;  %v1986_v57 = vpop.f32.mrf.mxu0  ;;  %v2179_v5 = vpop.f32.mrf.mxu1 }
 0x1eb   : > { %v2506_v8 = vsel %vm1424_vm1, %v2503_v44, %v2505_v24  ;;  %v2347_v9 = vrot.slane %v1986_v57, 1  ;;  %v2663_v0 = vrot.slane %v2179_v5, 3 }
 0x1ec   : > { %v2779_v27 = vmax.f32 %v2777_v12, %v2748_v54  ;;  %v2591_v18 = vadd.f32 %v2504_v47, %v2433_v59  ;;  %v1990_v21 = vpop.f32.mrf.mxu0  ;;  %v2183_v17 = vpop.f32.mrf.mxu1 }
 0x1ed   : > { %v2348_v51 = vsel %vm1265_vm0, %v2345_v14, %v2347_v9  ;;  %v2664_v49 = vsel %vm1583_vm2, %v2661_v56, %v2663_v0  ;;  %v2507_v2 = vrot.slane %v2183_v17, 2 }
 0x1ee   : > { %v2749_v60 = vadd.f32 %v2662_v35, %v2591_v18  ;;  %v2434_v55 = vadd.f32 %v2348_v51, %v1980_v32  ;;  %v1992_v37 = vpop.f32.mrf.mxu0  ;;  %v2185_v31 = vpop.f32.mrf.mxu1 }
 0x1ef   : > { %v2508_v34 = vsel %vm1424_vm1, %v2505_v24, %v2507_v2  ;;  %v2349_v3 = vrot.slane %v1992_v37, 1  ;;  %v2665_v6 = vrot.slane %v2185_v31, 3 }
 0x1f0   : > { %v2780_v61 = vmax.f32 %v2778_v15, %v2749_v60  ;;  %v2592_v4 = vadd.f32 %v2506_v8, %v2434_v55  ;;  %v1994_v10 = vpop.f32.mrf.mxu0  ;;  %v2187_v26 = vpop.f32.mrf.mxu1 }
 0x1f1   : > { %v2350_v62 = vsel %vm1265_vm0, %v2347_v9, %v2349_v3  ;;  %v2666_v11 = vsel %vm1583_vm2, %v2663_v0, %v2665_v6  ;;  %v2509_v29 = vrot.slane %v2187_v26, 2 }
 0x1f2   : > { %v2750_v23 = vadd.f32 %v2664_v49, %v2592_v4  ;;  %v2435_v42 = vadd.f32 %v2350_v62, %v1984_v28  ;;  %v1996_v53 = vpop.f32.mrf.mxu0  ;;  %v2189_v50 = vpop.f32.mrf.mxu1 }
 0x1f3   : > { %v2510_v7 = vsel %vm1424_vm1, %v2507_v2, %v2509_v29  ;;  %v2351_v16 = vrot.slane %v1996_v53, 1  ;;  %v2667_v63 = vrot.slane %v2189_v50, 3 }
 0x1f4   : > { %v2781_v20 = vmax.f32 %v2779_v27, %v2750_v23  ;;  %v2593_v30 = vadd.f32 %v2508_v34, %v2435_v42  ;;  %v2000_v48 = vpop.f32.mrf.mxu0  ;;  %v2193_v12 = vpop.f32.mrf.mxu1 }
 0x1f5   : > { %v2352_v13 = vsel %vm1265_vm0, %v2349_v3, %v2351_v16  ;;  %v2668_v32 = vsel %vm1583_vm2, %v2665_v6, %v2667_v63  ;;  %v2511_v41 = vrot.slane %v2193_v12, 2 }
 0x1f6   : > { %v2751_v33 = vadd.f32 %v2666_v11, %v2593_v30  ;;  %v2436_v38 = vadd.f32 %v2352_v13, %v1990_v21  ;;  %v2002_v43 = vpop.f32.mrf.mxu0  ;;  %v2195_v44 = vpop.f32.mrf.mxu1 }
 0x1f7   : > { %v2512_v45 = vsel %vm1424_vm1, %v2509_v29, %v2511_v41  ;;  %v2353_v39 = vrot.slane %v2002_v43, 1  ;;  %v2669_v19 = vrot.slane %v2195_v44, 3 }
 0x1f8   : > { %v2782_v46 = vmax.f32 %v2780_v61, %v2751_v33  ;;  %v2594_v52 = vadd.f32 %v2510_v7, %v2436_v38  ;;  %v2004_v47 = vpop.f32.mrf.mxu0  ;;  %v2197_v14 = vpop.f32.mrf.mxu1 }
 0x1f9   : > { %v2354_v56 = vsel %vm1265_vm0, %v2351_v16, %v2353_v39  ;;  %v2670_v15 = vsel %vm1583_vm2, %v2667_v63, %v2669_v19  ;;  %v2513_v58 = vrot.slane %v2197_v14, 2 }
 0x1fa   : > { %v2752_v28 = vadd.f32 %v2668_v32, %v2594_v52  ;;  %v2437_v25 = vadd.f32 %v2354_v56, %v1994_v10  ;;  %v2006_v36 = vpop.f32.mrf.mxu0  ;;  %v2199_v35 = vpop.f32.mrf.mxu1 }
 0x1fb   : > { %v2514_v24 = vsel %vm1424_vm1, %v2511_v41, %v2513_v58  ;;  %v2355_v54 = vrot.slane %v2006_v36, 1  ;;  %v2671_v59 = vrot.slane %v2199_v35, 3 }
 0x1fc   : > { %v2783_v57 = vmax.f32 %v2781_v20, %v2752_v28  ;;  %v2595_v5 = vadd.f32 %v2512_v45, %v2437_v25  ;;  %v2010_v8 = vpop.f32.mrf.mxu0  ;;  %v2203_v9 = vpop.f32.mrf.mxu1 }
 0x1fd   : > { %v2356_v0 = vsel %vm1265_vm0, %v2353_v39, %v2355_v54  ;;  %v2672_v27 = vsel %vm1583_vm2, %v2669_v19, %v2671_v59  ;;  %v2515_v18 = vrot.slane %v2203_v9, 2  ;;  %v2840_v39 = vld [vmem:[#allocation3 + $0x4] sm:$0x3]  ;;  %v2845_v9 = vrot.slane %v4198_v40, 1 }
 0x1fe   : > { %v2753_v21 = vadd.f32 %v2670_v15, %v2595_v5  ;;  %v2438_v17 = vadd.f32 %v2356_v0, %v2000_v48  ;;  %v2012_v51 = vpop.f32.mrf.mxu0  ;;  %v2205_v49 = vpop.f32.mrf.mxu1 }
 0x1ff   : > { %v2516_v2 = vsel %vm1424_vm1, %v2513_v58, %v2515_v18  ;;  %v2357_v60 = vrot.slane %v2012_v51, 1  ;;  %v2673_v55 = vrot.slane %v2205_v49, 3  ;;  %v2836_v51 = vrot.slane %v4204_v1, 1 }
 0x200   : > { %v4263_v37 = vmax.f32 %v2782_v46, %v2753_v21  ;;  %v2596_v31 = vadd.f32 %v2514_v24, %v2438_v17  ;;  %v2014_v34 = vpop.f32.mrf.mxu0  ;;  %v2207_v3 = vpop.f32.mrf.mxu1  ;;  %v2849_v49 = vrot.slane %v4204_v1, 2 }
 0x201   : > { %v2358_v6 = vsel %vm1265_vm0, %v2355_v54, %v2357_v60  ;;  %v2674_v61 = vsel %vm1583_vm2, %v2671_v59, %v2673_v55  ;;  %v2517_v4 = vrot.slane %v2207_v3, 2  ;;  %v2831_v3 = vld [vmem:[#allocation3 + $0x2] sm:$0x3] }
 0x202   : > { %v2754_v10 = vadd.f32 %v2672_v27, %v2596_v31  ;;  %v2439_v26 = vadd.f32 %v2358_v6, %v2004_v47  ;;  %v2016_v62 = vpop.f32.mrf.mxu0  ;;  %v2209_v11 = vpop.f32.mrf.mxu1 }
 0x203   : > { %v2518_v29 = vsel %vm1424_vm1, %v2515_v18, %v2517_v4  ;;  %v2359_v23 = vrot.slane %v2016_v62, 1  ;;  %v2675_v42 = vrot.slane %v2209_v11, 3 }
 0x204   : > { %v2785_v53 = vmax.f32 %v2783_v57, %v2754_v10  ;;  %v2597_v50 = vadd.f32 %v2516_v2, %v2439_v26  ;;  %v2020_v7 = vpop.f32.mrf.mxu0  ;;  %v2213_v16 = vpop.f32.mrf.mxu1 }
 0x205   : > { %v2360_v63 = vsel %vm1265_vm0, %v2357_v60, %v2359_v23  ;;  %v2676_v20 = vsel %vm1583_vm2, %v2673_v55, %v2675_v42  ;;  %v2519_v30 = vrot.slane %v2213_v16, 2 }
 0x206   : > { %v2755_v48 = vadd.f32 %v2674_v61, %v2597_v50  ;;  %v2440_v12 = vadd.f32 %v2360_v63, %v2010_v8  ;;  %v2022_v13 = vpop.f32.mrf.mxu0  ;;  %v2215_v32 = vpop.f32.mrf.mxu1 }
 0x207   : > { %v2520_v41 = vsel %vm1424_vm1, %v2517_v4, %v2519_v30  ;;  %v2361_v33 = vrot.slane %v2022_v13, 1  ;;  %v2677_v38 = vrot.slane %v2215_v32, 3 }
 0x208   : > { %v2786_v43 = vmax.f32 %v4263_v37, %v2755_v48  ;;  %v2598_v44 = vadd.f32 %v2518_v29, %v2440_v12  ;;  %v2024_v45 = vpop.f32.mrf.mxu0  ;;  %v2217_v19 = vpop.f32.mrf.mxu1 }
 0x209   : > { %v2362_v46 = vsel %vm1265_vm0, %v2359_v23, %v2361_v33  ;;  %v2678_v52 = vsel %vm1583_vm2, %v2675_v42, %v2677_v38  ;;  %2874 = vst [vmem:[#allocation3 - $0x3] sm:$0x80] %v2024_v45  ;;  %v2521_v47 = vrot.slane %v2217_v19, 2  ;;  %v2826_v23 = vld [vmem:[#allocation3] sm:$0x3] }
 0x20a   : > { %v2756_v14 = vadd.f32 %v2676_v20, %v2598_v44  ;;  %v2441_v56 = vadd.f32 %v2362_v46, %v2014_v34  ;;  %v2026_v15 = vpop.f32.mrf.mxu0  ;;  %v2219_v58 = vpop.f32.mrf.mxu1 }
 0x20b   : > { %v2522_v28 = vsel %vm1424_vm1, %v2519_v30, %v2521_v47  ;;  %v2363_v25 = vrot.slane %v2026_v15, 1  ;;  %v2679_v36 = vrot.slane %v2219_v58, 3 }
 0x20c   : > { %v2787_v35 = vmax.f32 %v2785_v53, %v2756_v14  ;;  %v2599_v24 = vadd.f32 %v2520_v41, %v2441_v56  ;;  %v4275_v54 = vpop.f32.mrf.mxu0  ;;  %v4277_v59 = vpop.f32.mrf.mxu1 }
 0x20d   : > { %v2364_v57 = vsel %vm1265_vm0, %v2361_v33, %v2363_v25  ;;  %v4280_v5 = vadd.f32 %v2363_v25, %v2024_v45  ;;  %v2680_v8 = vsel %vm1583_vm2, %v2677_v38, %v2679_v36  ;;  %v2832_v18 = vrot.slane %v4277_v59, 7 }
 0x20e   : > { %v2757_v0 = vadd.f32 %v2678_v52, %v2599_v24  ;;  %v2442_v27 = vadd.f32 %v2364_v57, %v2020_v7  ;;  %v2032_v21 = vpop.f32.mrf.mxu0  ;;  %v4285_v17 = vpop.f32.mrf.mxu1  ;;  %v2846_v10 = vsel %vm1757_vm3, %v4277_v59, %v2845_v9 }
 0x20f   : > { %v4290_v2 = vadd.f32 %v2521_v47, %v4280_v5  ;;  %v2841_v60 = vrot.slane %v2032_v21, 7  ;;  %v2833_v31 = vsel %vm1757_vm3, %v2832_v18, %v4198_v40  ;;  %v2827_v34 = vrot.slane %v4285_v17, 7 }
 0x210   : > { %v2600_v55 = vadd.f32 %v2522_v28, %v2442_v27  ;;  %v2788_v37 = vmax.f32 %v2786_v43, %v2757_v0  ;;  %v4295_v6 = vpop.f32.mrf.mxu0  ;;  %v4297_v61 = vpop.f32.mrf.mxu1  ;;  %v2835_v62 = vadd.f32 %v2833_v31, %v2831_v3  ;;  %v2837_v42 = vsel %vm1757_vm3, %v4285_v17, %v2836_v51 }
 0x211   : > { %v2759_v4 = vadd.f32 %v2679_v36, %v4290_v2  ;;  %v2842_v26 = vsel %vm1757_vm3, %v2841_v60, %v4202_v22  ;;  %v2828_v40 = vsel %vm1757_vm3, %v2827_v34, %v4204_v1  ;;  %v2850_v20 = vrot.slane %v4285_v17, 1 }
 0x212   : > { %v2758_v11 = vadd.f32 %v2680_v8, %v2600_v55  ;;  %v2844_v29 = vadd.f32 %v2842_v26, %v2840_v39  ;;  %v2036_v53 = vpop.f32.mrf.mxu0  ;;  %v4308_v50 = vpop.f32.mrf.mxu1  ;;  %v2830_v16 = vadd.f32 %v2828_v40, %v2826_v23  ;;  %v2839_v63 = vadd.f32 %v2837_v42, %v2835_v62 }
 0x213   : > { %v2790_v7 = vsel %vm1583_vm2, %v2759_v4, -inf  ;;  %v2851_v1 = vsel %vm1757_vm3, %v2850_v20, %v2849_v49  ;;  %v2366_v24 = vrot.slane %v2036_v53, 1  ;;  %v2365_v9 = vrot.slane %v2032_v21, 1 }
 0x214   : > { %v2789_v22 = vmax.f32 %v2787_v35, %v2758_v11  ;;  %v2791_v30 = vmax.f32 %v2788_v37, %v2790_v7  ;;  %v2848_v48 = vadd.f32 %v2846_v10, %v2844_v29  ;;  %v2040_v12 = vpop.f32.mrf.mxu0  ;;  %v4312_v13 = vpop.f32.mrf.mxu1  ;;  %v2854_v32 = vmax.f32 %v2830_v16, %v2839_v63 }
 0x215   : > { %v2367_v18 = vsel %vm1265_vm0, %v2365_v9, %v2366_v24  ;;  %v2523_v37 = vrot.slane %v4277_v59, 2  ;;  %v2524_v31 = vrot.slane %v4297_v61, 2  ;;  %v2682_v21 = vrot.slane %v4308_v50, 3 }
 0x216   : > { %v4315_v41 = vmax.f32 %v2789_v22, %v2791_v30  ;;  %v2853_v33 = vadd.f32 %v2851_v1, %v2848_v48  ;;  %v2042_v38 = vpop.f32.mrf.mxu0  ;;  %v4317_v43 = vpop.f32.mrf.mxu1  ;;  %v2444_v3 = vadd.f32 %v2367_v18, %v4275_v54  ;;  %v2526_v4 = vrot.slane %v4312_v13, 2 }
 0x217   : > { %v2368_v51 = vrot.slane %v2042_v38, 1  ;;  %v2684_v11 = vrot.slane %v4317_v43, 3  ;;  %v2681_v59 = vrot.slane %v4285_v17, 3  ;;  %v2525_v42 = vsel %vm1424_vm1, %v2523_v37, %v2524_v31 }
 0x218   : > { %v4319_v44 = vmax.f32 %v2854_v32, %v2853_v33  ;;  %v2044_v45 = vpop.f32.mrf.mxu0  ;;  %v4321_v39 = vpop.f32.mrf.mxu1  ;;  %v2602_v16 = vadd.f32 %v2525_v42, %v2444_v3  ;;  %v2527_v20 = vsel %vm1424_vm1, %v2524_v31, %v2526_v4 }
 0x219   : > { %v2369_v62 = vsel %vm1265_vm0, %v2366_v24, %v2368_v51  ;;  %v2528_v61 = vrot.slane %v4321_v39, 2  ;;  %v2683_v63 = vsel %vm1583_vm2, %v2681_v59, %v2682_v21  ;;  %v2685_v48 = vsel %vm1583_vm2, %v2682_v21, %v2684_v11 }
 0x21a   : > { %v2046_v19 = vpop.f32.mrf.mxu0  ;;  %v4323_v46 = vpop.f32.mrf.mxu1  ;;  %v2445_v17 = vadd.f32 %v2369_v62, %v4295_v6  ;;  %v2760_v24 = vadd.f32 %v2683_v63, %v2602_v16 }
 0x21b   : > { %v2370_v49 = vrot.slane %v2046_v19, 1  ;;  %v2529_v33 = vsel %vm1424_vm1, %v2526_v4, %v2528_v61  ;;  %v2686_v38 = vrot.slane %v4323_v46, 3 }
 0x21c   : > { %v4325_v52 = vpop.f32.mrf.mxu0  ;;  %v4327_v47 = vpop.f32.mrf.mxu1 }
 0x21d   : > { %v2371_v23 = vsel %vm1265_vm0, %v2368_v51, %v2370_v49  ;;  %v2530_v1 = vrot.slane %v4327_v47, 2  ;;  %v2687_v3 = vsel %vm1583_vm2, %v2684_v11, %v2686_v38 }
 0x21e   : > { %v2052_v14 = vpop.f32.mrf.mxu0  ;;  %v4329_v56 = vpop.f32.mrf.mxu1  ;;  %v2446_v13 = vadd.f32 %v2371_v23, %v2040_v12 }
 0x21f   : > { %v2372_v34 = vrot.slane %v2052_v14, 1  ;;  %v2688_v14 = vrot.slane %v4329_v56, 3 }
 0x220   : > { %v4331_v15 = vpop.f32.mrf.mxu0  ;;  %v4333_v58 = vpop.f32.mrf.mxu1  ;;  %v2604_v51 = vadd.f32 %v2529_v33, %v2446_v13 }
 0x221   : > { %v2373_v53 = vsel %vm1265_vm0, %v2370_v49, %v2372_v34  ;;  %v2531_v49 = vsel %vm1424_vm1, %v2528_v61, %v2530_v1  ;;  %v2689_v21 = vsel %vm1583_vm2, %v2686_v38, %v2688_v14 }
 0x222   : > { %v2056_v28 = vpop.f32.mrf.mxu0  ;;  %v4335_v25 = vpop.f32.mrf.mxu1  ;;  %v2447_v43 = vadd.f32 %v2373_v53, %v2044_v45  ;;  %v2762_v53 = vadd.f32 %v2687_v3, %v2604_v51 }
 0x223   : > { %v2374_v29 = vrot.slane %v2056_v28, 1  ;;  %v2532_v28 = vrot.slane %v4333_v58, 2 }
 0x224   : > { %v4337_v36 = vpop.f32.mrf.mxu0  ;;  %v4339_v35 = vpop.f32.mrf.mxu1 }
 0x225   : > { %v2375_v32 = vsel %vm1265_vm0, %v2372_v34, %v2374_v29  ;;  %v2534_v46 = vrot.slane %v4339_v35, 2  ;;  %v2533_v4 = vsel %vm1424_vm1, %v2530_v1, %v2532_v28 }
 0x226   : > { %v2062_v57 = vpop.f32.mrf.mxu0  ;;  %v4341_v8 = vpop.f32.mrf.mxu1  ;;  %v2448_v9 = vadd.f32 %v2375_v32, %v4325_v52 }
 0x227   : > { %v2376_v50 = vrot.slane %v2062_v57, 1  ;;  %v2603_v57 = vadd.f32 %v2527_v20, %v2445_v17 }
 0x228   : > { %v4343_v0 = vpop.f32.mrf.mxu0  ;;  %v4345_v27 = vpop.f32.mrf.mxu1  ;;  %v2606_v62 = vadd.f32 %v2533_v4, %v2448_v9 }
 0x229   : > { %v2377_v12 = vsel %vm1265_vm0, %v2374_v29, %v2376_v50  ;;  %v2536_v56 = vrot.slane %v4345_v27, 2  ;;  %v2690_v27 = vrot.slane %v4335_v25, 3  ;;  %v2535_v29 = vsel %vm1424_vm1, %v2532_v28, %v2534_v46 }
 0x22a   : > { %v2066_v60 = vpop.f32.mrf.mxu0  ;;  %v4348_v55 = vpop.f32.mrf.mxu1  ;;  %v2449_v37 = vadd.f32 %v2377_v12, %v4331_v15  ;;  %v2692_v15 = vrot.slane %v4341_v8, 3  ;;  %v2761_v8 = vadd.f32 %v2685_v48, %v2603_v57 }
 0x22b   : > { %v2378_v7 = vrot.slane %v2066_v60, 1  ;;  %v2605_v60 = vadd.f32 %v2531_v49, %v2447_v43  ;;  %v2537_v23 = vsel %vm1424_vm1, %v2534_v46, %v2536_v56  ;;  %v2694_v11 = vrot.slane %v4348_v55, 3 }
 0x22c   : > { %v4355_v10 = vpop.f32.mrf.mxu0  ;;  %v4357_v26 = vpop.f32.mrf.mxu1  ;;  %v2693_v38 = vsel %vm1583_vm2, %v2690_v27, %v2692_v15 }
 0x22d   : > { %v2379_v47 = vsel %vm1265_vm0, %v2376_v50, %v2378_v7  ;;  %v2763_v25 = vadd.f32 %v2689_v21, %v2605_v60  ;;  %v2607_v50 = vadd.f32 %v2535_v29, %v2449_v37  ;;  %v2695_v43 = vsel %vm1583_vm2, %v2692_v15, %v2694_v11 }
 0x22e   : > { %v2072_v54 = vpop.f32.mrf.mxu0  ;;  %v4364_v40 = vpop.f32.mrf.mxu1  ;;  %v2450_v31 = vadd.f32 %v2379_v47, %v4337_v36  ;;  %v2538_v36 = vrot.slane %v4357_v26, 2  ;;  %v2691_v26 = vsel %vm1583_vm2, %v2688_v14, %v2690_v27 }
 0x22f   : > { %v2380_v39 = vrot.slane %v2072_v54, 1  ;;  %v2764_v13 = vadd.f32 %v2691_v26, %v2606_v62  ;;  %v2800_v14 = vmax.f32 %v2761_v8, %v2763_v25 }
 0x230   : > { %v4371_v22 = vpop.f32.mrf.mxu0  ;;  %v4373_v30 = vpop.f32.mrf.mxu1  ;;  %v2539_v55 = vsel %vm1424_vm1, %v2536_v56, %v2538_v36 }
 0x231   : > { %v2381_v52 = vsel %vm1265_vm0, %v2378_v7, %v2380_v39  ;;  %v2608_v7 = vadd.f32 %v2537_v23, %v2450_v31  ;;  %v2540_v20 = vrot.slane %v4373_v30, 2  ;;  %v2765_v30 = vadd.f32 %v2693_v38, %v2607_v50 }
 0x232   : > { %v4380_v19 = vpop.f32.mrf.mxu0  ;;  %v4382_v6 = vpop.f32.mrf.mxu1  ;;  %v2451_v54 = vadd.f32 %v2381_v52, %v4343_v0  ;;  %v2696_v0 = vrot.slane %v4364_v40, 3 }
 0x233   : > { %v2382_v58 = vrot.slane %v4380_v19, 1  ;;  %v2799_v19 = vmax.f32 %v2760_v24, %v2762_v53  ;;  %v2766_v28 = vadd.f32 %v2695_v43, %v2608_v7  ;;  %v2541_v40 = vsel %vm1424_vm1, %v2538_v36, %v2540_v20 }
 0x234   : > { %v4390_v45 = vpop.f32.mrf.mxu0  ;;  %v4392_v18 = vpop.f32.mrf.mxu1  ;;  %v2609_v48 = vadd.f32 %v2539_v55, %v2451_v54  ;;  %v2697_v51 = vsel %vm1583_vm2, %v2694_v11, %v2696_v0 }
 0x235   : > { %v2383_v42 = vsel %vm1265_vm0, %v2380_v39, %v2382_v58  ;;  %v2801_v46 = vmax.f32 %v2799_v19, %v2764_v13  ;;  %v2542_v56 = vrot.slane %v4392_v18, 2 }
 0x236   : > { %v2082_v34 = vpop.f32.mrf.mxu0  ;;  %v4400_v35 = vpop.f32.mrf.mxu1  ;;  %v2452_v1 = vadd.f32 %v2383_v42, %v4355_v10  ;;  %v2698_v10 = vrot.slane %v4382_v6, 3  ;;  %v4433_v37 = vadd.f32 %v2697_v51, %v2609_v48  ;;  %v2793_v6 = vrot.slane %v4315_v41, 4 }
 0x237   : > { %v2384_v17 = vrot.slane %v2082_v34, 1  ;;  %v2700_v31 = vrot.slane %v4400_v35, 3  ;;  %v2803_v18 = vmax.f32 %v2801_v46, %v2766_v28  ;;  %v2543_v36 = vsel %vm1424_vm1, %v2540_v20, %v2542_v56 }
 0x238   : > { %v2084_v59 = vpop.f32.mrf.mxu0  ;;  %v4409_v61 = vpop.f32.mrf.mxu1  ;;  %v2610_v49 = vadd.f32 %v2541_v40, %v2452_v1  ;;  %v2699_v62 = vsel %vm1583_vm2, %v2696_v0, %v2698_v10 }
 0x239   : > { %v2385_v57 = vsel %vm1265_vm0, %v2382_v58, %v2384_v17  ;;  %v2802_v58 = vmax.f32 %v2800_v14, %v2765_v30  ;;  %v2544_v21 = vrot.slane %v4409_v61, 2  ;;  %v2701_v61 = vsel %vm1583_vm2, %v2698_v10, %v2700_v31 }
 0x23a   : > { %v2086_v16 = vpop.f32.mrf.mxu0  ;;  %v4415_v63 = vpop.f32.mrf.mxu1  ;;  %v2453_v3 = vadd.f32 %v2385_v57, %v4371_v22  ;;  %v2768_v35 = vadd.f32 %v2699_v62, %v2610_v49 }
 0x23b   : > { %v2386_v39 = vrot.slane %v2086_v16, 1  ;;  %v2804_v22 = vmax.f32 %v2802_v58, %v4433_v37  ;;  %v2545_v7 = vsel %vm1424_vm1, %v2542_v56, %v2544_v21  ;;  %v2702_v16 = vrot.slane %v4415_v63, 3 }
 0x23c   : > { %v2090_v32 = vpop.f32.mrf.mxu0  ;;  %v4422_v33 = vpop.f32.mrf.mxu1  ;;  %v2611_v50 = vadd.f32 %v2543_v36, %v2453_v3  ;;  %v2805_v55 = vmax.f32 %v2803_v18, %v2768_v35 }
 0x23d   : > { %v2387_v52 = vsel %vm1265_vm0, %v2384_v17, %v2386_v39  ;;  %v2546_v29 = vrot.slane %v4422_v33, 2  ;;  %v2703_v14 = vsel %vm1583_vm2, %v2700_v31, %v2702_v16 }
 0x23e   : > { %v2092_v12 = vpop.f32.mrf.mxu0  ;;  %v4426_v47 = vpop.f32.mrf.mxu1  ;;  %v2454_v23 = vadd.f32 %v2387_v52, %v4390_v45  ;;  %v2769_v19 = vadd.f32 %v2701_v61, %v2611_v50 }
 0x23f   : > { %v2388_v9 = vrot.slane %v2092_v12, 1  ;;  %v2547_v45 = vsel %vm1424_vm1, %v2544_v21, %v2546_v29 }
 0x240   : > { %v2094_v24 = vpop.f32.mrf.mxu0  ;;  %v2287_v60 = vpop.f32.mrf.mxu1  ;;  %v2612_v0 = vadd.f32 %v2545_v7, %v2454_v23  ;;  %v2806_v52 = vmax.f32 %v2804_v22, %v2769_v19 }
 0x241   : > { %v2389_v34 = vsel %vm1265_vm0, %v2386_v39, %v2388_v9  ;;  %v2548_v53 = vrot.slane %v2287_v60, 2 }
 0x242   : > { %v2096_v4 = vpop.f32.mrf.mxu0  ;;  %v2289_v27 = vpop.f32.mrf.mxu1  ;;  %v2455_v11 = vadd.f32 %v2389_v34, %v2084_v59  ;;  %v2704_v59 = vrot.slane %v4426_v47, 3  ;;  %v2770_v46 = vadd.f32 %v2703_v14, %v2612_v0 }
 0x243   : > { %v2390_v15 = vrot.slane %v2096_v4, 1  ;;  %v2706_v33 = vrot.slane %v2289_v27, 3  ;;  %v2549_v48 = vsel %vm1424_vm1, %v2546_v29, %v2548_v53 }
 0x244   : > { %v2100_v54 = vpop.f32.mrf.mxu0  ;;  %v2293_v42 = vpop.f32.mrf.mxu1  ;;  %v2613_v1 = vadd.f32 %v2547_v45, %v2455_v11  ;;  %v2705_v40 = vsel %vm1583_vm2, %v2702_v16, %v2704_v59  ;;  %v2807_v18 = vmax.f32 %v2805_v55, %v2770_v46  ;;  %v2794_v11 = vmax.f32 %v4315_v41, %v2793_v6  ;;  %v2776_v55 = vld [vmem:[#allocation2] sm:$0x3] }
 0x245   : > { %v2391_v25 = vsel %vm1265_vm0, %v2388_v9, %v2390_v15  ;;  %v2550_v17 = vrot.slane %v2293_v42, 2  ;;  %v2707_v49 = vsel %vm1583_vm2, %v2704_v59, %v2706_v33 }
 0x246   : > { %v2456_v8 = vadd.f32 %v2391_v25, %v2090_v32  ;;  %v2102_v26 = vpop.f32.mrf.mxu0  ;;  %v2295_v20 = vpop.f32.mrf.mxu1  ;;  %v2771_v51 = vadd.f32 %v2705_v40, %v2613_v1  ;;  %v2795_v50 = vrot.slane %v2794_v11, 2 }
 0x247   : > { %v2392_v13 = vrot.slane %v2102_v26, 1  ;;  %v2708_v63 = vrot.slane %v2295_v20, 3  ;;  %v2551_v10 = vsel %vm1424_vm1, %v2548_v53, %v2550_v17 }
 0x248   : > { %v2104_v38 = vpop.f32.mrf.mxu0  ;;  %v2297_v43 = vpop.f32.mrf.mxu1  ;;  %v2614_v30 = vadd.f32 %v2549_v48, %v2456_v8  ;;  %v2808_v62 = vmax.f32 %v2806_v52, %v2771_v51  ;;  %v2796_v8 = vmax.f32 %v2794_v11, %v2795_v50 }
 0x249   : > { %v2393_v39 = vsel %vm1265_vm0, %v2390_v15, %v2392_v13  ;;  %v2871_v32 = vrot.slane %v2104_v38, 7  ;;  %v2552_v57 = vrot.slane %v2297_v43, 2  ;;  %v2709_v60 = vsel %vm1583_vm2, %v2706_v33, %v2708_v63 }
 0x24a   : > { %v2457_v28 = vadd.f32 %v2393_v39, %v2094_v24  ;;  %v2106_v12 = vpop.f32.mrf.mxu0  ;;  %v2299_v47 = vpop.f32.mrf.mxu1  ;;  %v2772_v34 = vadd.f32 %v2707_v49, %v2614_v30  ;;  %v2797_v41 = vrot.slane %v2796_v8, 1  ;;  %v2883_v33 = vstv %s2882_s11 }
 0x24b   : > { %2875 = vst [vmem:[#allocation3 + $0x5] sm:$0x1] %v2871_v32  ;;  %v2394_v9 = vrot.slane %v2106_v12, 1  ;;  %v2710_v24 = vrot.slane %v2299_v47, 3  ;;  %v2553_v21 = vsel %vm1424_vm1, %v2550_v17, %v2552_v57  ;;  %vm2884_vm7 = vcmp.eq.s32.totalorder %v2883_v33, 1 }
 0x24c   : > { %v2615_v56 = vadd.f32 %v2551_v10, %v2457_v28  ;;  %v2798_v59 = vmax.f32 %v2796_v8, %v2797_v41 }
 0x24d   : > { %v2395_v37 = vsel %vm1265_vm0, %v2392_v13, %v2394_v9  ;;  %v2459_v31 = vadd.f32 %v2394_v9, %v2104_v38  ;;  %v2711_v36 = vsel %vm1583_vm2, %v2708_v63, %v2710_v24  ;;  %v2877_v38 = vrot.slane %v4290_v2, 5 }
 0x24e   : > { %v2773_v58 = vadd.f32 %v2709_v60, %v2615_v56  ;;  %v2458_v3 = vadd.f32 %v2395_v37, %v2100_v54  ;;  %v2809_v54 = vmax.f32 %v2807_v18, %v2772_v34 }
 0x24f   : > { %v2617_v4 = vadd.f32 %v2552_v57, %v2459_v31  ;;  %v2865_v27 = vrot.slane %v2459_v31, 7 }
 0x250   : > { %v2616_v29 = vadd.f32 %v2553_v21, %v2458_v3  ;;  %v2810_v22 = vmax.f32 %v2808_v62, %v2773_v58 }
 0x251   : > { %v2859_v15 = vrot.slane %v2617_v4, 7  ;;  %v2866_v35 = vsel %vm1808_vm5, %v2865_v27, %v4280_v5  ;;  %v2775_v23 = vadd.f32 %v2710_v24, %v2617_v4  ;;  %v2878_v13 = vrot.slane %v2617_v4, 4 }
 0x252   : > { %2868 = vst [vmem:[#allocation3 - $0x4] sm:$0xc0] %v2866_v35  ;;  %v2774_v42 = vadd.f32 %v2711_v36, %v2616_v29 }
 0x253   : > { %v2860_v61 = vsel %vm1801_vm6, %v2859_v15, %v4290_v2  ;;  %v2812_v53 = vsel %vm1583_vm2, %v2775_v23, -inf  ;;  %v2879_v48 = vsel %vm1757_vm3, %v2878_v13, %v2877_v38 }
 0x254   : > { %2862 = vst [vmem:[#allocation3 - $0x5] sm:$0x60] %v2860_v61  ;;  %v2811_v25 = vmax.f32 %v2809_v54, %v2774_v42  ;;  %v2813_v5 = vmax.f32 %v2810_v22, %v2812_v53 }
 0x256   : > { %v2814_v7 = vmax.f32 %v2811_v25, %v2813_v5 }
 0x258   : > { %v2815_v16 = vrot.slane %v2814_v7, 4 }
 0x25a   : > { %v2816_v26 = vmax.f32 %v2814_v7, %v2815_v16 }
 0x25c   : > { %v2817_v20 = vrot.slane %v2816_v26, 2 }
 0x25e   : > { %v2818_v6 = vmax.f32 %v2816_v26, %v2817_v20 }
 0x260   : > { %v2819_v45 = vrot.slane %v2818_v6, 1 }
 0x262   : > { %v2820_v17 = vmax.f32 %v2818_v6, %v2819_v45 }
 0x264   : > { %v2823_v0 = vsel %vm1757_vm3, %v2820_v17, %v2798_v59 }
 0x265   : > { %v2825_v1 = vmax.f32 %v2776_v55, %v2823_v0 }
 0x267   : > { %v2856_v43 = vmax.f32 %v2825_v1, %v4319_v44 }
 0x268   : > { %2889 = sbr.rel (%p3117_p11) target bundleno = 1102 (0x44e), region = 64 }
 0x269   : > { %v2881_v39 = vmax.f32 %v2856_v43, %v2879_v48 }
 0x26b   : > { %v2885_v63 = vsel %vm2884_vm7, %v2881_v39, %v2856_v43 }
 0x26c   : > { %2886 = vst [vmem:[#allocation2] sm:$0x3] %v2885_v63 }
 0x26d   : > { %v3118_v19 = vld [vmem:[%s4514_s2] ss:$0 sm:$0xff]  ;;  %vm2899_vm8 = vcmask 1041408   ;;  %v3122_v4 = vld [vmem:[#allocation4] ss:$0 sm:$0xff]  ;;  %vm2954_vm9 = vcmask 1024  }
 0x26e   : > { %v3119_v46 = vld [vmem:[%s4515_s3] ss:$0 sm:$0xff] }
 0x26f   : > { %v3120_v49 = vld [vmem:[%s4516_s4] ss:$0 sm:$0xff] }
 0x270   : > { %v3121_v34 = vld [vmem:[%s4517_s5] ss:$0 sm:$0xff] }
 0x273   : > { %v2890_v32 = vld [vmem:[#allocation2] sm:$0x3] }
 0x274   : > { %v2898_v14 = vadd.f32 %v3118_v19, %v2890_v32 }
 0x276   : > { %v2900_v2 = vsel %vm2899_vm8, %v2898_v14, 0.0 }
 0x277   : > { %2901 = vadd.xlane.f32.xlu0 %v2900_v2 }
 0x300   : > { %v2902_v44 = vpop.xlane.xlu0 %2901 }
 0x301   : > { %v2904_v30 = vmul.f32 0.0078125, %v2902_v44 }
 0x303   : > { %v2905_v28 = vsub.f32 %v2898_v14, %v2904_v30 }
 0x305   : > { %v2906_v12 = vmul.f32 %v2905_v28, %v2905_v28 }
 0x307   : > { %v2907_v47 = vsel %vm2899_vm8, %v2906_v12, 0.0 }
 0x308   : > { %2908 = vadd.xlane.f32.xlu0 %v2907_v47 }
 0x391   : > { %v2909_v40 = vpop.xlane.xlu0 %2908 }
 0x392   : > { %v2910_v10 = vmul.f32 0.0078125, %v2909_v40 }
 0x394   : > { %v2911_v57 = vadd.f32 1e-05, %v2910_v10 }
 0x396   : > { %3302 = vrsqrt.f32 %v2911_v57 }
 0x3a3   : > { %v3303_v9 = vpop.eup %3302 }
 0x3a4   : > { %v2913_v51 = vmul.f32 %v3303_v9, %v2905_v28 }
 0x3a6   : > { %v2921_v56 = vmul.f32 %v3119_v46, %v2913_v51 }
 0x3a8   : > { %v2929_v60 = vadd.f32 %v3120_v49, %v2921_v56 }
 0x3aa   : > { %v2931_v37 = vmul.f32 0.70710677, %v2929_v60  ;;  %v2930_v24 = vmul.f32 0.5, %v2929_v60 }
 0x3ac   : > { %3304 = verf.f32 %v2931_v37 }
 0x3b9   : > { %v3305_v31 = vpop.eup %3304 }
 0x3ba   : > { %v2933_v52 = vadd.f32 1.0, %v3305_v31 }
 0x3bc   : > { %v2934_v58 = vmul.f32 %v2933_v52, %v2930_v24 }
 0x3be   : > { %v2942_v3 = vmul.f32 %v3121_v34, %v2934_v58 }
 0x3c0   : > { %v2943_v21 = vsel %vm2899_vm8, %v2942_v3, 0.0 }
 0x3c1   : > { %2944 = vadd.xlane.f32.xlu1 %v2943_v21 }
 0x44a   : > { %v2945_v27 = vpop.xlane.xlu1 %2944 }
 0x44b   : > { %v2953_v18 = vadd.f32 %v3122_v4, %v2945_v27 }
 0x44d   : > { %2955 = vst.msk [vmem:[%s4519_s7] sm:$0x3] %vm2954_vm9, %v2953_v18 }
 0x44e PF: > { %s23_s8 = sadd.s32 1, %s3386_s8   ;;  %s4552_s26 = smov %s3370_s27 }
 0x44f   : > { %p20_p12 = scmp.ge.s32.totalorder %s23_s8, 4   ;;  %s4553_s27 = smov %s3374_s28 }
 0x450   : > { %s4554_s28 = smov %s3498_s15  ;;  %s4555_s29 = smov %s3382_s30 }
 0x451   : > { %s4556_s30 = smov %s4558_s9  ;;  %22 = sbr.rel (!%p20_p12) target bundleno = 8 (0x8), region = 107 }
 0x456   :  { %2975 = vsyncpa [#allocation6], 1 }
 0x457   :  { %2977 = vsyncpa [#allocation6 + $0x1], 1 }
 0x458   :  { %2978 = vsyncpa [#allocation8], 1 }

</bundles_post_ra>
